<compile_context>
chip_gen: v7x
topology: tpu7x:2x2x1
jax: 0.10.0
libtpu: 0.0.40
codegen_flags: <defaults>
</compile_context>

<pallas_src>
import jax
import jax.numpy as jnp
from jax.experimental import pallas as pl
from jax.experimental.pallas import tpu as pltpu

SLAB_H, SLAB_W = 34, 128   # 32x32 spatial (+2 rows of headroom for di row shifts)
KPAD = 768                 # Linear K padded to 24 groups of 32 lanes (22*22 -> 768)


def nn_kernel(x_ref, w1v_ref, b1_ref, w2v_ref, b2_ref, wlin_hbm, blin_ref,
              out_ref, wlin_vmem, wlin_sem, bufA, bufB, flat_ref):
    """Single-invocation kernel.

    x_ref     : (34, 128) f32 VMEM   lane-packed input: [i, 32c+j] = x[c, i, j], rest 0
    w1v_ref   : (27, 1, 128) f32 VMEM conv1 weights: [o*9+di*3+dj, 0, 32c+j] = W1[o,c,di,dj]
    b1_ref    : (3,)  f32 SMEM       conv1 bias
    w2v_ref   : (9, 1, 128) f32 VMEM conv2 weights (same packing, cout=1)
    b2_ref    : (1,)  f32 SMEM       conv2 bias
    wlin_hbm  : (768, 512) bf16 HBM  Linear weight, row 32i+j = W[n, 22i+j] (pad rows = 0)
    blin_ref  : (1, 512) f32 VMEM    Linear bias
    out_ref   : (1, 512) f32 VMEM    output (pre-squeeze)
    wlin_vmem : (768, 512) bf16 VMEM scratch target of the overlapped weight DMA
    wlin_sem  : DMA semaphore
    bufA/B    : (34, 128) f32 VMEM   ping-pong activation slabs
    flat_ref  : (1, 768) f32 VMEM    32-lane-grouped flattened activations
    """
    # Kick off the big Linear-weight DMA first; it is only needed at the very end,
    # so it overlaps the whole conv/pool stack.
    wcopy = pltpu.make_async_copy(wlin_hbm, wlin_vmem, wlin_sem)
    wcopy.start()

    zero_slab = jnp.zeros((SLAB_H, SLAB_W), jnp.float32)
    bufA[...] = zero_slab          # margins (rows 32..33) must stay finite/zero
    bufB[...] = zero_slab

    # Lane-group mask: lanes 0..31 (computed once, reused by every conv epilogue).
    lane_lt32 = jax.lax.broadcasted_iota(jnp.int32, (32, SLAB_W), 1) < 32

    def conv(src, dst, cout, wv_ref, b_ref):
        # Valid 3x3 conv (cross-correlation) on the lane-packed slab, all channels at once.
        accs = [None] * cout
        for di in range(3):
            base = src[di:di + 32, 0:128]                      # aligned (32,128) row-shifted tile
            for dj in range(3):
                # dj lane shift via XLU roll; wrapped lanes only reach the zero-weighted pad group.
                s = base if dj == 0 else pltpu.roll(base, shift=128 - dj, axis=1)
                for o in range(cout):
                    w = wv_ref[o * 9 + di * 3 + dj]            # (1,128) lane-broadcast weights
                    contrib = w * s
                    accs[o] = contrib if accs[o] is None else accs[o] + contrib
        # Epilogue: cross-channel reduce, bias, place channel o at lanes [32o, 32o+32),
        # combine into ONE dense (32,128) tile, single dense store.
        tile = None
        for o in range(cout):
            a = accs[o]
            r = a + pltpu.roll(a, shift=96, axis=1) + pltpu.roll(a, shift=64, axis=1)
            g = jnp.where(lane_lt32, r + b_ref[o], 0.0)        # valid sum+bias in lanes 0..31
            if o > 0:
                g = pltpu.roll(g, shift=32 * o, axis=1)        # place at lane group o
            tile = g if tile is None else tile + g
        dst[0:32, 0:128] = tile

    def pool(src, dst):
        # MaxPool2d(kernel=2, stride=1); lane+1 shift via roll (wrap only hits garbage lanes).
        m = jnp.maximum(src[0:32, 0:128], src[1:33, 0:128])
        dst[0:32, 0:128] = jnp.maximum(m, pltpu.roll(m, shift=127, axis=1))

    conv(x_ref, bufA, 3, w1v_ref, b1_ref)   # 32 -> 30
    conv(bufA, bufB, 3, w1v_ref, b1_ref)    # 30 -> 28
    pool(bufB, bufA)                        # 28 -> 27
    conv(bufA, bufB, 3, w1v_ref, b1_ref)    # 27 -> 25
    conv(bufB, bufA, 1, w2v_ref, b2_ref)    # 25 -> 23  (single output channel, lanes 0..31)
    pool(bufA, bufB)                        # 23 -> 22, valid result = bufB[0:22, 0:22]

    # 32-lane-aligned flatten: flat[0, 32i+j] = pooled[i, j]; pad lanes hit zero weight rows.
    flat_ref[...] = jnp.zeros((1, KPAD), jnp.float32)
    for i in range(22):
        flat_ref[0:1, 32 * i:32 * i + 32] = bufB[i:i + 1, 0:32]

    # Wait for the overlapped weight DMA only now, then ONE bf16 MXU matmul (f32 accumulate).
    wcopy.wait()
    flat_bf = flat_ref[...].astype(jnp.bfloat16)
    y = jnp.dot(flat_bf, wlin_vmem[...], preferred_element_type=jnp.float32)
    out_ref[...] = jnp.maximum(y + blin_ref[...], 0.0)


def pack_input(xp):
    """(3, 32, 32) CHW -> (34, 128) lane-packed slab: [i, 32c+j] = xp[c, i, j], rest 0."""
    slab = jnp.zeros((SLAB_H, SLAB_W), jnp.float32)
    x_icj = jnp.transpose(xp, (1, 0, 2)).reshape(32, 96)   # [i, 32c+j] = xp[c, i, j]
    return slab.at[:32, :96].set(x_icj)


def pack_conv_weights(w):
    """(cout, cin, 3, 3) -> (cout*9, 1, 128): [o*9+di*3+dj, 0, 32c+j] = w[o,c,di,dj] (c>=cin -> 0)."""
    cout, cin = w.shape[0], w.shape[1]
    wt = jnp.transpose(w, (0, 2, 3, 1)).astype(jnp.float32)        # (cout, 3, 3, cin)
    wt = jnp.repeat(wt[..., None], 32, axis=-1)                    # (cout, 3, 3, cin, 32)
    pad = jnp.zeros((cout, 3, 3, 4 - cin, 32), jnp.float32)
    wv = jnp.concatenate([wt, pad], axis=3)                        # (cout, 3, 3, 4, 32)
    return wv.reshape(cout * 9, 1, 128)


def make_params(key):
    k1, k2, k3, k4, k5, k6 = jax.random.split(key, 6)
    u = lambda k, s: jax.random.uniform(k, s, jnp.float32, -0.1, 0.1)
    w1 = u(k1, (3, 3, 3, 3))     # conv1: Conv2d(3, 3, 3)
    b1 = u(k2, (3,))
    w2 = u(k3, (1, 3, 3, 3))     # conv2: Conv2d(3, 1, 3)
    b2 = u(k4, (1,))
    wl = u(k5, (512, 484))       # Linear(22*22, 512), PyTorch (out, in) layout
    bl = u(k6, (512,))
    return w1, b1, w2, b2, wl, bl


def prepare_params(params):
    """One-time host-side packing (hoisted out of the inference path)."""
    w1, b1, w2, b2, wl, bl = params
    wv1 = pack_conv_weights(w1)                                    # (27, 1, 128) f32
    wv2 = pack_conv_weights(w2)                                    # (9, 1, 128)  f32
    # Linear weight in 32-lane-group order: row 32i+j <- W[n, 22i+j], pad rows zero, bf16 in HBM.
    wl3 = wl.T.reshape(22, 22, 512)                                # [i, j, n]
    wl3p = jnp.pad(wl3, ((0, 2), (0, 10), (0, 0)))                 # (24, 32, 512)
    wlin = wl3p.reshape(KPAD, 512).astype(jnp.bfloat16)            # (768, 512) bf16
    blin = bl.reshape(1, 512).astype(jnp.float32)
    return (wv1, b1.astype(jnp.float32), wv2, b2.astype(jnp.float32), wlin, blin)


@jax.jit
def forward_pallas(x, packed):
    wv1, b1, wv2, b2, wlin, blin = packed
    # glue: torch.reshape(x, (32,32,3)).permute(2,0,1) -> (3, 32, 32) CHW, then lane-pack.
    xp = jnp.transpose(jnp.reshape(x.astype(jnp.float32), (32, 32, 3)), (2, 0, 1))
    xslab = pack_input(xp)

    out = pl.pallas_call(
        nn_kernel,
        out_shape=jax.ShapeDtypeStruct((1, 512), jnp.float32),
        in_specs=[
            pl.BlockSpec(memory_space=pltpu.MemorySpace.VMEM),   # packed input slab
            pl.BlockSpec(memory_space=pltpu.MemorySpace.VMEM),   # conv1 lane-weights
            pl.BlockSpec(memory_space=pltpu.MemorySpace.SMEM),   # conv1 bias
            pl.BlockSpec(memory_space=pltpu.MemorySpace.VMEM),   # conv2 lane-weights
            pl.BlockSpec(memory_space=pltpu.MemorySpace.SMEM),   # conv2 bias
            pl.BlockSpec(memory_space=pl.ANY),                   # Linear weight stays in HBM
            pl.BlockSpec(memory_space=pltpu.MemorySpace.VMEM),   # linear bias (1,512)
        ],
        out_specs=pl.BlockSpec(memory_space=pltpu.MemorySpace.VMEM),
        scratch_shapes=[
            pltpu.VMEM((KPAD, 512), jnp.bfloat16),    # VMEM target of the overlapped weight DMA
            pltpu.SemaphoreType.DMA(()),              # its completion semaphore
            pltpu.VMEM((SLAB_H, SLAB_W), jnp.float32),   # bufA
            pltpu.VMEM((SLAB_H, SLAB_W), jnp.float32),   # bufB
            pltpu.VMEM((1, KPAD), jnp.float32),          # flattened activations
        ],
    )(xslab, wv1, b1, wv2, b2, wlin, blin)
    return out[0]   # squeeze -> (512,)


def forward_reference(x, params):
    """Pure-JAX (XLA) reference of the PyTorch forward for a correctness check."""
    w1, b1, w2, b2, wl, bl = params
    xp = jnp.transpose(jnp.reshape(x.astype(jnp.float32), (32, 32, 3)), (2, 0, 1))[None]

    def conv(inp, w, b):
        o = jax.lax.conv_general_dilated(inp, w, (1, 1), 'VALID',
                                         dimension_numbers=('NCHW', 'OIHW', 'NCHW'))
        return o + b[None, :, None, None]

    def pool(inp):  # MaxPool2d(2, stride=1), as in the module
        return jax.lax.reduce_window(inp, -jnp.inf, jax.lax.max,
                                     (1, 1, 2, 2), (1, 1, 1, 1), 'VALID')

    h = conv(xp, w1, b1)
    h = conv(h, w1, b1)
    h = pool(h)
    h = conv(h, w1, b1)
    h = conv(h, w2, b2)
    h = pool(h)                       # (1, 1, 22, 22)
    flat = h.reshape(1, 484)
    out = jnp.maximum(flat @ wl.T + bl[None, :], 0.0)
    return out[0]


if __name__ == "__main__":
    key = jax.random.PRNGKey(0)
    pkey, xkey = jax.random.split(key)
    params = make_params(pkey)
    packed = prepare_params(params)   # one-time packing, outside the inference path
    # x has 32*32*3 = 3072 elements, as required by torch.reshape(x, (32, 32, 3))
    x = jax.random.uniform(xkey, (32, 32, 3), jnp.float32, -1.0, 1.0)

    out = jax.block_until_ready(forward_pallas(x, packed))
    ref = jax.block_until_ready(forward_reference(x, params))

    assert out.shape == (512,)
    # bf16 is used only for HBM/MXU storage of the Linear weight + flattened activations
    # (f32 accumulate); error stays well inside the original 2e-3 check.
    assert jnp.allclose(out, ref, atol=2e-3, rtol=2e-3), (
        f"max abs diff = {float(jnp.max(jnp.abs(out - ref)))}")
    print("KERNEL_OK")
</pallas_src>

<mosaic_0001>
module attributes {stable_mosaic.version = 11 : i64} {
  func.func @nn_kernel(%arg0: memref<34x128xf32, #tpu.memory_space<vmem>>, %arg1: memref<27x1x128xf32, #tpu.memory_space<vmem>>, %arg2: memref<3xf32, #tpu.memory_space<smem>>, %arg3: memref<9x1x128xf32, #tpu.memory_space<vmem>>, %arg4: memref<1xf32, #tpu.memory_space<smem>>, %arg5: memref<768x512xbf16, #tpu.memory_space<any>>, %arg6: memref<1x512xf32, #tpu.memory_space<vmem>>, %arg7: memref<1x512xf32, #tpu.memory_space<vmem>>, %arg8: memref<768x512xbf16, #tpu.memory_space<vmem>>, %arg9: memref<!tpu.dma_semaphore, #tpu.memory_space<semaphore_mem>>, %arg10: memref<34x128xf32, #tpu.memory_space<vmem>>, %arg11: memref<34x128xf32, #tpu.memory_space<vmem>>, %arg12: memref<1x768xf32, #tpu.memory_space<vmem>>) attributes {dimension_semantics = [], scalar_prefetch = 0 : i64, scratch_operands = 5 : i64, tpu.core_type = #tpu.core_type<tc>} {
    tpu.enqueue_dma source(%arg5 : memref<768x512xbf16, #tpu.memory_space<any>>) target(%arg8 : memref<768x512xbf16, #tpu.memory_space<vmem>>) target_semaphore(%arg9 : memref<!tpu.dma_semaphore, #tpu.memory_space<semaphore_mem>>)
    %cst = arith.constant 0.000000e+00 : f32
    %0 = vector.broadcast %cst : f32 to vector<34x128xf32>
    %c0 = arith.constant 0 : index
    %c0_0 = arith.constant 0 : index
    %1 = vector.load %arg10[%c0, %c0_0] : memref<34x128xf32, #tpu.memory_space<vmem>>, vector<34x128xf32>
    tpu.vector_store %arg10[%c0, %c0_0], %0 {strides = array<i32>} : memref<34x128xf32, #tpu.memory_space<vmem>>, vector<34x128xf32>,
    %c0_1 = arith.constant 0 : index
    %c0_2 = arith.constant 0 : index
    %2 = vector.load %arg11[%c0_1, %c0_2] : memref<34x128xf32, #tpu.memory_space<vmem>>, vector<34x128xf32>
    tpu.vector_store %arg11[%c0_1, %c0_2], %0 {strides = array<i32>} : memref<34x128xf32, #tpu.memory_space<vmem>>, vector<34x128xf32>,
    %3 = tpu.iota {dimensions = array<i32: 1>} : vector<32x128xi32>
    %c32_i32 = arith.constant 32 : i32
    %4 = vector.broadcast %c32_i32 : i32 to vector<32x128xi32>
    %5 = arith.cmpi slt, %3, %4 : vector<32x128xi32>
    %c0_3 = arith.constant 0 : index
    %c0_4 = arith.constant 0 : index
    %6 = vector.load %arg0[%c0_3, %c0_4] : memref<34x128xf32, #tpu.memory_space<vmem>>, vector<32x128xf32>
    %c0_5 = arith.constant 0 : index
    %c0_6 = arith.constant 0 : index
    %c0_7 = arith.constant 0 : index
    %7 = vector.load %arg1[%c0_5, %c0_6, %c0_7] : memref<27x1x128xf32, #tpu.memory_space<vmem>>, vector<1x1x128xf32>
    %8 = vector.shape_cast %7 : vector<1x1x128xf32> to vector<1x128xf32>
    %9 = vector.broadcast %8 : vector<1x128xf32> to vector<32x128xf32>
    %10 = arith.mulf %9, %6 : vector<32x128xf32>
    %c9 = arith.constant 9 : index
    %c0_8 = arith.constant 0 : index
    %c0_9 = arith.constant 0 : index
    %11 = vector.load %arg1[%c9, %c0_8, %c0_9] : memref<27x1x128xf32, #tpu.memory_space<vmem>>, vector<1x1x128xf32>
    %12 = vector.shape_cast %11 : vector<1x1x128xf32> to vector<1x128xf32>
    %13 = vector.broadcast %12 : vector<1x128xf32> to vector<32x128xf32>
    %14 = arith.mulf %13, %6 : vector<32x128xf32>
    %c18 = arith.constant 18 : index
    %c0_10 = arith.constant 0 : index
    %c0_11 = arith.constant 0 : index
    %15 = vector.load %arg1[%c18, %c0_10, %c0_11] : memref<27x1x128xf32, #tpu.memory_space<vmem>>, vector<1x1x128xf32>
    %16 = vector.shape_cast %15 : vector<1x1x128xf32> to vector<1x128xf32>
    %17 = vector.broadcast %16 : vector<1x128xf32> to vector<32x128xf32>
    %18 = arith.mulf %17, %6 : vector<32x128xf32>
    %c127_i32 = arith.constant 127 : i32
    %19 = tpu.dynamic_rotate %6 by %c127_i32 dim 1 : vector<32x128xf32>, i32 -> vector<32x128xf32>
    %c1 = arith.constant 1 : index
    %c0_12 = arith.constant 0 : index
    %c0_13 = arith.constant 0 : index
    %20 = vector.load %arg1[%c1, %c0_12, %c0_13] : memref<27x1x128xf32, #tpu.memory_space<vmem>>, vector<1x1x128xf32>
    %21 = vector.shape_cast %20 : vector<1x1x128xf32> to vector<1x128xf32>
    %22 = vector.broadcast %21 : vector<1x128xf32> to vector<32x128xf32>
    %23 = arith.mulf %22, %19 : vector<32x128xf32>
    %24 = arith.addf %10, %23 : vector<32x128xf32>
    %c10 = arith.constant 10 : index
    %c0_14 = arith.constant 0 : index
    %c0_15 = arith.constant 0 : index
    %25 = vector.load %arg1[%c10, %c0_14, %c0_15] : memref<27x1x128xf32, #tpu.memory_space<vmem>>, vector<1x1x128xf32>
    %26 = vector.shape_cast %25 : vector<1x1x128xf32> to vector<1x128xf32>
    %27 = vector.broadcast %26 : vector<1x128xf32> to vector<32x128xf32>
    %28 = arith.mulf %27, %19 : vector<32x128xf32>
    %29 = arith.addf %14, %28 : vector<32x128xf32>
    %c19 = arith.constant 19 : index
    %c0_16 = arith.constant 0 : index
    %c0_17 = arith.constant 0 : index
    %30 = vector.load %arg1[%c19, %c0_16, %c0_17] : memref<27x1x128xf32, #tpu.memory_space<vmem>>, vector<1x1x128xf32>
    %31 = vector.shape_cast %30 : vector<1x1x128xf32> to vector<1x128xf32>
    %32 = vector.broadcast %31 : vector<1x128xf32> to vector<32x128xf32>
    %33 = arith.mulf %32, %19 : vector<32x128xf32>
    %34 = arith.addf %18, %33 : vector<32x128xf32>
    %c126_i32 = arith.constant 126 : i32
    %35 = tpu.dynamic_rotate %6 by %c126_i32 dim 1 : vector<32x128xf32>, i32 -> vector<32x128xf32>
    %c2 = arith.constant 2 : index
    %c0_18 = arith.constant 0 : index
    %c0_19 = arith.constant 0 : index
    %36 = vector.load %arg1[%c2, %c0_18, %c0_19] : memref<27x1x128xf32, #tpu.memory_space<vmem>>, vector<1x1x128xf32>
    %37 = vector.shape_cast %36 : vector<1x1x128xf32> to vector<1x128xf32>
    %38 = vector.broadcast %37 : vector<1x128xf32> to vector<32x128xf32>
    %39 = arith.mulf %38, %35 : vector<32x128xf32>
    %40 = arith.addf %24, %39 : vector<32x128xf32>
    %c11 = arith.constant 11 : index
    %c0_20 = arith.constant 0 : index
    %c0_21 = arith.constant 0 : index
    %41 = vector.load %arg1[%c11, %c0_20, %c0_21] : memref<27x1x128xf32, #tpu.memory_space<vmem>>, vector<1x1x128xf32>
    %42 = vector.shape_cast %41 : vector<1x1x128xf32> to vector<1x128xf32>
    %43 = vector.broadcast %42 : vector<1x128xf32> to vector<32x128xf32>
    %44 = arith.mulf %43, %35 : vector<32x128xf32>
    %45 = arith.addf %29, %44 : vector<32x128xf32>
    %c20 = arith.constant 20 : index
    %c0_22 = arith.constant 0 : index
    %c0_23 = arith.constant 0 : index
    %46 = vector.load %arg1[%c20, %c0_22, %c0_23] : memref<27x1x128xf32, #tpu.memory_space<vmem>>, vector<1x1x128xf32>
    %47 = vector.shape_cast %46 : vector<1x1x128xf32> to vector<1x128xf32>
    %48 = vector.broadcast %47 : vector<1x128xf32> to vector<32x128xf32>
    %49 = arith.mulf %48, %35 : vector<32x128xf32>
    %50 = arith.addf %34, %49 : vector<32x128xf32>
    %c1_24 = arith.constant 1 : index
    %c0_25 = arith.constant 0 : index
    %51 = vector.load %arg0[%c1_24, %c0_25] : memref<34x128xf32, #tpu.memory_space<vmem>>, vector<32x128xf32>
    %c3 = arith.constant 3 : index
    %c0_26 = arith.constant 0 : index
    %c0_27 = arith.constant 0 : index
    %52 = vector.load %arg1[%c3, %c0_26, %c0_27] : memref<27x1x128xf32, #tpu.memory_space<vmem>>, vector<1x1x128xf32>
    %53 = vector.shape_cast %52 : vector<1x1x128xf32> to vector<1x128xf32>
    %54 = vector.broadcast %53 : vector<1x128xf32> to vector<32x128xf32>
    %55 = arith.mulf %54, %51 : vector<32x128xf32>
    %56 = arith.addf %40, %55 : vector<32x128xf32>
    %c12 = arith.constant 12 : index
    %c0_28 = arith.constant 0 : index
    %c0_29 = arith.constant 0 : index
    %57 = vector.load %arg1[%c12, %c0_28, %c0_29] : memref<27x1x128xf32, #tpu.memory_space<vmem>>, vector<1x1x128xf32>
    %58 = vector.shape_cast %57 : vector<1x1x128xf32> to vector<1x128xf32>
    %59 = vector.broadcast %58 : vector<1x128xf32> to vector<32x128xf32>
    %60 = arith.mulf %59, %51 : vector<32x128xf32>
    %61 = arith.addf %45, %60 : vector<32x128xf32>
    %c21 = arith.constant 21 : index
    %c0_30 = arith.constant 0 : index
    %c0_31 = arith.constant 0 : index
    %62 = vector.load %arg1[%c21, %c0_30, %c0_31] : memref<27x1x128xf32, #tpu.memory_space<vmem>>, vector<1x1x128xf32>
    %63 = vector.shape_cast %62 : vector<1x1x128xf32> to vector<1x128xf32>
    %64 = vector.broadcast %63 : vector<1x128xf32> to vector<32x128xf32>
    %65 = arith.mulf %64, %51 : vector<32x128xf32>
    %66 = arith.addf %50, %65 : vector<32x128xf32>
    %c127_i32_32 = arith.constant 127 : i32
    %67 = tpu.dynamic_rotate %51 by %c127_i32_32 dim 1 : vector<32x128xf32>, i32 -> vector<32x128xf32>
    %c4 = arith.constant 4 : index
    %c0_33 = arith.constant 0 : index
    %c0_34 = arith.constant 0 : index
    %68 = vector.load %arg1[%c4, %c0_33, %c0_34] : memref<27x1x128xf32, #tpu.memory_space<vmem>>, vector<1x1x128xf32>
    %69 = vector.shape_cast %68 : vector<1x1x128xf32> to vector<1x128xf32>
    %70 = vector.broadcast %69 : vector<1x128xf32> to vector<32x128xf32>
    %71 = arith.mulf %70, %67 : vector<32x128xf32>
    %72 = arith.addf %56, %71 : vector<32x128xf32>
    %c13 = arith.constant 13 : index
    %c0_35 = arith.constant 0 : index
    %c0_36 = arith.constant 0 : index
    %73 = vector.load %arg1[%c13, %c0_35, %c0_36] : memref<27x1x128xf32, #tpu.memory_space<vmem>>, vector<1x1x128xf32>
    %74 = vector.shape_cast %73 : vector<1x1x128xf32> to vector<1x128xf32>
    %75 = vector.broadcast %74 : vector<1x128xf32> to vector<32x128xf32>
    %76 = arith.mulf %75, %67 : vector<32x128xf32>
    %77 = arith.addf %61, %76 : vector<32x128xf32>
    %c22 = arith.constant 22 : index
    %c0_37 = arith.constant 0 : index
    %c0_38 = arith.constant 0 : index
    %78 = vector.load %arg1[%c22, %c0_37, %c0_38] : memref<27x1x128xf32, #tpu.memory_space<vmem>>, vector<1x1x128xf32>
    %79 = vector.shape_cast %78 : vector<1x1x128xf32> to vector<1x128xf32>
    %80 = vector.broadcast %79 : vector<1x128xf32> to vector<32x128xf32>
    %81 = arith.mulf %80, %67 : vector<32x128xf32>
    %82 = arith.addf %66, %81 : vector<32x128xf32>
    %c126_i32_39 = arith.constant 126 : i32
    %83 = tpu.dynamic_rotate %51 by %c126_i32_39 dim 1 : vector<32x128xf32>, i32 -> vector<32x128xf32>
    %c5 = arith.constant 5 : index
    %c0_40 = arith.constant 0 : index
    %c0_41 = arith.constant 0 : index
    %84 = vector.load %arg1[%c5, %c0_40, %c0_41] : memref<27x1x128xf32, #tpu.memory_space<vmem>>, vector<1x1x128xf32>
    %85 = vector.shape_cast %84 : vector<1x1x128xf32> to vector<1x128xf32>
    %86 = vector.broadcast %85 : vector<1x128xf32> to vector<32x128xf32>
    %87 = arith.mulf %86, %83 : vector<32x128xf32>
    %88 = arith.addf %72, %87 : vector<32x128xf32>
    %c14 = arith.constant 14 : index
    %c0_42 = arith.constant 0 : index
    %c0_43 = arith.constant 0 : index
    %89 = vector.load %arg1[%c14, %c0_42, %c0_43] : memref<27x1x128xf32, #tpu.memory_space<vmem>>, vector<1x1x128xf32>
    %90 = vector.shape_cast %89 : vector<1x1x128xf32> to vector<1x128xf32>
    %91 = vector.broadcast %90 : vector<1x128xf32> to vector<32x128xf32>
    %92 = arith.mulf %91, %83 : vector<32x128xf32>
    %93 = arith.addf %77, %92 : vector<32x128xf32>
    %c23 = arith.constant 23 : index
    %c0_44 = arith.constant 0 : index
    %c0_45 = arith.constant 0 : index
    %94 = vector.load %arg1[%c23, %c0_44, %c0_45] : memref<27x1x128xf32, #tpu.memory_space<vmem>>, vector<1x1x128xf32>
    %95 = vector.shape_cast %94 : vector<1x1x128xf32> to vector<1x128xf32>
    %96 = vector.broadcast %95 : vector<1x128xf32> to vector<32x128xf32>
    %97 = arith.mulf %96, %83 : vector<32x128xf32>
    %98 = arith.addf %82, %97 : vector<32x128xf32>
    %c2_46 = arith.constant 2 : index
    %c0_47 = arith.constant 0 : index
    %99 = vector.load %arg0[%c2_46, %c0_47] : memref<34x128xf32, #tpu.memory_space<vmem>>, vector<32x128xf32>
    %c6 = arith.constant 6 : index
    %c0_48 = arith.constant 0 : index
    %c0_49 = arith.constant 0 : index
    %100 = vector.load %arg1[%c6, %c0_48, %c0_49] : memref<27x1x128xf32, #tpu.memory_space<vmem>>, vector<1x1x128xf32>
    %101 = vector.shape_cast %100 : vector<1x1x128xf32> to vector<1x128xf32>
    %102 = vector.broadcast %101 : vector<1x128xf32> to vector<32x128xf32>
    %103 = arith.mulf %102, %99 : vector<32x128xf32>
    %104 = arith.addf %88, %103 : vector<32x128xf32>
    %c15 = arith.constant 15 : index
    %c0_50 = arith.constant 0 : index
    %c0_51 = arith.constant 0 : index
    %105 = vector.load %arg1[%c15, %c0_50, %c0_51] : memref<27x1x128xf32, #tpu.memory_space<vmem>>, vector<1x1x128xf32>
    %106 = vector.shape_cast %105 : vector<1x1x128xf32> to vector<1x128xf32>
    %107 = vector.broadcast %106 : vector<1x128xf32> to vector<32x128xf32>
    %108 = arith.mulf %107, %99 : vector<32x128xf32>
    %109 = arith.addf %93, %108 : vector<32x128xf32>
    %c24 = arith.constant 24 : index
    %c0_52 = arith.constant 0 : index
    %c0_53 = arith.constant 0 : index
    %110 = vector.load %arg1[%c24, %c0_52, %c0_53] : memref<27x1x128xf32, #tpu.memory_space<vmem>>, vector<1x1x128xf32>
    %111 = vector.shape_cast %110 : vector<1x1x128xf32> to vector<1x128xf32>
    %112 = vector.broadcast %111 : vector<1x128xf32> to vector<32x128xf32>
    %113 = arith.mulf %112, %99 : vector<32x128xf32>
    %114 = arith.addf %98, %113 : vector<32x128xf32>
    %c127_i32_54 = arith.constant 127 : i32
    %115 = tpu.dynamic_rotate %99 by %c127_i32_54 dim 1 : vector<32x128xf32>, i32 -> vector<32x128xf32>
    %c7 = arith.constant 7 : index
    %c0_55 = arith.constant 0 : index
    %c0_56 = arith.constant 0 : index
    %116 = vector.load %arg1[%c7, %c0_55, %c0_56] : memref<27x1x128xf32, #tpu.memory_space<vmem>>, vector<1x1x128xf32>
    %117 = vector.shape_cast %116 : vector<1x1x128xf32> to vector<1x128xf32>
    %118 = vector.broadcast %117 : vector<1x128xf32> to vector<32x128xf32>
    %119 = arith.mulf %118, %115 : vector<32x128xf32>
    %120 = arith.addf %104, %119 : vector<32x128xf32>
    %c16 = arith.constant 16 : index
    %c0_57 = arith.constant 0 : index
    %c0_58 = arith.constant 0 : index
    %121 = vector.load %arg1[%c16, %c0_57, %c0_58] : memref<27x1x128xf32, #tpu.memory_space<vmem>>, vector<1x1x128xf32>
    %122 = vector.shape_cast %121 : vector<1x1x128xf32> to vector<1x128xf32>
    %123 = vector.broadcast %122 : vector<1x128xf32> to vector<32x128xf32>
    %124 = arith.mulf %123, %115 : vector<32x128xf32>
    %125 = arith.addf %109, %124 : vector<32x128xf32>
    %c25 = arith.constant 25 : index
    %c0_59 = arith.constant 0 : index
    %c0_60 = arith.constant 0 : index
    %126 = vector.load %arg1[%c25, %c0_59, %c0_60] : memref<27x1x128xf32, #tpu.memory_space<vmem>>, vector<1x1x128xf32>
    %127 = vector.shape_cast %126 : vector<1x1x128xf32> to vector<1x128xf32>
    %128 = vector.broadcast %127 : vector<1x128xf32> to vector<32x128xf32>
    %129 = arith.mulf %128, %115 : vector<32x128xf32>
    %130 = arith.addf %114, %129 : vector<32x128xf32>
    %c126_i32_61 = arith.constant 126 : i32
    %131 = tpu.dynamic_rotate %99 by %c126_i32_61 dim 1 : vector<32x128xf32>, i32 -> vector<32x128xf32>
    %c8 = arith.constant 8 : index
    %c0_62 = arith.constant 0 : index
    %c0_63 = arith.constant 0 : index
    %132 = vector.load %arg1[%c8, %c0_62, %c0_63] : memref<27x1x128xf32, #tpu.memory_space<vmem>>, vector<1x1x128xf32>
    %133 = vector.shape_cast %132 : vector<1x1x128xf32> to vector<1x128xf32>
    %134 = vector.broadcast %133 : vector<1x128xf32> to vector<32x128xf32>
    %135 = arith.mulf %134, %131 : vector<32x128xf32>
    %136 = arith.addf %120, %135 : vector<32x128xf32>
    %c17 = arith.constant 17 : index
    %c0_64 = arith.constant 0 : index
    %c0_65 = arith.constant 0 : index
    %137 = vector.load %arg1[%c17, %c0_64, %c0_65] : memref<27x1x128xf32, #tpu.memory_space<vmem>>, vector<1x1x128xf32>
    %138 = vector.shape_cast %137 : vector<1x1x128xf32> to vector<1x128xf32>
    %139 = vector.broadcast %138 : vector<1x128xf32> to vector<32x128xf32>
    %140 = arith.mulf %139, %131 : vector<32x128xf32>
    %141 = arith.addf %125, %140 : vector<32x128xf32>
    %c26 = arith.constant 26 : index
    %c0_66 = arith.constant 0 : index
    %c0_67 = arith.constant 0 : index
    %142 = vector.load %arg1[%c26, %c0_66, %c0_67] : memref<27x1x128xf32, #tpu.memory_space<vmem>>, vector<1x1x128xf32>
    %143 = vector.shape_cast %142 : vector<1x1x128xf32> to vector<1x128xf32>
    %144 = vector.broadcast %143 : vector<1x128xf32> to vector<32x128xf32>
    %145 = arith.mulf %144, %131 : vector<32x128xf32>
    %146 = arith.addf %130, %145 : vector<32x128xf32>
    %c96_i32 = arith.constant 96 : i32
    %147 = tpu.dynamic_rotate %136 by %c96_i32 dim 1 : vector<32x128xf32>, i32 -> vector<32x128xf32>
    %148 = arith.addf %136, %147 : vector<32x128xf32>
    %c64_i32 = arith.constant 64 : i32
    %149 = tpu.dynamic_rotate %136 by %c64_i32 dim 1 : vector<32x128xf32>, i32 -> vector<32x128xf32>
    %150 = arith.addf %148, %149 : vector<32x128xf32>
    %c0_68 = arith.constant 0 : index
    %151 = memref.load %arg2[%c0_68] : memref<3xf32, #tpu.memory_space<smem>>
    %152 = vector.broadcast %151 : f32 to vector<32x128xf32>
    %153 = arith.addf %150, %152 : vector<32x128xf32>
    %cst_69 = arith.constant 0.000000e+00 : f32
    %154 = vector.broadcast %cst_69 : f32 to vector<32x128xf32>
    %155 = arith.select %5, %153, %154 : vector<32x128xi1>, vector<32x128xf32>
    %c96_i32_70 = arith.constant 96 : i32
    %156 = tpu.dynamic_rotate %141 by %c96_i32_70 dim 1 : vector<32x128xf32>, i32 -> vector<32x128xf32>
    %157 = arith.addf %141, %156 : vector<32x128xf32>
    %c64_i32_71 = arith.constant 64 : i32
    %158 = tpu.dynamic_rotate %141 by %c64_i32_71 dim 1 : vector<32x128xf32>, i32 -> vector<32x128xf32>
    %159 = arith.addf %157, %158 : vector<32x128xf32>
    %c1_72 = arith.constant 1 : index
    %160 = memref.load %arg2[%c1_72] : memref<3xf32, #tpu.memory_space<smem>>
    %161 = vector.broadcast %160 : f32 to vector<32x128xf32>
    %162 = arith.addf %159, %161 : vector<32x128xf32>
    %cst_73 = arith.constant 0.000000e+00 : f32
    %163 = vector.broadcast %cst_73 : f32 to vector<32x128xf32>
    %164 = arith.select %5, %162, %163 : vector<32x128xi1>, vector<32x128xf32>
    %c32_i32_74 = arith.constant 32 : i32
    %165 = tpu.dynamic_rotate %164 by %c32_i32_74 dim 1 : vector<32x128xf32>, i32 -> vector<32x128xf32>
    %166 = arith.addf %155, %165 : vector<32x128xf32>
    %c96_i32_75 = arith.constant 96 : i32
    %167 = tpu.dynamic_rotate %146 by %c96_i32_75 dim 1 : vector<32x128xf32>, i32 -> vector<32x128xf32>
    %168 = arith.addf %146, %167 : vector<32x128xf32>
    %c64_i32_76 = arith.constant 64 : i32
    %169 = tpu.dynamic_rotate %146 by %c64_i32_76 dim 1 : vector<32x128xf32>, i32 -> vector<32x128xf32>
    %170 = arith.addf %168, %169 : vector<32x128xf32>
    %c2_77 = arith.constant 2 : index
    %171 = memref.load %arg2[%c2_77] : memref<3xf32, #tpu.memory_space<smem>>
    %172 = vector.broadcast %171 : f32 to vector<32x128xf32>
    %173 = arith.addf %170, %172 : vector<32x128xf32>
    %cst_78 = arith.constant 0.000000e+00 : f32
    %174 = vector.broadcast %cst_78 : f32 to vector<32x128xf32>
    %175 = arith.select %5, %173, %174 : vector<32x128xi1>, vector<32x128xf32>
    %c64_i32_79 = arith.constant 64 : i32
    %176 = tpu.dynamic_rotate %175 by %c64_i32_79 dim 1 : vector<32x128xf32>, i32 -> vector<32x128xf32>
    %177 = arith.addf %166, %176 : vector<32x128xf32>
    %c0_80 = arith.constant 0 : index
    %c0_81 = arith.constant 0 : index
    %178 = vector.load %arg10[%c0_80, %c0_81] : memref<34x128xf32, #tpu.memory_space<vmem>>, vector<32x128xf32>
    tpu.vector_store %arg10[%c0_80, %c0_81], %177 {strides = array<i32>} : memref<34x128xf32, #tpu.memory_space<vmem>>, vector<32x128xf32>,
    %c0_82 = arith.constant 0 : index
    %c0_83 = arith.constant 0 : index
    %179 = vector.load %arg10[%c0_82, %c0_83] : memref<34x128xf32, #tpu.memory_space<vmem>>, vector<32x128xf32>
    %c0_84 = arith.constant 0 : index
    %c0_85 = arith.constant 0 : index
    %c0_86 = arith.constant 0 : index
    %180 = vector.load %arg1[%c0_84, %c0_85, %c0_86] : memref<27x1x128xf32, #tpu.memory_space<vmem>>, vector<1x1x128xf32>
    %181 = vector.shape_cast %180 : vector<1x1x128xf32> to vector<1x128xf32>
    %182 = vector.broadcast %181 : vector<1x128xf32> to vector<32x128xf32>
    %183 = arith.mulf %182, %179 : vector<32x128xf32>
    %c9_87 = arith.constant 9 : index
    %c0_88 = arith.constant 0 : index
    %c0_89 = arith.constant 0 : index
    %184 = vector.load %arg1[%c9_87, %c0_88, %c0_89] : memref<27x1x128xf32, #tpu.memory_space<vmem>>, vector<1x1x128xf32>
    %185 = vector.shape_cast %184 : vector<1x1x128xf32> to vector<1x128xf32>
    %186 = vector.broadcast %185 : vector<1x128xf32> to vector<32x128xf32>
    %187 = arith.mulf %186, %179 : vector<32x128xf32>
    %c18_90 = arith.constant 18 : index
    %c0_91 = arith.constant 0 : index
    %c0_92 = arith.constant 0 : index
    %188 = vector.load %arg1[%c18_90, %c0_91, %c0_92] : memref<27x1x128xf32, #tpu.memory_space<vmem>>, vector<1x1x128xf32>
    %189 = vector.shape_cast %188 : vector<1x1x128xf32> to vector<1x128xf32>
    %190 = vector.broadcast %189 : vector<1x128xf32> to vector<32x128xf32>
    %191 = arith.mulf %190, %179 : vector<32x128xf32>
    %c127_i32_93 = arith.constant 127 : i32
    %192 = tpu.dynamic_rotate %179 by %c127_i32_93 dim 1 : vector<32x128xf32>, i32 -> vector<32x128xf32>
    %c1_94 = arith.constant 1 : index
    %c0_95 = arith.constant 0 : index
    %c0_96 = arith.constant 0 : index
    %193 = vector.load %arg1[%c1_94, %c0_95, %c0_96] : memref<27x1x128xf32, #tpu.memory_space<vmem>>, vector<1x1x128xf32>
    %194 = vector.shape_cast %193 : vector<1x1x128xf32> to vector<1x128xf32>
    %195 = vector.broadcast %194 : vector<1x128xf32> to vector<32x128xf32>
    %196 = arith.mulf %195, %192 : vector<32x128xf32>
    %197 = arith.addf %183, %196 : vector<32x128xf32>
    %c10_97 = arith.constant 10 : index
    %c0_98 = arith.constant 0 : index
    %c0_99 = arith.constant 0 : index
    %198 = vector.load %arg1[%c10_97, %c0_98, %c0_99] : memref<27x1x128xf32, #tpu.memory_space<vmem>>, vector<1x1x128xf32>
    %199 = vector.shape_cast %198 : vector<1x1x128xf32> to vector<1x128xf32>
    %200 = vector.broadcast %199 : vector<1x128xf32> to vector<32x128xf32>
    %201 = arith.mulf %200, %192 : vector<32x128xf32>
    %202 = arith.addf %187, %201 : vector<32x128xf32>
    %c19_100 = arith.constant 19 : index
    %c0_101 = arith.constant 0 : index
    %c0_102 = arith.constant 0 : index
    %203 = vector.load %arg1[%c19_100, %c0_101, %c0_102] : memref<27x1x128xf32, #tpu.memory_space<vmem>>, vector<1x1x128xf32>
    %204 = vector.shape_cast %203 : vector<1x1x128xf32> to vector<1x128xf32>
    %205 = vector.broadcast %204 : vector<1x128xf32> to vector<32x128xf32>
    %206 = arith.mulf %205, %192 : vector<32x128xf32>
    %207 = arith.addf %191, %206 : vector<32x128xf32>
    %c126_i32_103 = arith.constant 126 : i32
    %208 = tpu.dynamic_rotate %179 by %c126_i32_103 dim 1 : vector<32x128xf32>, i32 -> vector<32x128xf32>
    %c2_104 = arith.constant 2 : index
    %c0_105 = arith.constant 0 : index
    %c0_106 = arith.constant 0 : index
    %209 = vector.load %arg1[%c2_104, %c0_105, %c0_106] : memref<27x1x128xf32, #tpu.memory_space<vmem>>, vector<1x1x128xf32>
    %210 = vector.shape_cast %209 : vector<1x1x128xf32> to vector<1x128xf32>
    %211 = vector.broadcast %210 : vector<1x128xf32> to vector<32x128xf32>
    %212 = arith.mulf %211, %208 : vector<32x128xf32>
    %213 = arith.addf %197, %212 : vector<32x128xf32>
    %c11_107 = arith.constant 11 : index
    %c0_108 = arith.constant 0 : index
    %c0_109 = arith.constant 0 : index
    %214 = vector.load %arg1[%c11_107, %c0_108, %c0_109] : memref<27x1x128xf32, #tpu.memory_space<vmem>>, vector<1x1x128xf32>
    %215 = vector.shape_cast %214 : vector<1x1x128xf32> to vector<1x128xf32>
    %216 = vector.broadcast %215 : vector<1x128xf32> to vector<32x128xf32>
    %217 = arith.mulf %216, %208 : vector<32x128xf32>
    %218 = arith.addf %202, %217 : vector<32x128xf32>
    %c20_110 = arith.constant 20 : index
    %c0_111 = arith.constant 0 : index
    %c0_112 = arith.constant 0 : index
    %219 = vector.load %arg1[%c20_110, %c0_111, %c0_112] : memref<27x1x128xf32, #tpu.memory_space<vmem>>, vector<1x1x128xf32>
    %220 = vector.shape_cast %219 : vector<1x1x128xf32> to vector<1x128xf32>
    %221 = vector.broadcast %220 : vector<1x128xf32> to vector<32x128xf32>
    %222 = arith.mulf %221, %208 : vector<32x128xf32>
    %223 = arith.addf %207, %222 : vector<32x128xf32>
    %c1_113 = arith.constant 1 : index
    %c0_114 = arith.constant 0 : index
    %224 = vector.load %arg10[%c1_113, %c0_114] : memref<34x128xf32, #tpu.memory_space<vmem>>, vector<32x128xf32>
    %c3_115 = arith.constant 3 : index
    %c0_116 = arith.constant 0 : index
    %c0_117 = arith.constant 0 : index
    %225 = vector.load %arg1[%c3_115, %c0_116, %c0_117] : memref<27x1x128xf32, #tpu.memory_space<vmem>>, vector<1x1x128xf32>
    %226 = vector.shape_cast %225 : vector<1x1x128xf32> to vector<1x128xf32>
    %227 = vector.broadcast %226 : vector<1x128xf32> to vector<32x128xf32>
    %228 = arith.mulf %227, %224 : vector<32x128xf32>
    %229 = arith.addf %213, %228 : vector<32x128xf32>
    %c12_118 = arith.constant 12 : index
    %c0_119 = arith.constant 0 : index
    %c0_120 = arith.constant 0 : index
    %230 = vector.load %arg1[%c12_118, %c0_119, %c0_120] : memref<27x1x128xf32, #tpu.memory_space<vmem>>, vector<1x1x128xf32>
    %231 = vector.shape_cast %230 : vector<1x1x128xf32> to vector<1x128xf32>
    %232 = vector.broadcast %231 : vector<1x128xf32> to vector<32x128xf32>
    %233 = arith.mulf %232, %224 : vector<32x128xf32>
    %234 = arith.addf %218, %233 : vector<32x128xf32>
    %c21_121 = arith.constant 21 : index
    %c0_122 = arith.constant 0 : index
    %c0_123 = arith.constant 0 : index
    %235 = vector.load %arg1[%c21_121, %c0_122, %c0_123] : memref<27x1x128xf32, #tpu.memory_space<vmem>>, vector<1x1x128xf32>
    %236 = vector.shape_cast %235 : vector<1x1x128xf32> to vector<1x128xf32>
    %237 = vector.broadcast %236 : vector<1x128xf32> to vector<32x128xf32>
    %238 = arith.mulf %237, %224 : vector<32x128xf32>
    %239 = arith.addf %223, %238 : vector<32x128xf32>
    %c127_i32_124 = arith.constant 127 : i32
    %240 = tpu.dynamic_rotate %224 by %c127_i32_124 dim 1 : vector<32x128xf32>, i32 -> vector<32x128xf32>
    %c4_125 = arith.constant 4 : index
    %c0_126 = arith.constant 0 : index
    %c0_127 = arith.constant 0 : index
    %241 = vector.load %arg1[%c4_125, %c0_126, %c0_127] : memref<27x1x128xf32, #tpu.memory_space<vmem>>, vector<1x1x128xf32>
    %242 = vector.shape_cast %241 : vector<1x1x128xf32> to vector<1x128xf32>
    %243 = vector.broadcast %242 : vector<1x128xf32> to vector<32x128xf32>
    %244 = arith.mulf %243, %240 : vector<32x128xf32>
    %245 = arith.addf %229, %244 : vector<32x128xf32>
    %c13_128 = arith.constant 13 : index
    %c0_129 = arith.constant 0 : index
    %c0_130 = arith.constant 0 : index
    %246 = vector.load %arg1[%c13_128, %c0_129, %c0_130] : memref<27x1x128xf32, #tpu.memory_space<vmem>>, vector<1x1x128xf32>
    %247 = vector.shape_cast %246 : vector<1x1x128xf32> to vector<1x128xf32>
    %248 = vector.broadcast %247 : vector<1x128xf32> to vector<32x128xf32>
    %249 = arith.mulf %248, %240 : vector<32x128xf32>
    %250 = arith.addf %234, %249 : vector<32x128xf32>
    %c22_131 = arith.constant 22 : index
    %c0_132 = arith.constant 0 : index
    %c0_133 = arith.constant 0 : index
    %251 = vector.load %arg1[%c22_131, %c0_132, %c0_133] : memref<27x1x128xf32, #tpu.memory_space<vmem>>, vector<1x1x128xf32>
    %252 = vector.shape_cast %251 : vector<1x1x128xf32> to vector<1x128xf32>
    %253 = vector.broadcast %252 : vector<1x128xf32> to vector<32x128xf32>
    %254 = arith.mulf %253, %240 : vector<32x128xf32>
    %255 = arith.addf %239, %254 : vector<32x128xf32>
    %c126_i32_134 = arith.constant 126 : i32
    %256 = tpu.dynamic_rotate %224 by %c126_i32_134 dim 1 : vector<32x128xf32>, i32 -> vector<32x128xf32>
    %c5_135 = arith.constant 5 : index
    %c0_136 = arith.constant 0 : index
    %c0_137 = arith.constant 0 : index
    %257 = vector.load %arg1[%c5_135, %c0_136, %c0_137] : memref<27x1x128xf32, #tpu.memory_space<vmem>>, vector<1x1x128xf32>
    %258 = vector.shape_cast %257 : vector<1x1x128xf32> to vector<1x128xf32>
    %259 = vector.broadcast %258 : vector<1x128xf32> to vector<32x128xf32>
    %260 = arith.mulf %259, %256 : vector<32x128xf32>
    %261 = arith.addf %245, %260 : vector<32x128xf32>
    %c14_138 = arith.constant 14 : index
    %c0_139 = arith.constant 0 : index
    %c0_140 = arith.constant 0 : index
    %262 = vector.load %arg1[%c14_138, %c0_139, %c0_140] : memref<27x1x128xf32, #tpu.memory_space<vmem>>, vector<1x1x128xf32>
    %263 = vector.shape_cast %262 : vector<1x1x128xf32> to vector<1x128xf32>
    %264 = vector.broadcast %263 : vector<1x128xf32> to vector<32x128xf32>
    %265 = arith.mulf %264, %256 : vector<32x128xf32>
    %266 = arith.addf %250, %265 : vector<32x128xf32>
    %c23_141 = arith.constant 23 : index
    %c0_142 = arith.constant 0 : index
    %c0_143 = arith.constant 0 : index
    %267 = vector.load %arg1[%c23_141, %c0_142, %c0_143] : memref<27x1x128xf32, #tpu.memory_space<vmem>>, vector<1x1x128xf32>
    %268 = vector.shape_cast %267 : vector<1x1x128xf32> to vector<1x128xf32>
    %269 = vector.broadcast %268 : vector<1x128xf32> to vector<32x128xf32>
    %270 = arith.mulf %269, %256 : vector<32x128xf32>
    %271 = arith.addf %255, %270 : vector<32x128xf32>
    %c2_144 = arith.constant 2 : index
    %c0_145 = arith.constant 0 : index
    %272 = vector.load %arg10[%c2_144, %c0_145] : memref<34x128xf32, #tpu.memory_space<vmem>>, vector<32x128xf32>
    %c6_146 = arith.constant 6 : index
    %c0_147 = arith.constant 0 : index
    %c0_148 = arith.constant 0 : index
    %273 = vector.load %arg1[%c6_146, %c0_147, %c0_148] : memref<27x1x128xf32, #tpu.memory_space<vmem>>, vector<1x1x128xf32>
    %274 = vector.shape_cast %273 : vector<1x1x128xf32> to vector<1x128xf32>
    %275 = vector.broadcast %274 : vector<1x128xf32> to vector<32x128xf32>
    %276 = arith.mulf %275, %272 : vector<32x128xf32>
    %277 = arith.addf %261, %276 : vector<32x128xf32>
    %c15_149 = arith.constant 15 : index
    %c0_150 = arith.constant 0 : index
    %c0_151 = arith.constant 0 : index
    %278 = vector.load %arg1[%c15_149, %c0_150, %c0_151] : memref<27x1x128xf32, #tpu.memory_space<vmem>>, vector<1x1x128xf32>
    %279 = vector.shape_cast %278 : vector<1x1x128xf32> to vector<1x128xf32>
    %280 = vector.broadcast %279 : vector<1x128xf32> to vector<32x128xf32>
    %281 = arith.mulf %280, %272 : vector<32x128xf32>
    %282 = arith.addf %266, %281 : vector<32x128xf32>
    %c24_152 = arith.constant 24 : index
    %c0_153 = arith.constant 0 : index
    %c0_154 = arith.constant 0 : index
    %283 = vector.load %arg1[%c24_152, %c0_153, %c0_154] : memref<27x1x128xf32, #tpu.memory_space<vmem>>, vector<1x1x128xf32>
    %284 = vector.shape_cast %283 : vector<1x1x128xf32> to vector<1x128xf32>
    %285 = vector.broadcast %284 : vector<1x128xf32> to vector<32x128xf32>
    %286 = arith.mulf %285, %272 : vector<32x128xf32>
    %287 = arith.addf %271, %286 : vector<32x128xf32>
    %c127_i32_155 = arith.constant 127 : i32
    %288 = tpu.dynamic_rotate %272 by %c127_i32_155 dim 1 : vector<32x128xf32>, i32 -> vector<32x128xf32>
    %c7_156 = arith.constant 7 : index
    %c0_157 = arith.constant 0 : index
    %c0_158 = arith.constant 0 : index
    %289 = vector.load %arg1[%c7_156, %c0_157, %c0_158] : memref<27x1x128xf32, #tpu.memory_space<vmem>>, vector<1x1x128xf32>
    %290 = vector.shape_cast %289 : vector<1x1x128xf32> to vector<1x128xf32>
    %291 = vector.broadcast %290 : vector<1x128xf32> to vector<32x128xf32>
    %292 = arith.mulf %291, %288 : vector<32x128xf32>
    %293 = arith.addf %277, %292 : vector<32x128xf32>
    %c16_159 = arith.constant 16 : index
    %c0_160 = arith.constant 0 : index
    %c0_161 = arith.constant 0 : index
    %294 = vector.load %arg1[%c16_159, %c0_160, %c0_161] : memref<27x1x128xf32, #tpu.memory_space<vmem>>, vector<1x1x128xf32>
    %295 = vector.shape_cast %294 : vector<1x1x128xf32> to vector<1x128xf32>
    %296 = vector.broadcast %295 : vector<1x128xf32> to vector<32x128xf32>
    %297 = arith.mulf %296, %288 : vector<32x128xf32>
    %298 = arith.addf %282, %297 : vector<32x128xf32>
    %c25_162 = arith.constant 25 : index
    %c0_163 = arith.constant 0 : index
    %c0_164 = arith.constant 0 : index
    %299 = vector.load %arg1[%c25_162, %c0_163, %c0_164] : memref<27x1x128xf32, #tpu.memory_space<vmem>>, vector<1x1x128xf32>
    %300 = vector.shape_cast %299 : vector<1x1x128xf32> to vector<1x128xf32>
    %301 = vector.broadcast %300 : vector<1x128xf32> to vector<32x128xf32>
    %302 = arith.mulf %301, %288 : vector<32x128xf32>
    %303 = arith.addf %287, %302 : vector<32x128xf32>
    %c126_i32_165 = arith.constant 126 : i32
    %304 = tpu.dynamic_rotate %272 by %c126_i32_165 dim 1 : vector<32x128xf32>, i32 -> vector<32x128xf32>
    %c8_166 = arith.constant 8 : index
    %c0_167 = arith.constant 0 : index
    %c0_168 = arith.constant 0 : index
    %305 = vector.load %arg1[%c8_166, %c0_167, %c0_168] : memref<27x1x128xf32, #tpu.memory_space<vmem>>, vector<1x1x128xf32>
    %306 = vector.shape_cast %305 : vector<1x1x128xf32> to vector<1x128xf32>
    %307 = vector.broadcast %306 : vector<1x128xf32> to vector<32x128xf32>
    %308 = arith.mulf %307, %304 : vector<32x128xf32>
    %309 = arith.addf %293, %308 : vector<32x128xf32>
    %c17_169 = arith.constant 17 : index
    %c0_170 = arith.constant 0 : index
    %c0_171 = arith.constant 0 : index
    %310 = vector.load %arg1[%c17_169, %c0_170, %c0_171] : memref<27x1x128xf32, #tpu.memory_space<vmem>>, vector<1x1x128xf32>
    %311 = vector.shape_cast %310 : vector<1x1x128xf32> to vector<1x128xf32>
    %312 = vector.broadcast %311 : vector<1x128xf32> to vector<32x128xf32>
    %313 = arith.mulf %312, %304 : vector<32x128xf32>
    %314 = arith.addf %298, %313 : vector<32x128xf32>
    %c26_172 = arith.constant 26 : index
    %c0_173 = arith.constant 0 : index
    %c0_174 = arith.constant 0 : index
    %315 = vector.load %arg1[%c26_172, %c0_173, %c0_174] : memref<27x1x128xf32, #tpu.memory_space<vmem>>, vector<1x1x128xf32>
    %316 = vector.shape_cast %315 : vector<1x1x128xf32> to vector<1x128xf32>
    %317 = vector.broadcast %316 : vector<1x128xf32> to vector<32x128xf32>
    %318 = arith.mulf %317, %304 : vector<32x128xf32>
    %319 = arith.addf %303, %318 : vector<32x128xf32>
    %c96_i32_175 = arith.constant 96 : i32
    %320 = tpu.dynamic_rotate %309 by %c96_i32_175 dim 1 : vector<32x128xf32>, i32 -> vector<32x128xf32>
    %321 = arith.addf %309, %320 : vector<32x128xf32>
    %c64_i32_176 = arith.constant 64 : i32
    %322 = tpu.dynamic_rotate %309 by %c64_i32_176 dim 1 : vector<32x128xf32>, i32 -> vector<32x128xf32>
    %323 = arith.addf %321, %322 : vector<32x128xf32>
    %c0_177 = arith.constant 0 : index
    %324 = memref.load %arg2[%c0_177] : memref<3xf32, #tpu.memory_space<smem>>
    %325 = vector.broadcast %324 : f32 to vector<32x128xf32>
    %326 = arith.addf %323, %325 : vector<32x128xf32>
    %cst_178 = arith.constant 0.000000e+00 : f32
    %327 = vector.broadcast %cst_178 : f32 to vector<32x128xf32>
    %328 = arith.select %5, %326, %327 : vector<32x128xi1>, vector<32x128xf32>
    %c96_i32_179 = arith.constant 96 : i32
    %329 = tpu.dynamic_rotate %314 by %c96_i32_179 dim 1 : vector<32x128xf32>, i32 -> vector<32x128xf32>
    %330 = arith.addf %314, %329 : vector<32x128xf32>
    %c64_i32_180 = arith.constant 64 : i32
    %331 = tpu.dynamic_rotate %314 by %c64_i32_180 dim 1 : vector<32x128xf32>, i32 -> vector<32x128xf32>
    %332 = arith.addf %330, %331 : vector<32x128xf32>
    %c1_181 = arith.constant 1 : index
    %333 = memref.load %arg2[%c1_181] : memref<3xf32, #tpu.memory_space<smem>>
    %334 = vector.broadcast %333 : f32 to vector<32x128xf32>
    %335 = arith.addf %332, %334 : vector<32x128xf32>
    %cst_182 = arith.constant 0.000000e+00 : f32
    %336 = vector.broadcast %cst_182 : f32 to vector<32x128xf32>
    %337 = arith.select %5, %335, %336 : vector<32x128xi1>, vector<32x128xf32>
    %c32_i32_183 = arith.constant 32 : i32
    %338 = tpu.dynamic_rotate %337 by %c32_i32_183 dim 1 : vector<32x128xf32>, i32 -> vector<32x128xf32>
    %339 = arith.addf %328, %338 : vector<32x128xf32>
    %c96_i32_184 = arith.constant 96 : i32
    %340 = tpu.dynamic_rotate %319 by %c96_i32_184 dim 1 : vector<32x128xf32>, i32 -> vector<32x128xf32>
    %341 = arith.addf %319, %340 : vector<32x128xf32>
    %c64_i32_185 = arith.constant 64 : i32
    %342 = tpu.dynamic_rotate %319 by %c64_i32_185 dim 1 : vector<32x128xf32>, i32 -> vector<32x128xf32>
    %343 = arith.addf %341, %342 : vector<32x128xf32>
    %c2_186 = arith.constant 2 : index
    %344 = memref.load %arg2[%c2_186] : memref<3xf32, #tpu.memory_space<smem>>
    %345 = vector.broadcast %344 : f32 to vector<32x128xf32>
    %346 = arith.addf %343, %345 : vector<32x128xf32>
    %cst_187 = arith.constant 0.000000e+00 : f32
    %347 = vector.broadcast %cst_187 : f32 to vector<32x128xf32>
    %348 = arith.select %5, %346, %347 : vector<32x128xi1>, vector<32x128xf32>
    %c64_i32_188 = arith.constant 64 : i32
    %349 = tpu.dynamic_rotate %348 by %c64_i32_188 dim 1 : vector<32x128xf32>, i32 -> vector<32x128xf32>
    %350 = arith.addf %339, %349 : vector<32x128xf32>
    %c0_189 = arith.constant 0 : index
    %c0_190 = arith.constant 0 : index
    %351 = vector.load %arg11[%c0_189, %c0_190] : memref<34x128xf32, #tpu.memory_space<vmem>>, vector<32x128xf32>
    tpu.vector_store %arg11[%c0_189, %c0_190], %350 {strides = array<i32>} : memref<34x128xf32, #tpu.memory_space<vmem>>, vector<32x128xf32>,
    %c0_191 = arith.constant 0 : index
    %c0_192 = arith.constant 0 : index
    %352 = vector.load %arg11[%c0_191, %c0_192] : memref<34x128xf32, #tpu.memory_space<vmem>>, vector<32x128xf32>
    %c1_193 = arith.constant 1 : index
    %c0_194 = arith.constant 0 : index
    %353 = vector.load %arg11[%c1_193, %c0_194] : memref<34x128xf32, #tpu.memory_space<vmem>>, vector<32x128xf32>
    %354 = arith.maximumf %352, %353 : vector<32x128xf32>
    %c127_i32_195 = arith.constant 127 : i32
    %355 = tpu.dynamic_rotate %354 by %c127_i32_195 dim 1 : vector<32x128xf32>, i32 -> vector<32x128xf32>
    %356 = arith.maximumf %354, %355 : vector<32x128xf32>
    %c0_196 = arith.constant 0 : index
    %c0_197 = arith.constant 0 : index
    %357 = vector.load %arg10[%c0_196, %c0_197] : memref<34x128xf32, #tpu.memory_space<vmem>>, vector<32x128xf32>
    tpu.vector_store %arg10[%c0_196, %c0_197], %356 {strides = array<i32>} : memref<34x128xf32, #tpu.memory_space<vmem>>, vector<32x128xf32>,
    %c0_198 = arith.constant 0 : index
    %c0_199 = arith.constant 0 : index
    %358 = vector.load %arg10[%c0_198, %c0_199] : memref<34x128xf32, #tpu.memory_space<vmem>>, vector<32x128xf32>
    %c0_200 = arith.constant 0 : index
    %c0_201 = arith.constant 0 : index
    %c0_202 = arith.constant 0 : index
    %359 = vector.load %arg1[%c0_200, %c0_201, %c0_202] : memref<27x1x128xf32, #tpu.memory_space<vmem>>, vector<1x1x128xf32>
    %360 = vector.shape_cast %359 : vector<1x1x128xf32> to vector<1x128xf32>
    %361 = vector.broadcast %360 : vector<1x128xf32> to vector<32x128xf32>
    %362 = arith.mulf %361, %358 : vector<32x128xf32>
    %c9_203 = arith.constant 9 : index
    %c0_204 = arith.constant 0 : index
    %c0_205 = arith.constant 0 : index
    %363 = vector.load %arg1[%c9_203, %c0_204, %c0_205] : memref<27x1x128xf32, #tpu.memory_space<vmem>>, vector<1x1x128xf32>
    %364 = vector.shape_cast %363 : vector<1x1x128xf32> to vector<1x128xf32>
    %365 = vector.broadcast %364 : vector<1x128xf32> to vector<32x128xf32>
    %366 = arith.mulf %365, %358 : vector<32x128xf32>
    %c18_206 = arith.constant 18 : index
    %c0_207 = arith.constant 0 : index
    %c0_208 = arith.constant 0 : index
    %367 = vector.load %arg1[%c18_206, %c0_207, %c0_208] : memref<27x1x128xf32, #tpu.memory_space<vmem>>, vector<1x1x128xf32>
    %368 = vector.shape_cast %367 : vector<1x1x128xf32> to vector<1x128xf32>
    %369 = vector.broadcast %368 : vector<1x128xf32> to vector<32x128xf32>
    %370 = arith.mulf %369, %358 : vector<32x128xf32>
    %c127_i32_209 = arith.constant 127 : i32
    %371 = tpu.dynamic_rotate %358 by %c127_i32_209 dim 1 : vector<32x128xf32>, i32 -> vector<32x128xf32>
    %c1_210 = arith.constant 1 : index
    %c0_211 = arith.constant 0 : index
    %c0_212 = arith.constant 0 : index
    %372 = vector.load %arg1[%c1_210, %c0_211, %c0_212] : memref<27x1x128xf32, #tpu.memory_space<vmem>>, vector<1x1x128xf32>
    %373 = vector.shape_cast %372 : vector<1x1x128xf32> to vector<1x128xf32>
    %374 = vector.broadcast %373 : vector<1x128xf32> to vector<32x128xf32>
    %375 = arith.mulf %374, %371 : vector<32x128xf32>
    %376 = arith.addf %362, %375 : vector<32x128xf32>
    %c10_213 = arith.constant 10 : index
    %c0_214 = arith.constant 0 : index
    %c0_215 = arith.constant 0 : index
    %377 = vector.load %arg1[%c10_213, %c0_214, %c0_215] : memref<27x1x128xf32, #tpu.memory_space<vmem>>, vector<1x1x128xf32>
    %378 = vector.shape_cast %377 : vector<1x1x128xf32> to vector<1x128xf32>
    %379 = vector.broadcast %378 : vector<1x128xf32> to vector<32x128xf32>
    %380 = arith.mulf %379, %371 : vector<32x128xf32>
    %381 = arith.addf %366, %380 : vector<32x128xf32>
    %c19_216 = arith.constant 19 : index
    %c0_217 = arith.constant 0 : index
    %c0_218 = arith.constant 0 : index
    %382 = vector.load %arg1[%c19_216, %c0_217, %c0_218] : memref<27x1x128xf32, #tpu.memory_space<vmem>>, vector<1x1x128xf32>
    %383 = vector.shape_cast %382 : vector<1x1x128xf32> to vector<1x128xf32>
    %384 = vector.broadcast %383 : vector<1x128xf32> to vector<32x128xf32>
    %385 = arith.mulf %384, %371 : vector<32x128xf32>
    %386 = arith.addf %370, %385 : vector<32x128xf32>
    %c126_i32_219 = arith.constant 126 : i32
    %387 = tpu.dynamic_rotate %358 by %c126_i32_219 dim 1 : vector<32x128xf32>, i32 -> vector<32x128xf32>
    %c2_220 = arith.constant 2 : index
    %c0_221 = arith.constant 0 : index
    %c0_222 = arith.constant 0 : index
    %388 = vector.load %arg1[%c2_220, %c0_221, %c0_222] : memref<27x1x128xf32, #tpu.memory_space<vmem>>, vector<1x1x128xf32>
    %389 = vector.shape_cast %388 : vector<1x1x128xf32> to vector<1x128xf32>
    %390 = vector.broadcast %389 : vector<1x128xf32> to vector<32x128xf32>
    %391 = arith.mulf %390, %387 : vector<32x128xf32>
    %392 = arith.addf %376, %391 : vector<32x128xf32>
    %c11_223 = arith.constant 11 : index
    %c0_224 = arith.constant 0 : index
    %c0_225 = arith.constant 0 : index
    %393 = vector.load %arg1[%c11_223, %c0_224, %c0_225] : memref<27x1x128xf32, #tpu.memory_space<vmem>>, vector<1x1x128xf32>
    %394 = vector.shape_cast %393 : vector<1x1x128xf32> to vector<1x128xf32>
    %395 = vector.broadcast %394 : vector<1x128xf32> to vector<32x128xf32>
    %396 = arith.mulf %395, %387 : vector<32x128xf32>
    %397 = arith.addf %381, %396 : vector<32x128xf32>
    %c20_226 = arith.constant 20 : index
    %c0_227 = arith.constant 0 : index
    %c0_228 = arith.constant 0 : index
    %398 = vector.load %arg1[%c20_226, %c0_227, %c0_228] : memref<27x1x128xf32, #tpu.memory_space<vmem>>, vector<1x1x128xf32>
    %399 = vector.shape_cast %398 : vector<1x1x128xf32> to vector<1x128xf32>
    %400 = vector.broadcast %399 : vector<1x128xf32> to vector<32x128xf32>
    %401 = arith.mulf %400, %387 : vector<32x128xf32>
    %402 = arith.addf %386, %401 : vector<32x128xf32>
    %c1_229 = arith.constant 1 : index
    %c0_230 = arith.constant 0 : index
    %403 = vector.load %arg10[%c1_229, %c0_230] : memref<34x128xf32, #tpu.memory_space<vmem>>, vector<32x128xf32>
    %c3_231 = arith.constant 3 : index
    %c0_232 = arith.constant 0 : index
    %c0_233 = arith.constant 0 : index
    %404 = vector.load %arg1[%c3_231, %c0_232, %c0_233] : memref<27x1x128xf32, #tpu.memory_space<vmem>>, vector<1x1x128xf32>
    %405 = vector.shape_cast %404 : vector<1x1x128xf32> to vector<1x128xf32>
    %406 = vector.broadcast %405 : vector<1x128xf32> to vector<32x128xf32>
    %407 = arith.mulf %406, %403 : vector<32x128xf32>
    %408 = arith.addf %392, %407 : vector<32x128xf32>
    %c12_234 = arith.constant 12 : index
    %c0_235 = arith.constant 0 : index
    %c0_236 = arith.constant 0 : index
    %409 = vector.load %arg1[%c12_234, %c0_235, %c0_236] : memref<27x1x128xf32, #tpu.memory_space<vmem>>, vector<1x1x128xf32>
    %410 = vector.shape_cast %409 : vector<1x1x128xf32> to vector<1x128xf32>
    %411 = vector.broadcast %410 : vector<1x128xf32> to vector<32x128xf32>
    %412 = arith.mulf %411, %403 : vector<32x128xf32>
    %413 = arith.addf %397, %412 : vector<32x128xf32>
    %c21_237 = arith.constant 21 : index
    %c0_238 = arith.constant 0 : index
    %c0_239 = arith.constant 0 : index
    %414 = vector.load %arg1[%c21_237, %c0_238, %c0_239] : memref<27x1x128xf32, #tpu.memory_space<vmem>>, vector<1x1x128xf32>
    %415 = vector.shape_cast %414 : vector<1x1x128xf32> to vector<1x128xf32>
    %416 = vector.broadcast %415 : vector<1x128xf32> to vector<32x128xf32>
    %417 = arith.mulf %416, %403 : vector<32x128xf32>
    %418 = arith.addf %402, %417 : vector<32x128xf32>
    %c127_i32_240 = arith.constant 127 : i32
    %419 = tpu.dynamic_rotate %403 by %c127_i32_240 dim 1 : vector<32x128xf32>, i32 -> vector<32x128xf32>
    %c4_241 = arith.constant 4 : index
    %c0_242 = arith.constant 0 : index
    %c0_243 = arith.constant 0 : index
    %420 = vector.load %arg1[%c4_241, %c0_242, %c0_243] : memref<27x1x128xf32, #tpu.memory_space<vmem>>, vector<1x1x128xf32>
    %421 = vector.shape_cast %420 : vector<1x1x128xf32> to vector<1x128xf32>
    %422 = vector.broadcast %421 : vector<1x128xf32> to vector<32x128xf32>
    %423 = arith.mulf %422, %419 : vector<32x128xf32>
    %424 = arith.addf %408, %423 : vector<32x128xf32>
    %c13_244 = arith.constant 13 : index
    %c0_245 = arith.constant 0 : index
    %c0_246 = arith.constant 0 : index
    %425 = vector.load %arg1[%c13_244, %c0_245, %c0_246] : memref<27x1x128xf32, #tpu.memory_space<vmem>>, vector<1x1x128xf32>
    %426 = vector.shape_cast %425 : vector<1x1x128xf32> to vector<1x128xf32>
    %427 = vector.broadcast %426 : vector<1x128xf32> to vector<32x128xf32>
    %428 = arith.mulf %427, %419 : vector<32x128xf32>
    %429 = arith.addf %413, %428 : vector<32x128xf32>
    %c22_247 = arith.constant 22 : index
    %c0_248 = arith.constant 0 : index
    %c0_249 = arith.constant 0 : index
    %430 = vector.load %arg1[%c22_247, %c0_248, %c0_249] : memref<27x1x128xf32, #tpu.memory_space<vmem>>, vector<1x1x128xf32>
    %431 = vector.shape_cast %430 : vector<1x1x128xf32> to vector<1x128xf32>
    %432 = vector.broadcast %431 : vector<1x128xf32> to vector<32x128xf32>
    %433 = arith.mulf %432, %419 : vector<32x128xf32>
    %434 = arith.addf %418, %433 : vector<32x128xf32>
    %c126_i32_250 = arith.constant 126 : i32
    %435 = tpu.dynamic_rotate %403 by %c126_i32_250 dim 1 : vector<32x128xf32>, i32 -> vector<32x128xf32>
    %c5_251 = arith.constant 5 : index
    %c0_252 = arith.constant 0 : index
    %c0_253 = arith.constant 0 : index
    %436 = vector.load %arg1[%c5_251, %c0_252, %c0_253] : memref<27x1x128xf32, #tpu.memory_space<vmem>>, vector<1x1x128xf32>
    %437 = vector.shape_cast %436 : vector<1x1x128xf32> to vector<1x128xf32>
    %438 = vector.broadcast %437 : vector<1x128xf32> to vector<32x128xf32>
    %439 = arith.mulf %438, %435 : vector<32x128xf32>
    %440 = arith.addf %424, %439 : vector<32x128xf32>
    %c14_254 = arith.constant 14 : index
    %c0_255 = arith.constant 0 : index
    %c0_256 = arith.constant 0 : index
    %441 = vector.load %arg1[%c14_254, %c0_255, %c0_256] : memref<27x1x128xf32, #tpu.memory_space<vmem>>, vector<1x1x128xf32>
    %442 = vector.shape_cast %441 : vector<1x1x128xf32> to vector<1x128xf32>
    %443 = vector.broadcast %442 : vector<1x128xf32> to vector<32x128xf32>
    %444 = arith.mulf %443, %435 : vector<32x128xf32>
    %445 = arith.addf %429, %444 : vector<32x128xf32>
    %c23_257 = arith.constant 23 : index
    %c0_258 = arith.constant 0 : index
    %c0_259 = arith.constant 0 : index
    %446 = vector.load %arg1[%c23_257, %c0_258, %c0_259] : memref<27x1x128xf32, #tpu.memory_space<vmem>>, vector<1x1x128xf32>
    %447 = vector.shape_cast %446 : vector<1x1x128xf32> to vector<1x128xf32>
    %448 = vector.broadcast %447 : vector<1x128xf32> to vector<32x128xf32>
    %449 = arith.mulf %448, %435 : vector<32x128xf32>
    %450 = arith.addf %434, %449 : vector<32x128xf32>
    %c2_260 = arith.constant 2 : index
    %c0_261 = arith.constant 0 : index
    %451 = vector.load %arg10[%c2_260, %c0_261] : memref<34x128xf32, #tpu.memory_space<vmem>>, vector<32x128xf32>
    %c6_262 = arith.constant 6 : index
    %c0_263 = arith.constant 0 : index
    %c0_264 = arith.constant 0 : index
    %452 = vector.load %arg1[%c6_262, %c0_263, %c0_264] : memref<27x1x128xf32, #tpu.memory_space<vmem>>, vector<1x1x128xf32>
    %453 = vector.shape_cast %452 : vector<1x1x128xf32> to vector<1x128xf32>
    %454 = vector.broadcast %453 : vector<1x128xf32> to vector<32x128xf32>
    %455 = arith.mulf %454, %451 : vector<32x128xf32>
    %456 = arith.addf %440, %455 : vector<32x128xf32>
    %c15_265 = arith.constant 15 : index
    %c0_266 = arith.constant 0 : index
    %c0_267 = arith.constant 0 : index
    %457 = vector.load %arg1[%c15_265, %c0_266, %c0_267] : memref<27x1x128xf32, #tpu.memory_space<vmem>>, vector<1x1x128xf32>
    %458 = vector.shape_cast %457 : vector<1x1x128xf32> to vector<1x128xf32>
    %459 = vector.broadcast %458 : vector<1x128xf32> to vector<32x128xf32>
    %460 = arith.mulf %459, %451 : vector<32x128xf32>
    %461 = arith.addf %445, %460 : vector<32x128xf32>
    %c24_268 = arith.constant 24 : index
    %c0_269 = arith.constant 0 : index
    %c0_270 = arith.constant 0 : index
    %462 = vector.load %arg1[%c24_268, %c0_269, %c0_270] : memref<27x1x128xf32, #tpu.memory_space<vmem>>, vector<1x1x128xf32>
    %463 = vector.shape_cast %462 : vector<1x1x128xf32> to vector<1x128xf32>
    %464 = vector.broadcast %463 : vector<1x128xf32> to vector<32x128xf32>
    %465 = arith.mulf %464, %451 : vector<32x128xf32>
    %466 = arith.addf %450, %465 : vector<32x128xf32>
    %c127_i32_271 = arith.constant 127 : i32
    %467 = tpu.dynamic_rotate %451 by %c127_i32_271 dim 1 : vector<32x128xf32>, i32 -> vector<32x128xf32>
    %c7_272 = arith.constant 7 : index
    %c0_273 = arith.constant 0 : index
    %c0_274 = arith.constant 0 : index
    %468 = vector.load %arg1[%c7_272, %c0_273, %c0_274] : memref<27x1x128xf32, #tpu.memory_space<vmem>>, vector<1x1x128xf32>
    %469 = vector.shape_cast %468 : vector<1x1x128xf32> to vector<1x128xf32>
    %470 = vector.broadcast %469 : vector<1x128xf32> to vector<32x128xf32>
    %471 = arith.mulf %470, %467 : vector<32x128xf32>
    %472 = arith.addf %456, %471 : vector<32x128xf32>
    %c16_275 = arith.constant 16 : index
    %c0_276 = arith.constant 0 : index
    %c0_277 = arith.constant 0 : index
    %473 = vector.load %arg1[%c16_275, %c0_276, %c0_277] : memref<27x1x128xf32, #tpu.memory_space<vmem>>, vector<1x1x128xf32>
    %474 = vector.shape_cast %473 : vector<1x1x128xf32> to vector<1x128xf32>
    %475 = vector.broadcast %474 : vector<1x128xf32> to vector<32x128xf32>
    %476 = arith.mulf %475, %467 : vector<32x128xf32>
    %477 = arith.addf %461, %476 : vector<32x128xf32>
    %c25_278 = arith.constant 25 : index
    %c0_279 = arith.constant 0 : index
    %c0_280 = arith.constant 0 : index
    %478 = vector.load %arg1[%c25_278, %c0_279, %c0_280] : memref<27x1x128xf32, #tpu.memory_space<vmem>>, vector<1x1x128xf32>
    %479 = vector.shape_cast %478 : vector<1x1x128xf32> to vector<1x128xf32>
    %480 = vector.broadcast %479 : vector<1x128xf32> to vector<32x128xf32>
    %481 = arith.mulf %480, %467 : vector<32x128xf32>
    %482 = arith.addf %466, %481 : vector<32x128xf32>
    %c126_i32_281 = arith.constant 126 : i32
    %483 = tpu.dynamic_rotate %451 by %c126_i32_281 dim 1 : vector<32x128xf32>, i32 -> vector<32x128xf32>
    %c8_282 = arith.constant 8 : index
    %c0_283 = arith.constant 0 : index
    %c0_284 = arith.constant 0 : index
    %484 = vector.load %arg1[%c8_282, %c0_283, %c0_284] : memref<27x1x128xf32, #tpu.memory_space<vmem>>, vector<1x1x128xf32>
    %485 = vector.shape_cast %484 : vector<1x1x128xf32> to vector<1x128xf32>
    %486 = vector.broadcast %485 : vector<1x128xf32> to vector<32x128xf32>
    %487 = arith.mulf %486, %483 : vector<32x128xf32>
    %488 = arith.addf %472, %487 : vector<32x128xf32>
    %c17_285 = arith.constant 17 : index
    %c0_286 = arith.constant 0 : index
    %c0_287 = arith.constant 0 : index
    %489 = vector.load %arg1[%c17_285, %c0_286, %c0_287] : memref<27x1x128xf32, #tpu.memory_space<vmem>>, vector<1x1x128xf32>
    %490 = vector.shape_cast %489 : vector<1x1x128xf32> to vector<1x128xf32>
    %491 = vector.broadcast %490 : vector<1x128xf32> to vector<32x128xf32>
    %492 = arith.mulf %491, %483 : vector<32x128xf32>
    %493 = arith.addf %477, %492 : vector<32x128xf32>
    %c26_288 = arith.constant 26 : index
    %c0_289 = arith.constant 0 : index
    %c0_290 = arith.constant 0 : index
    %494 = vector.load %arg1[%c26_288, %c0_289, %c0_290] : memref<27x1x128xf32, #tpu.memory_space<vmem>>, vector<1x1x128xf32>
    %495 = vector.shape_cast %494 : vector<1x1x128xf32> to vector<1x128xf32>
    %496 = vector.broadcast %495 : vector<1x128xf32> to vector<32x128xf32>
    %497 = arith.mulf %496, %483 : vector<32x128xf32>
    %498 = arith.addf %482, %497 : vector<32x128xf32>
    %c96_i32_291 = arith.constant 96 : i32
    %499 = tpu.dynamic_rotate %488 by %c96_i32_291 dim 1 : vector<32x128xf32>, i32 -> vector<32x128xf32>
    %500 = arith.addf %488, %499 : vector<32x128xf32>
    %c64_i32_292 = arith.constant 64 : i32
    %501 = tpu.dynamic_rotate %488 by %c64_i32_292 dim 1 : vector<32x128xf32>, i32 -> vector<32x128xf32>
    %502 = arith.addf %500, %501 : vector<32x128xf32>
    %c0_293 = arith.constant 0 : index
    %503 = memref.load %arg2[%c0_293] : memref<3xf32, #tpu.memory_space<smem>>
    %504 = vector.broadcast %503 : f32 to vector<32x128xf32>
    %505 = arith.addf %502, %504 : vector<32x128xf32>
    %cst_294 = arith.constant 0.000000e+00 : f32
    %506 = vector.broadcast %cst_294 : f32 to vector<32x128xf32>
    %507 = arith.select %5, %505, %506 : vector<32x128xi1>, vector<32x128xf32>
    %c96_i32_295 = arith.constant 96 : i32
    %508 = tpu.dynamic_rotate %493 by %c96_i32_295 dim 1 : vector<32x128xf32>, i32 -> vector<32x128xf32>
    %509 = arith.addf %493, %508 : vector<32x128xf32>
    %c64_i32_296 = arith.constant 64 : i32
    %510 = tpu.dynamic_rotate %493 by %c64_i32_296 dim 1 : vector<32x128xf32>, i32 -> vector<32x128xf32>
    %511 = arith.addf %509, %510 : vector<32x128xf32>
    %c1_297 = arith.constant 1 : index
    %512 = memref.load %arg2[%c1_297] : memref<3xf32, #tpu.memory_space<smem>>
    %513 = vector.broadcast %512 : f32 to vector<32x128xf32>
    %514 = arith.addf %511, %513 : vector<32x128xf32>
    %cst_298 = arith.constant 0.000000e+00 : f32
    %515 = vector.broadcast %cst_298 : f32 to vector<32x128xf32>
    %516 = arith.select %5, %514, %515 : vector<32x128xi1>, vector<32x128xf32>
    %c32_i32_299 = arith.constant 32 : i32
    %517 = tpu.dynamic_rotate %516 by %c32_i32_299 dim 1 : vector<32x128xf32>, i32 -> vector<32x128xf32>
    %518 = arith.addf %507, %517 : vector<32x128xf32>
    %c96_i32_300 = arith.constant 96 : i32
    %519 = tpu.dynamic_rotate %498 by %c96_i32_300 dim 1 : vector<32x128xf32>, i32 -> vector<32x128xf32>
    %520 = arith.addf %498, %519 : vector<32x128xf32>
    %c64_i32_301 = arith.constant 64 : i32
    %521 = tpu.dynamic_rotate %498 by %c64_i32_301 dim 1 : vector<32x128xf32>, i32 -> vector<32x128xf32>
    %522 = arith.addf %520, %521 : vector<32x128xf32>
    %c2_302 = arith.constant 2 : index
    %523 = memref.load %arg2[%c2_302] : memref<3xf32, #tpu.memory_space<smem>>
    %524 = vector.broadcast %523 : f32 to vector<32x128xf32>
    %525 = arith.addf %522, %524 : vector<32x128xf32>
    %cst_303 = arith.constant 0.000000e+00 : f32
    %526 = vector.broadcast %cst_303 : f32 to vector<32x128xf32>
    %527 = arith.select %5, %525, %526 : vector<32x128xi1>, vector<32x128xf32>
    %c64_i32_304 = arith.constant 64 : i32
    %528 = tpu.dynamic_rotate %527 by %c64_i32_304 dim 1 : vector<32x128xf32>, i32 -> vector<32x128xf32>
    %529 = arith.addf %518, %528 : vector<32x128xf32>
    %c0_305 = arith.constant 0 : index
    %c0_306 = arith.constant 0 : index
    %530 = vector.load %arg11[%c0_305, %c0_306] : memref<34x128xf32, #tpu.memory_space<vmem>>, vector<32x128xf32>
    tpu.vector_store %arg11[%c0_305, %c0_306], %529 {strides = array<i32>} : memref<34x128xf32, #tpu.memory_space<vmem>>, vector<32x128xf32>,
    %c0_307 = arith.constant 0 : index
    %c0_308 = arith.constant 0 : index
    %531 = vector.load %arg11[%c0_307, %c0_308] : memref<34x128xf32, #tpu.memory_space<vmem>>, vector<32x128xf32>
    %c0_309 = arith.constant 0 : index
    %c0_310 = arith.constant 0 : index
    %c0_311 = arith.constant 0 : index
    %532 = vector.load %arg3[%c0_309, %c0_310, %c0_311] : memref<9x1x128xf32, #tpu.memory_space<vmem>>, vector<1x1x128xf32>
    %533 = vector.shape_cast %532 : vector<1x1x128xf32> to vector<1x128xf32>
    %534 = vector.broadcast %533 : vector<1x128xf32> to vector<32x128xf32>
    %535 = arith.mulf %534, %531 : vector<32x128xf32>
    %c127_i32_312 = arith.constant 127 : i32
    %536 = tpu.dynamic_rotate %531 by %c127_i32_312 dim 1 : vector<32x128xf32>, i32 -> vector<32x128xf32>
    %c1_313 = arith.constant 1 : index
    %c0_314 = arith.constant 0 : index
    %c0_315 = arith.constant 0 : index
    %537 = vector.load %arg3[%c1_313, %c0_314, %c0_315] : memref<9x1x128xf32, #tpu.memory_space<vmem>>, vector<1x1x128xf32>
    %538 = vector.shape_cast %537 : vector<1x1x128xf32> to vector<1x128xf32>
    %539 = vector.broadcast %538 : vector<1x128xf32> to vector<32x128xf32>
    %540 = arith.mulf %539, %536 : vector<32x128xf32>
    %541 = arith.addf %535, %540 : vector<32x128xf32>
    %c126_i32_316 = arith.constant 126 : i32
    %542 = tpu.dynamic_rotate %531 by %c126_i32_316 dim 1 : vector<32x128xf32>, i32 -> vector<32x128xf32>
    %c2_317 = arith.constant 2 : index
    %c0_318 = arith.constant 0 : index
    %c0_319 = arith.constant 0 : index
    %543 = vector.load %arg3[%c2_317, %c0_318, %c0_319] : memref<9x1x128xf32, #tpu.memory_space<vmem>>, vector<1x1x128xf32>
    %544 = vector.shape_cast %543 : vector<1x1x128xf32> to vector<1x128xf32>
    %545 = vector.broadcast %544 : vector<1x128xf32> to vector<32x128xf32>
    %546 = arith.mulf %545, %542 : vector<32x128xf32>
    %547 = arith.addf %541, %546 : vector<32x128xf32>
    %c1_320 = arith.constant 1 : index
    %c0_321 = arith.constant 0 : index
    %548 = vector.load %arg11[%c1_320, %c0_321] : memref<34x128xf32, #tpu.memory_space<vmem>>, vector<32x128xf32>
    %c3_322 = arith.constant 3 : index
    %c0_323 = arith.constant 0 : index
    %c0_324 = arith.constant 0 : index
    %549 = vector.load %arg3[%c3_322, %c0_323, %c0_324] : memref<9x1x128xf32, #tpu.memory_space<vmem>>, vector<1x1x128xf32>
    %550 = vector.shape_cast %549 : vector<1x1x128xf32> to vector<1x128xf32>
    %551 = vector.broadcast %550 : vector<1x128xf32> to vector<32x128xf32>
    %552 = arith.mulf %551, %548 : vector<32x128xf32>
    %553 = arith.addf %547, %552 : vector<32x128xf32>
    %c127_i32_325 = arith.constant 127 : i32
    %554 = tpu.dynamic_rotate %548 by %c127_i32_325 dim 1 : vector<32x128xf32>, i32 -> vector<32x128xf32>
    %c4_326 = arith.constant 4 : index
    %c0_327 = arith.constant 0 : index
    %c0_328 = arith.constant 0 : index
    %555 = vector.load %arg3[%c4_326, %c0_327, %c0_328] : memref<9x1x128xf32, #tpu.memory_space<vmem>>, vector<1x1x128xf32>
    %556 = vector.shape_cast %555 : vector<1x1x128xf32> to vector<1x128xf32>
    %557 = vector.broadcast %556 : vector<1x128xf32> to vector<32x128xf32>
    %558 = arith.mulf %557, %554 : vector<32x128xf32>
    %559 = arith.addf %553, %558 : vector<32x128xf32>
    %c126_i32_329 = arith.constant 126 : i32
    %560 = tpu.dynamic_rotate %548 by %c126_i32_329 dim 1 : vector<32x128xf32>, i32 -> vector<32x128xf32>
    %c5_330 = arith.constant 5 : index
    %c0_331 = arith.constant 0 : index
    %c0_332 = arith.constant 0 : index
    %561 = vector.load %arg3[%c5_330, %c0_331, %c0_332] : memref<9x1x128xf32, #tpu.memory_space<vmem>>, vector<1x1x128xf32>
    %562 = vector.shape_cast %561 : vector<1x1x128xf32> to vector<1x128xf32>
    %563 = vector.broadcast %562 : vector<1x128xf32> to vector<32x128xf32>
    %564 = arith.mulf %563, %560 : vector<32x128xf32>
    %565 = arith.addf %559, %564 : vector<32x128xf32>
    %c2_333 = arith.constant 2 : index
    %c0_334 = arith.constant 0 : index
    %566 = vector.load %arg11[%c2_333, %c0_334] : memref<34x128xf32, #tpu.memory_space<vmem>>, vector<32x128xf32>
    %c6_335 = arith.constant 6 : index
    %c0_336 = arith.constant 0 : index
    %c0_337 = arith.constant 0 : index
    %567 = vector.load %arg3[%c6_335, %c0_336, %c0_337] : memref<9x1x128xf32, #tpu.memory_space<vmem>>, vector<1x1x128xf32>
    %568 = vector.shape_cast %567 : vector<1x1x128xf32> to vector<1x128xf32>
    %569 = vector.broadcast %568 : vector<1x128xf32> to vector<32x128xf32>
    %570 = arith.mulf %569, %566 : vector<32x128xf32>
    %571 = arith.addf %565, %570 : vector<32x128xf32>
    %c127_i32_338 = arith.constant 127 : i32
    %572 = tpu.dynamic_rotate %566 by %c127_i32_338 dim 1 : vector<32x128xf32>, i32 -> vector<32x128xf32>
    %c7_339 = arith.constant 7 : index
    %c0_340 = arith.constant 0 : index
    %c0_341 = arith.constant 0 : index
    %573 = vector.load %arg3[%c7_339, %c0_340, %c0_341] : memref<9x1x128xf32, #tpu.memory_space<vmem>>, vector<1x1x128xf32>
    %574 = vector.shape_cast %573 : vector<1x1x128xf32> to vector<1x128xf32>
    %575 = vector.broadcast %574 : vector<1x128xf32> to vector<32x128xf32>
    %576 = arith.mulf %575, %572 : vector<32x128xf32>
    %577 = arith.addf %571, %576 : vector<32x128xf32>
    %c126_i32_342 = arith.constant 126 : i32
    %578 = tpu.dynamic_rotate %566 by %c126_i32_342 dim 1 : vector<32x128xf32>, i32 -> vector<32x128xf32>
    %c8_343 = arith.constant 8 : index
    %c0_344 = arith.constant 0 : index
    %c0_345 = arith.constant 0 : index
    %579 = vector.load %arg3[%c8_343, %c0_344, %c0_345] : memref<9x1x128xf32, #tpu.memory_space<vmem>>, vector<1x1x128xf32>
    %580 = vector.shape_cast %579 : vector<1x1x128xf32> to vector<1x128xf32>
    %581 = vector.broadcast %580 : vector<1x128xf32> to vector<32x128xf32>
    %582 = arith.mulf %581, %578 : vector<32x128xf32>
    %583 = arith.addf %577, %582 : vector<32x128xf32>
    %c96_i32_346 = arith.constant 96 : i32
    %584 = tpu.dynamic_rotate %583 by %c96_i32_346 dim 1 : vector<32x128xf32>, i32 -> vector<32x128xf32>
    %585 = arith.addf %583, %584 : vector<32x128xf32>
    %c64_i32_347 = arith.constant 64 : i32
    %586 = tpu.dynamic_rotate %583 by %c64_i32_347 dim 1 : vector<32x128xf32>, i32 -> vector<32x128xf32>
    %587 = arith.addf %585, %586 : vector<32x128xf32>
    %c0_348 = arith.constant 0 : index
    %588 = memref.load %arg4[%c0_348] : memref<1xf32, #tpu.memory_space<smem>>
    %589 = vector.broadcast %588 : f32 to vector<32x128xf32>
    %590 = arith.addf %587, %589 : vector<32x128xf32>
    %cst_349 = arith.constant 0.000000e+00 : f32
    %591 = vector.broadcast %cst_349 : f32 to vector<32x128xf32>
    %592 = arith.select %5, %590, %591 : vector<32x128xi1>, vector<32x128xf32>
    %c0_350 = arith.constant 0 : index
    %c0_351 = arith.constant 0 : index
    %593 = vector.load %arg10[%c0_350, %c0_351] : memref<34x128xf32, #tpu.memory_space<vmem>>, vector<32x128xf32>
    tpu.vector_store %arg10[%c0_350, %c0_351], %592 {strides = array<i32>} : memref<34x128xf32, #tpu.memory_space<vmem>>, vector<32x128xf32>,
    %c0_352 = arith.constant 0 : index
    %c0_353 = arith.constant 0 : index
    %594 = vector.load %arg10[%c0_352, %c0_353] : memref<34x128xf32, #tpu.memory_space<vmem>>, vector<32x128xf32>
    %c1_354 = arith.constant 1 : index
    %c0_355 = arith.constant 0 : index
    %595 = vector.load %arg10[%c1_354, %c0_355] : memref<34x128xf32, #tpu.memory_space<vmem>>, vector<32x128xf32>
    %596 = arith.maximumf %594, %595 : vector<32x128xf32>
    %c127_i32_356 = arith.constant 127 : i32
    %597 = tpu.dynamic_rotate %596 by %c127_i32_356 dim 1 : vector<32x128xf32>, i32 -> vector<32x128xf32>
    %598 = arith.maximumf %596, %597 : vector<32x128xf32>
    %c0_357 = arith.constant 0 : index
    %c0_358 = arith.constant 0 : index
    %599 = vector.load %arg11[%c0_357, %c0_358] : memref<34x128xf32, #tpu.memory_space<vmem>>, vector<32x128xf32>
    tpu.vector_store %arg11[%c0_357, %c0_358], %598 {strides = array<i32>} : memref<34x128xf32, #tpu.memory_space<vmem>>, vector<32x128xf32>,
    %cst_359 = arith.constant 0.000000e+00 : f32
    %600 = vector.broadcast %cst_359 : f32 to vector<1x768xf32>
    %c0_360 = arith.constant 0 : index
    %c0_361 = arith.constant 0 : index
    %601 = vector.load %arg12[%c0_360, %c0_361] : memref<1x768xf32, #tpu.memory_space<vmem>>, vector<1x768xf32>
    tpu.vector_store %arg12[%c0_360, %c0_361], %600 {strides = array<i32>} : memref<1x768xf32, #tpu.memory_space<vmem>>, vector<1x768xf32>,
    %c0_362 = arith.constant 0 : index
    %c0_363 = arith.constant 0 : index
    %602 = vector.load %arg11[%c0_362, %c0_363] : memref<34x128xf32, #tpu.memory_space<vmem>>, vector<1x32xf32>
    %c0_364 = arith.constant 0 : index
    %c0_365 = arith.constant 0 : index
    %603 = vector.load %arg12[%c0_364, %c0_365] : memref<1x768xf32, #tpu.memory_space<vmem>>, vector<1x32xf32>
    tpu.vector_store %arg12[%c0_364, %c0_365], %602 {strides = array<i32>} : memref<1x768xf32, #tpu.memory_space<vmem>>, vector<1x32xf32>,
    %c1_366 = arith.constant 1 : index
    %c0_367 = arith.constant 0 : index
    %604 = vector.load %arg11[%c1_366, %c0_367] : memref<34x128xf32, #tpu.memory_space<vmem>>, vector<1x32xf32>
    %c0_368 = arith.constant 0 : index
    %c32 = arith.constant 32 : index
    %605 = vector.load %arg12[%c0_368, %c32] : memref<1x768xf32, #tpu.memory_space<vmem>>, vector<1x32xf32>
    tpu.vector_store %arg12[%c0_368, %c32], %604 {strides = array<i32>} : memref<1x768xf32, #tpu.memory_space<vmem>>, vector<1x32xf32>,
    %c2_369 = arith.constant 2 : index
    %c0_370 = arith.constant 0 : index
    %606 = vector.load %arg11[%c2_369, %c0_370] : memref<34x128xf32, #tpu.memory_space<vmem>>, vector<1x32xf32>
    %c0_371 = arith.constant 0 : index
    %c64 = arith.constant 64 : index
    %607 = vector.load %arg12[%c0_371, %c64] : memref<1x768xf32, #tpu.memory_space<vmem>>, vector<1x32xf32>
    tpu.vector_store %arg12[%c0_371, %c64], %606 {strides = array<i32>} : memref<1x768xf32, #tpu.memory_space<vmem>>, vector<1x32xf32>,
    %c3_372 = arith.constant 3 : index
    %c0_373 = arith.constant 0 : index
    %608 = vector.load %arg11[%c3_372, %c0_373] : memref<34x128xf32, #tpu.memory_space<vmem>>, vector<1x32xf32>
    %c0_374 = arith.constant 0 : index
    %c96 = arith.constant 96 : index
    %609 = vector.load %arg12[%c0_374, %c96] : memref<1x768xf32, #tpu.memory_space<vmem>>, vector<1x32xf32>
    tpu.vector_store %arg12[%c0_374, %c96], %608 {strides = array<i32>} : memref<1x768xf32, #tpu.memory_space<vmem>>, vector<1x32xf32>,
    %c4_375 = arith.constant 4 : index
    %c0_376 = arith.constant 0 : index
    %610 = vector.load %arg11[%c4_375, %c0_376] : memref<34x128xf32, #tpu.memory_space<vmem>>, vector<1x32xf32>
    %c0_377 = arith.constant 0 : index
    %c128 = arith.constant 128 : index
    %611 = vector.load %arg12[%c0_377, %c128] : memref<1x768xf32, #tpu.memory_space<vmem>>, vector<1x32xf32>
    tpu.vector_store %arg12[%c0_377, %c128], %610 {strides = array<i32>} : memref<1x768xf32, #tpu.memory_space<vmem>>, vector<1x32xf32>,
    %c5_378 = arith.constant 5 : index
    %c0_379 = arith.constant 0 : index
    %612 = vector.load %arg11[%c5_378, %c0_379] : memref<34x128xf32, #tpu.memory_space<vmem>>, vector<1x32xf32>
    %c0_380 = arith.constant 0 : index
    %c160 = arith.constant 160 : index
    %613 = vector.load %arg12[%c0_380, %c160] : memref<1x768xf32, #tpu.memory_space<vmem>>, vector<1x32xf32>
    tpu.vector_store %arg12[%c0_380, %c160], %612 {strides = array<i32>} : memref<1x768xf32, #tpu.memory_space<vmem>>, vector<1x32xf32>,
    %c6_381 = arith.constant 6 : index
    %c0_382 = arith.constant 0 : index
    %614 = vector.load %arg11[%c6_381, %c0_382] : memref<34x128xf32, #tpu.memory_space<vmem>>, vector<1x32xf32>
    %c0_383 = arith.constant 0 : index
    %c192 = arith.constant 192 : index
    %615 = vector.load %arg12[%c0_383, %c192] : memref<1x768xf32, #tpu.memory_space<vmem>>, vector<1x32xf32>
    tpu.vector_store %arg12[%c0_383, %c192], %614 {strides = array<i32>} : memref<1x768xf32, #tpu.memory_space<vmem>>, vector<1x32xf32>,
    %c7_384 = arith.constant 7 : index
    %c0_385 = arith.constant 0 : index
    %616 = vector.load %arg11[%c7_384, %c0_385] : memref<34x128xf32, #tpu.memory_space<vmem>>, vector<1x32xf32>
    %c0_386 = arith.constant 0 : index
    %c224 = arith.constant 224 : index
    %617 = vector.load %arg12[%c0_386, %c224] : memref<1x768xf32, #tpu.memory_space<vmem>>, vector<1x32xf32>
    tpu.vector_store %arg12[%c0_386, %c224], %616 {strides = array<i32>} : memref<1x768xf32, #tpu.memory_space<vmem>>, vector<1x32xf32>,
    %c8_387 = arith.constant 8 : index
    %c0_388 = arith.constant 0 : index
    %618 = vector.load %arg11[%c8_387, %c0_388] : memref<34x128xf32, #tpu.memory_space<vmem>>, vector<1x32xf32>
    %c0_389 = arith.constant 0 : index
    %c256 = arith.constant 256 : index
    %619 = vector.load %arg12[%c0_389, %c256] : memref<1x768xf32, #tpu.memory_space<vmem>>, vector<1x32xf32>
    tpu.vector_store %arg12[%c0_389, %c256], %618 {strides = array<i32>} : memref<1x768xf32, #tpu.memory_space<vmem>>, vector<1x32xf32>,
    %c9_390 = arith.constant 9 : index
    %c0_391 = arith.constant 0 : index
    %620 = vector.load %arg11[%c9_390, %c0_391] : memref<34x128xf32, #tpu.memory_space<vmem>>, vector<1x32xf32>
    %c0_392 = arith.constant 0 : index
    %c288 = arith.constant 288 : index
    %621 = vector.load %arg12[%c0_392, %c288] : memref<1x768xf32, #tpu.memory_space<vmem>>, vector<1x32xf32>
    tpu.vector_store %arg12[%c0_392, %c288], %620 {strides = array<i32>} : memref<1x768xf32, #tpu.memory_space<vmem>>, vector<1x32xf32>,
    %c10_393 = arith.constant 10 : index
    %c0_394 = arith.constant 0 : index
    %622 = vector.load %arg11[%c10_393, %c0_394] : memref<34x128xf32, #tpu.memory_space<vmem>>, vector<1x32xf32>
    %c0_395 = arith.constant 0 : index
    %c320 = arith.constant 320 : index
    %623 = vector.load %arg12[%c0_395, %c320] : memref<1x768xf32, #tpu.memory_space<vmem>>, vector<1x32xf32>
    tpu.vector_store %arg12[%c0_395, %c320], %622 {strides = array<i32>} : memref<1x768xf32, #tpu.memory_space<vmem>>, vector<1x32xf32>,
    %c11_396 = arith.constant 11 : index
    %c0_397 = arith.constant 0 : index
    %624 = vector.load %arg11[%c11_396, %c0_397] : memref<34x128xf32, #tpu.memory_space<vmem>>, vector<1x32xf32>
    %c0_398 = arith.constant 0 : index
    %c352 = arith.constant 352 : index
    %625 = vector.load %arg12[%c0_398, %c352] : memref<1x768xf32, #tpu.memory_space<vmem>>, vector<1x32xf32>
    tpu.vector_store %arg12[%c0_398, %c352], %624 {strides = array<i32>} : memref<1x768xf32, #tpu.memory_space<vmem>>, vector<1x32xf32>,
    %c12_399 = arith.constant 12 : index
    %c0_400 = arith.constant 0 : index
    %626 = vector.load %arg11[%c12_399, %c0_400] : memref<34x128xf32, #tpu.memory_space<vmem>>, vector<1x32xf32>
    %c0_401 = arith.constant 0 : index
    %c384 = arith.constant 384 : index
    %627 = vector.load %arg12[%c0_401, %c384] : memref<1x768xf32, #tpu.memory_space<vmem>>, vector<1x32xf32>
    tpu.vector_store %arg12[%c0_401, %c384], %626 {strides = array<i32>} : memref<1x768xf32, #tpu.memory_space<vmem>>, vector<1x32xf32>,
    %c13_402 = arith.constant 13 : index
    %c0_403 = arith.constant 0 : index
    %628 = vector.load %arg11[%c13_402, %c0_403] : memref<34x128xf32, #tpu.memory_space<vmem>>, vector<1x32xf32>
    %c0_404 = arith.constant 0 : index
    %c416 = arith.constant 416 : index
    %629 = vector.load %arg12[%c0_404, %c416] : memref<1x768xf32, #tpu.memory_space<vmem>>, vector<1x32xf32>
    tpu.vector_store %arg12[%c0_404, %c416], %628 {strides = array<i32>} : memref<1x768xf32, #tpu.memory_space<vmem>>, vector<1x32xf32>,
    %c14_405 = arith.constant 14 : index
    %c0_406 = arith.constant 0 : index
    %630 = vector.load %arg11[%c14_405, %c0_406] : memref<34x128xf32, #tpu.memory_space<vmem>>, vector<1x32xf32>
    %c0_407 = arith.constant 0 : index
    %c448 = arith.constant 448 : index
    %631 = vector.load %arg12[%c0_407, %c448] : memref<1x768xf32, #tpu.memory_space<vmem>>, vector<1x32xf32>
    tpu.vector_store %arg12[%c0_407, %c448], %630 {strides = array<i32>} : memref<1x768xf32, #tpu.memory_space<vmem>>, vector<1x32xf32>,
    %c15_408 = arith.constant 15 : index
    %c0_409 = arith.constant 0 : index
    %632 = vector.load %arg11[%c15_408, %c0_409] : memref<34x128xf32, #tpu.memory_space<vmem>>, vector<1x32xf32>
    %c0_410 = arith.constant 0 : index
    %c480 = arith.constant 480 : index
    %633 = vector.load %arg12[%c0_410, %c480] : memref<1x768xf32, #tpu.memory_space<vmem>>, vector<1x32xf32>
    tpu.vector_store %arg12[%c0_410, %c480], %632 {strides = array<i32>} : memref<1x768xf32, #tpu.memory_space<vmem>>, vector<1x32xf32>,
    %c16_411 = arith.constant 16 : index
    %c0_412 = arith.constant 0 : index
    %634 = vector.load %arg11[%c16_411, %c0_412] : memref<34x128xf32, #tpu.memory_space<vmem>>, vector<1x32xf32>
    %c0_413 = arith.constant 0 : index
    %c512 = arith.constant 512 : index
    %635 = vector.load %arg12[%c0_413, %c512] : memref<1x768xf32, #tpu.memory_space<vmem>>, vector<1x32xf32>
    tpu.vector_store %arg12[%c0_413, %c512], %634 {strides = array<i32>} : memref<1x768xf32, #tpu.memory_space<vmem>>, vector<1x32xf32>,
    %c17_414 = arith.constant 17 : index
    %c0_415 = arith.constant 0 : index
    %636 = vector.load %arg11[%c17_414, %c0_415] : memref<34x128xf32, #tpu.memory_space<vmem>>, vector<1x32xf32>
    %c0_416 = arith.constant 0 : index
    %c544 = arith.constant 544 : index
    %637 = vector.load %arg12[%c0_416, %c544] : memref<1x768xf32, #tpu.memory_space<vmem>>, vector<1x32xf32>
    tpu.vector_store %arg12[%c0_416, %c544], %636 {strides = array<i32>} : memref<1x768xf32, #tpu.memory_space<vmem>>, vector<1x32xf32>,
    %c18_417 = arith.constant 18 : index
    %c0_418 = arith.constant 0 : index
    %638 = vector.load %arg11[%c18_417, %c0_418] : memref<34x128xf32, #tpu.memory_space<vmem>>, vector<1x32xf32>
    %c0_419 = arith.constant 0 : index
    %c576 = arith.constant 576 : index
    %639 = vector.load %arg12[%c0_419, %c576] : memref<1x768xf32, #tpu.memory_space<vmem>>, vector<1x32xf32>
    tpu.vector_store %arg12[%c0_419, %c576], %638 {strides = array<i32>} : memref<1x768xf32, #tpu.memory_space<vmem>>, vector<1x32xf32>,
    %c19_420 = arith.constant 19 : index
    %c0_421 = arith.constant 0 : index
    %640 = vector.load %arg11[%c19_420, %c0_421] : memref<34x128xf32, #tpu.memory_space<vmem>>, vector<1x32xf32>
    %c0_422 = arith.constant 0 : index
    %c608 = arith.constant 608 : index
    %641 = vector.load %arg12[%c0_422, %c608] : memref<1x768xf32, #tpu.memory_space<vmem>>, vector<1x32xf32>
    tpu.vector_store %arg12[%c0_422, %c608], %640 {strides = array<i32>} : memref<1x768xf32, #tpu.memory_space<vmem>>, vector<1x32xf32>,
    %c20_423 = arith.constant 20 : index
    %c0_424 = arith.constant 0 : index
    %642 = vector.load %arg11[%c20_423, %c0_424] : memref<34x128xf32, #tpu.memory_space<vmem>>, vector<1x32xf32>
    %c0_425 = arith.constant 0 : index
    %c640 = arith.constant 640 : index
    %643 = vector.load %arg12[%c0_425, %c640] : memref<1x768xf32, #tpu.memory_space<vmem>>, vector<1x32xf32>
    tpu.vector_store %arg12[%c0_425, %c640], %642 {strides = array<i32>} : memref<1x768xf32, #tpu.memory_space<vmem>>, vector<1x32xf32>,
    %c21_426 = arith.constant 21 : index
    %c0_427 = arith.constant 0 : index
    %644 = vector.load %arg11[%c21_426, %c0_427] : memref<34x128xf32, #tpu.memory_space<vmem>>, vector<1x32xf32>
    %c0_428 = arith.constant 0 : index
    %c672 = arith.constant 672 : index
    %645 = vector.load %arg12[%c0_428, %c672] : memref<1x768xf32, #tpu.memory_space<vmem>>, vector<1x32xf32>
    tpu.vector_store %arg12[%c0_428, %c672], %644 {strides = array<i32>} : memref<1x768xf32, #tpu.memory_space<vmem>>, vector<1x32xf32>,
    tpu.wait_dma2 semaphore(%arg9 : memref<!tpu.dma_semaphore, #tpu.memory_space<semaphore_mem>>) src(%arg5 : memref<768x512xbf16, #tpu.memory_space<any>>) dst(%arg8 : memref<768x512xbf16, #tpu.memory_space<vmem>>)
    %c0_429 = arith.constant 0 : index
    %c0_430 = arith.constant 0 : index
    %646 = vector.load %arg12[%c0_429, %c0_430] : memref<1x768xf32, #tpu.memory_space<vmem>>, vector<1x768xf32>
    %647 = arith.truncf %646 : vector<1x768xf32> to vector<1x768xbf16>
    %c0_431 = arith.constant 0 : index
    %c0_432 = arith.constant 0 : index
    %648 = vector.load %arg8[%c0_431, %c0_432] : memref<768x512xbf16, #tpu.memory_space<vmem>>, vector<768x512xbf16>
    %cst_433 = arith.constant dense<0.000000e+00> : vector<1x512xf32>
    %649 = tpu.matmul %647, %648, %cst_433 {dimension_numbers = #tpu.dot_dimension_numbers<[1], [0], [0], [1], [0, 0, 1, 1], [], []>} : vector<1x768xbf16>, vector<768x512xbf16>, vector<1x512xf32> -> vector<1x512xf32>
    %c0_434 = arith.constant 0 : index
    %c0_435 = arith.constant 0 : index
    %650 = vector.load %arg6[%c0_434, %c0_435] : memref<1x512xf32, #tpu.memory_space<vmem>>, vector<1x512xf32>
    %651 = arith.addf %649, %650 : vector<1x512xf32>
    %cst_436 = arith.constant 0.000000e+00 : f32
    %652 = vector.broadcast %cst_436 : f32 to vector<1x512xf32>
    %653 = arith.maximumf %651, %652 : vector<1x512xf32>
    %c0_437 = arith.constant 0 : index
    %c0_438 = arith.constant 0 : index
    %654 = vector.load %arg7[%c0_437, %c0_438] : memref<1x512xf32, #tpu.memory_space<vmem>>, vector<1x512xf32>
    tpu.vector_store %arg7[%c0_437, %c0_438], %653 {strides = array<i32>} : memref<1x512xf32, #tpu.memory_space<vmem>>, vector<1x512xf32>,
    return
  }
}

</mosaic_0001>

<bundles_post_ra>
// kernel: forward_pallas.1
= control target key start
LH: loop header
LB: loop body
LE: loop exit
PB: predicated region body
PF: predicated region fallthrough
CT: control target
= control target key end

     0   :  { %13 = vsyncpa [#allocation10], 0  ;;  %s5184_s0 = inlined_call_operand.vmem [shape: f32[34,128], index: 0, kind: input, shape index: {}]   ;;  %s5185_s1 = inlined_call_operand.vmem [shape: f32[27,1,128], index: 1, kind: input, shape index: {}]   ;;  %s5186_s2 = inlined_call_operand.vmem [shape: f32[3], index: 2, kind: input, shape index: {}]   ;;  %s5187_s3 = inlined_call_operand.vmem [shape: f32[9,1,128], index: 3, kind: input, shape index: {}]   ;;  %s5188_s4 = inlined_call_operand.<no memory space> [shape: f32[1], index: 4, kind: input, shape index: {}]   ;;  %s5189_s5 = inlined_call_operand.hbm [shape: bf16[768,512], index: 5, kind: input, shape index: {}]   ;;  %s5190_s6 = inlined_call_operand.vmem [shape: f32[1,512], index: 6, kind: input, shape index: {}]   ;;  %s5191_s7 = inlined_call_operand.hbm [shape: f32[1,512], index: 7, kind: output, shape index: {}]  }
   0x1   :  { %14 = vsyncpa [#allocation9], 0  ;;  %s25_s26 = sshll.u32 %s5186_s2, 4  ;;  %s26_s26 = int_to_ptr.vmem [resolvable:$true] %s25_s26 }
   0x2   :  { %s3307_s27 = scalar_lea.vmem %s26_s26, 16  ;;  %p3312_p1 = scmp.lt.s32.totalorder %s26_s26, %s26_s26 }
   0x3   :  { %p3308_p0 = scmp.ne.s32.totalorder %s26_s26, %s3307_s27  ;;  %p3313_p2 = scmp.lt.s32.totalorder %s3307_s27, %s3307_s27 }
   0x5   :  { %p3314_p3 = por %p3313_p2, %p3312_p1 }
   0x7   :  { %p3315_p4 = pnand %p3314_p3, %p3308_p0 }
   0x9   :  { %3318 = shalt.err (!%p3315_p4)
}
   0xa   :  { %s3347_s28 = smov [#allocation8]  }
   0xb   :  { %28 = dma.vmem_to_smem %s26_s26, 16, %s3347_s28, [#allocation10]  }
   0xc   :  { %3341 = dma.done.wait [#allocation10], 16  }
   0xd   :  { %3342 = vsyncadd [#allocation10], 4294967280 }
   0xe   :  { %38 = sfence }
   0xf   :  { %s43_s29 = sld [smem:[#allocation0]]   ;;  %s3348_s30 = smov [#allocation2]  }
  0x10   :  { %s51_s8 = sshll.u32 %s3348_s30, 4  ;;  %s3349_s9 = smov 512   ;;  %s52_s8 = int_to_ptr.vmem [resolvable:$true] %s51_s8 }
  0x11   :  { %55 = sst [smem:[#allocation13]] %s3349_s9  ;;  %s3350_s2 = smov 4  }
  0x12   :  { %57 = sst [smem:[#allocation13 + $0x1]] %s3349_s9  ;;  %s3351_s10 = smov 64  }
  0x13   :  { %59 = sst [smem:[#allocation13 + $0x2]] %s3350_s2  ;;  %s3352_s12 = smov 128  }
  0x14   :  { %61 = sst [smem:[#allocation13 + $0x3]] %s3351_s10  ;;  %s3353_s14 = smov 2  }
  0x15   :  { %s3062_s11 = sshll.u32 %s43_s29, 26  ;;  %63 = sst [smem:[#allocation13 + $0x4]] %s3352_s12 }
  0x16   :  { %s3063_s13 = sadd.s32 134217728, %s3062_s11  ;;  %65 = sst [smem:[#allocation13 + $0x5]] %s3353_s14 }
  0x17   :  { %s3354_s15 = smov 256   ;;  %69 = sst [smem:[#allocation13 + $0x7]] %s3351_s10 }
  0x18   :  { %67 = sst [smem:[#allocation13 + $0x6]] %s3354_s15  ;;  %s3355_s16 = smov [#allocation3]  }
  0x19   :  { %71 = sst [smem:[#allocation13 + $0x8]] %s3350_s2  ;;  %s3356_s17 = smov [#allocation12]  }
  0x1a   :  { %73 = dma.general %s5189_s5, 24576, %s52_s8, %s3355_s16, %s3356_s17, [#allocation13], %s3063_s13, 0  }
  0x1b   :  { %v89_v0 = vld [vmem:[%s5184_s0 + $0x10] sm:$0xff]  ;;  %v87_v1 = vld [vmem:[%s5184_s0] sm:$0xff]  ;;  %s3357_s24 = smov 127   ;;  %v90_v2 = vld [vmem:[%s5184_s0 + $0x18] sm:$0xff]  ;;  %s3358_s5 = smov 126  }
  0x1c   :  { %130 = vrot.lane.b32.xlu1 %v89_v0, %s3357_s24  ;;  %126 = vrot.lane.b32.xlu0 %v87_v1, %s3357_s24  ;;  %v88_v3 = vld [vmem:[%s5184_s0 + $0x8] sm:$0xff]  ;;  %v241_v6 = vld [vmem:[%s5184_s0 + $0x19] sm:$0xff]  ;;  %s3359_s22 = smov 96   ;;  %s3117_s8 = sld [smem:[#allocation8 + $0x1]] }
  0x1d   :  { %v239_v4 = vld [vmem:[%s5184_s0 + $0x9] sm:$0xff]  ;;  %v238_v5 = vld [vmem:[%s5184_s0 + $0x1] sm:$0xff]  ;;  %v240_v7 = vld [vmem:[%s5184_s0 + $0x11] sm:$0xff]  ;;  %s3361_s9 = smov 32   ;;  %s3118_s2 = sld [smem:[#allocation8 + $0x2]] }
  0x1e   :  { %v403_v8 = vld [vmem:[%s5184_s0 + $0xa] sm:$0xff]  ;;  %v402_v9 = vld [vmem:[%s5184_s0 + $0x2] sm:$0xff]  ;;  %v3463_v10 = vld [vmem:[%s5184_s0 + $0x1a] sm:$0xff]  ;;  %s590_s11 = sld [smem:[#allocation8]]  ;;  %s3228_s17 = sld [smem:[#allocation8 + $0x2]] }
  0x1f   :  { %v3468_v11 = vld [vmem:[%s5184_s0 + $0x12] sm:$0xff]  ;;  %v3483_v12 = vld [vmem:[%s5185_s1] ss:$0 sm:$0xff]  ;;  %v3488_v13 = vld [vmem:[%s5185_s1 + $0x9] ss:$0 sm:$0xff]  ;;  %s1784_s18 = sld [smem:[#allocation8]] }
  0x20   :  { %132 = vrot.lane.b32.xlu1 %v90_v2, %s3357_s24  ;;  %128 = vrot.lane.b32.xlu0 %v88_v3, %s3357_s24  ;;  %5233 = vst [vmem:[#allocation17_spill] sm:$0xff] %v3483_v12  ;;  %5234 = vst [vmem:[#allocation18_spill] sm:$0xff] %v3488_v13  ;;  %v3493_v14 = vld [vmem:[%s5185_s1 + $0x12] ss:$0 sm:$0xff]  ;;  %v3496_v15 = vmul.f32 %v3483_v12, %v89_v0  ;;  %v3499_v16 = vmul.f32 %v3488_v13, %v89_v0  ;;  %v3082_v17 = vld [vmem:[%s5185_s1 + $0x3] ss:$0 sm:$0xff] }
  0x21   :  { %5235 = vst [vmem:[#allocation19_spill] sm:$0xff] %v3493_v14  ;;  %v3505_v18 = vmul.f32 %v3493_v14, %v89_v0  ;;  %v98_v19 = vmul.f32 %v3483_v12, %v87_v1  ;;  %v110_v20 = vmul.f32 %v3488_v13, %v87_v1  ;;  %v122_v21 = vmul.f32 %v3493_v14, %v87_v1  ;;  %v3513_v22 = vld [vmem:[%s5185_s1 + $0xc] ss:$0 sm:$0xff]  ;;  %v3518_v23 = vld [vmem:[%s5185_s1 + $0x15] ss:$0 sm:$0xff] }
  0x22   :  { %5236 = vst [vmem:[#allocation20_spill] sm:$0xff] %v3513_v22  ;;  %5237 = vst [vmem:[#allocation21_spill] sm:$0xff] %v3518_v23  ;;  %v3521_v24 = vmul.f32 %v3483_v12, %v90_v2  ;;  %v3524_v25 = vmul.f32 %v3488_v13, %v90_v2  ;;  %v3527_v26 = vmul.f32 %v3493_v14, %v90_v2  ;;  %v3070_v28 = vld [vmem:[%s5185_s1 + $0x1] ss:$0 sm:$0xff]  ;;  %v3542_v35 = vld [vmem:[%s5185_s1 + $0xf] ss:$0 sm:$0xff] }
  0x23   :  { %v99_v27 = vmul.f32 %v3483_v12, %v88_v3  ;;  %v111_v31 = vmul.f32 %v3488_v13, %v88_v3  ;;  %v123_v32 = vmul.f32 %v3493_v14, %v88_v3  ;;  %v3535_v33 = vmul.f32 %v3082_v17, %v239_v4  ;;  %v3547_v36 = vld [vmem:[%s5185_s1 + $0xa] ss:$0 sm:$0xff]  ;;  %v3552_v37 = vld [vmem:[%s5185_s1 + $0x13] ss:$0 sm:$0xff]  ;;  %v3568_v42 = vld [vmem:[%s5185_s1 + $0x18] ss:$0 sm:$0xff] }
  0x24   :  { %184 = vrot.lane.b32.xlu1 %v88_v3, %s3358_s5  ;;  %182 = vrot.lane.b32.xlu0 %v87_v1, %s3358_s5  ;;  %v3537_v34 = vmul.f32 %v3082_v17, %v238_v5  ;;  %v3555_v38 = vmul.f32 %v3513_v22, %v239_v4  ;;  %v3558_v39 = vmul.f32 %v3518_v23, %v239_v4  ;;  %v3584_v47 = vld [vmem:[%s5185_s1 + $0x6] ss:$0 sm:$0xff]  ;;  %v3621_v3 = vld [vmem:[%s5185_s1 + $0xb] ss:$0 sm:$0xff] }
  0x25   :  { %v3561_v40 = vmul.f32 %v3513_v22, %v238_v5  ;;  %v3563_v41 = vmul.f32 %v3082_v17, %v241_v6  ;;  %v3571_v43 = vmul.f32 %v3518_v23, %v238_v5  ;;  %v3574_v44 = vmul.f32 %v3513_v22, %v241_v6  ;;  %5238 = vst [vmem:[#allocation22_spill] sm:$0xff] %v3584_v47 }
  0x26   :  { %v3577_v45 = vmul.f32 %v3518_v23, %v241_v6  ;;  %v3579_v46 = vmul.f32 %v3082_v17, %v240_v7  ;;  %v3587_v49 = vmul.f32 %v3513_v22, %v240_v7  ;;  %v3590_v50 = vmul.f32 %v3518_v23, %v240_v7 }
  0x27   :  { %v3593_v51 = vmul.f32 %v3542_v35, %v403_v8  ;;  %v3598_v56 = vmul.f32 %v3542_v35, %v402_v9  ;;  %v3601_v57 = vmul.f32 %v3568_v42, %v403_v8  ;;  %v3604_v59 = vmul.f32 %v3568_v42, %v402_v9 }
  0x28   :  { %188 = vrot.lane.b32.xlu1 %v90_v2, %s3358_s5  ;;  %186 = vrot.lane.b32.xlu0 %v89_v0, %s3358_s5  ;;  %v3607_v60 = vmul.f32 %v3584_v47, %v403_v8  ;;  %v3610_v61 = vmul.f32 %v3584_v47, %v402_v9  ;;  %v3076_v2 = vld [vmem:[%s5185_s1 + $0x2] ss:$0 sm:$0xff] }
  0x2a   :  { %5239 = vst [vmem:[#allocation23_spill] sm:$0xff] %v3607_v60  ;;  %5240 = vst [vmem:[#allocation24_spill] sm:$0xff] %v3610_v61 }
  0x2c   :  { %292 = vrot.lane.b32.xlu1 %v239_v4, %s3357_s24  ;;  %290 = vrot.lane.b32.xlu0 %v238_v5, %s3357_s24 }
  0x30   :  { %296 = vrot.lane.b32.xlu1 %v241_v6, %s3357_s24  ;;  %294 = vrot.lane.b32.xlu0 %v240_v7, %s3357_s24 }
  0x34   :  { %348 = vrot.lane.b32.xlu1 %v239_v4, %s3358_s5  ;;  %346 = vrot.lane.b32.xlu0 %v238_v5, %s3358_s5  ;;  %v3626_v4 = vld [vmem:[%s5185_s1 + $0x14] ss:$0 sm:$0xff] }
  0x38   :  { %352 = vrot.lane.b32.xlu1 %v241_v6, %s3358_s5  ;;  %350 = vrot.lane.b32.xlu0 %v240_v7, %s3358_s5 }
  0x3c   :  { %456 = vrot.lane.b32.xlu1 %v403_v8, %s3357_s24  ;;  %454 = vrot.lane.b32.xlu0 %v402_v9, %s3357_s24 }
  0x40   :  { %460 = vrot.lane.b32.xlu1 %v3463_v10, %s3357_s24  ;;  %458 = vrot.lane.b32.xlu0 %v3468_v11, %s3357_s24 }
  0x44   :  { %512 = vrot.lane.b32.xlu1 %v403_v8, %s3358_s5  ;;  %510 = vrot.lane.b32.xlu0 %v402_v9, %s3358_s5 }
  0x48   :  { %516 = vrot.lane.b32.xlu1 %v3463_v10, %s3358_s5  ;;  %514 = vrot.lane.b32.xlu0 %v3468_v11, %s3358_s5 }
  0x8e   :  { %v131_v29 = vpop.permute.xlu1 %130  ;;  %v127_v30 = vpop.permute.xlu0 %126 }
  0x8f   :  { %v142_v48 = vmul.f32 %v3070_v28, %v127_v30  ;;  %v158_v52 = vmul.f32 %v3547_v36, %v127_v30  ;;  %v174_v53 = vmul.f32 %v3552_v37, %v127_v30  ;;  %v144_v62 = vmul.f32 %v3070_v28, %v131_v29 }
  0x90   :  { %v160_v63 = vmul.f32 %v3547_v36, %v131_v29  ;;  %v176_v5 = vmul.f32 %v3552_v37, %v131_v29 }
  0x91   :  { %v146_v6 = vadd.f32 %v142_v48, %v98_v19  ;;  %v162_v9 = vadd.f32 %v158_v52, %v110_v20  ;;  %v178_v17 = vadd.f32 %v174_v53, %v122_v21 }
  0x92   :  { %v133_v54 = vpop.permute.xlu1 %132  ;;  %v129_v55 = vpop.permute.xlu0 %128 }
  0x93   :  { %v143_v58 = vmul.f32 %v3070_v28, %v129_v55  ;;  %v159_v0 = vmul.f32 %v3547_v36, %v129_v55  ;;  %v175_v1 = vmul.f32 %v3552_v37, %v129_v55  ;;  %v145_v7 = vmul.f32 %v3070_v28, %v133_v54 }
  0x94   :  { %v161_v8 = vmul.f32 %v3547_v36, %v133_v54  ;;  %v177_v60 = vmul.f32 %v3552_v37, %v133_v54 }
  0x95   :  { %v147_v30 = vadd.f32 %v143_v58, %v99_v27  ;;  %v163_v55 = vadd.f32 %v159_v0, %v111_v31  ;;  %v179_v47 = vadd.f32 %v175_v1, %v123_v32  ;;  %v149_v20 = vadd.f32 %v145_v7, %v3521_v24 }
  0x96   :  { %v185_v23 = vpop.permute.xlu1 %184  ;;  %v183_v22 = vpop.permute.xlu0 %182  ;;  %v165_v21 = vadd.f32 %v161_v8, %v3524_v25  ;;  %v148_v25 = vadd.f32 %v144_v62, %v3496_v15  ;;  %v180_v7 = vadd.f32 %v176_v5, %v3505_v18 }
  0x97   :  { %v199_v14 = vmul.f32 %v3076_v2, %v185_v23  ;;  %v215_v12 = vmul.f32 %v3621_v3, %v185_v23  ;;  %v231_v13 = vmul.f32 %v3626_v4, %v185_v23  ;;  %v198_v61 = vmul.f32 %v3076_v2, %v183_v22 }
  0x98   :  { %v214_v19 = vmul.f32 %v3621_v3, %v183_v22  ;;  %v230_v28 = vmul.f32 %v3626_v4, %v183_v22 }
  0x99   :  { %v203_v27 = vadd.f32 %v199_v14, %v147_v30  ;;  %v219_v29 = vadd.f32 %v215_v12, %v163_v55  ;;  %v235_v31 = vadd.f32 %v231_v13, %v179_v47  ;;  %v202_v48 = vadd.f32 %v198_v61, %v146_v6  ;;  %v3088_v12 = vld [vmem:[%s5185_s1 + $0x4] ss:$0 sm:$0xff] }
  0x9a   :  { %v218_v52 = vadd.f32 %v214_v19, %v162_v9  ;;  %v234_v53 = vadd.f32 %v230_v28, %v178_v17  ;;  %v189_v58 = vpop.permute.xlu1 %188  ;;  %v187_v23 = vpop.permute.xlu0 %186  ;;  %v164_v47 = vadd.f32 %v160_v63, %v3499_v16  ;;  %v181_v61 = vadd.f32 %v177_v60, %v3527_v26 }
  0x9b   :  { %v201_v0 = vmul.f32 %v3076_v2, %v189_v58  ;;  %v217_v54 = vmul.f32 %v3621_v3, %v189_v58  ;;  %v233_v32 = vmul.f32 %v3626_v4, %v189_v58  ;;  %v200_v1 = vmul.f32 %v3076_v2, %v187_v23  ;;  %v3652_v2 = vld [vmem:[%s5185_s1 + $0xd] ss:$0 sm:$0xff] }
  0x9c   :  { %v216_v22 = vmul.f32 %v3621_v3, %v187_v23  ;;  %v232_v24 = vmul.f32 %v3626_v4, %v187_v23  ;;  %v255_v13 = vadd.f32 %v3535_v33, %v203_v27  ;;  %v271_v14 = vadd.f32 %v3555_v38, %v219_v29  ;;  %v3658_v33 = vld [vmem:[%s5185_s1 + $0x16] ss:$0 sm:$0xff]  ;;  %v3695_v23 = vld [vmem:[%s5185_s1 + $0x5] ss:$0 sm:$0xff] }
  0x9d   :  { %v205_v6 = vadd.f32 %v201_v0, %v149_v20  ;;  %v221_v8 = vadd.f32 %v217_v54, %v165_v21  ;;  %v287_v15 = vadd.f32 %v3558_v39, %v235_v31  ;;  %v254_v26 = vadd.f32 %v3537_v34, %v202_v48  ;;  %5241 = vst [vmem:[#allocation25_spill] sm:$0xff] %v3695_v23 }
  0x9e   :  { %v293_v38 = vpop.permute.xlu1 %292  ;;  %v291_v16 = vpop.permute.xlu0 %290  ;;  %v237_v60 = vadd.f32 %v233_v32, %v181_v61  ;;  %v204_v62 = vadd.f32 %v200_v1, %v148_v25  ;;  %v270_v9 = vadd.f32 %v3561_v40, %v218_v52  ;;  %v220_v17 = vadd.f32 %v216_v22, %v164_v47 }
  0x9f   :  { %v307_v63 = vmul.f32 %v3088_v12, %v293_v38  ;;  %v236_v30 = vadd.f32 %v232_v24, %v180_v7  ;;  %v323_v18 = vmul.f32 %v3652_v2, %v293_v38  ;;  %v286_v5 = vadd.f32 %v3571_v43, %v234_v53 }
  0xa0   :  { %v339_v55 = vmul.f32 %v3658_v33, %v293_v38  ;;  %v3667_v19 = vadd.f32 %v3563_v41, %v205_v6  ;;  %v3671_v39 = vmul.f32 %v3542_v35, %v3463_v10  ;;  %v3675_v34 = vmul.f32 %v3542_v35, %v3468_v11 }
  0xa1   :  { %v306_v40 = vmul.f32 %v3088_v12, %v291_v16  ;;  %v322_v28 = vmul.f32 %v3652_v2, %v291_v16  ;;  %v338_v20 = vmul.f32 %v3658_v33, %v291_v16  ;;  %v273_v43 = vadd.f32 %v3574_v44, %v221_v8 }
  0xa2   :  { %v297_v21 = vpop.permute.xlu1 %296  ;;  %v295_v27 = vpop.permute.xlu0 %294  ;;  %v311_v29 = vadd.f32 %v307_v63, %v255_v13  ;;  %v289_v41 = vadd.f32 %v3577_v45, %v237_v60  ;;  %v3683_v31 = vmul.f32 %v3568_v42, %v3463_v10  ;;  %v3687_v48 = vmul.f32 %v3568_v42, %v3468_v11  ;;  %v3700_v45 = vld [vmem:[%s5185_s1 + $0xe] ss:$0 sm:$0xff]  ;;  %v3705_v42 = vld [vmem:[%s5185_s1 + $0x17] ss:$0 sm:$0xff] }
  0xa3   :  { %v327_v52 = vadd.f32 %v323_v18, %v271_v14  ;;  %v256_v53 = vadd.f32 %v3579_v46, %v204_v62  ;;  %v272_v58 = vadd.f32 %v3587_v49, %v220_v17  ;;  %v288_v44 = vadd.f32 %v3590_v50, %v236_v30 }
  0xa4   :  { %v343_v46 = vadd.f32 %v339_v55, %v287_v15  ;;  %v325_v49 = vmul.f32 %v3652_v2, %v297_v21  ;;  %v341_v50 = vmul.f32 %v3658_v33, %v297_v21  ;;  %v324_v0 = vmul.f32 %v3652_v2, %v295_v27 }
  0xa5   :  { %v310_v54 = vadd.f32 %v306_v40, %v254_v26  ;;  %v326_v32 = vadd.f32 %v322_v28, %v270_v9  ;;  %v342_v1 = vadd.f32 %v338_v20, %v286_v5  ;;  %v340_v22 = vmul.f32 %v3658_v33, %v295_v27 }
  0xa6   :  { %v349_v24 = vpop.permute.xlu1 %348  ;;  %v347_v13 = vpop.permute.xlu0 %346  ;;  %v309_v14 = vmul.f32 %v3088_v12, %v297_v21  ;;  %v308_v6 = vmul.f32 %v3088_v12, %v295_v27  ;;  %v329_v15 = vadd.f32 %v325_v49, %v273_v43  ;;  %v345_v16 = vadd.f32 %v341_v50, %v289_v41 }
  0xa7   :  { %v363_v25 = vmul.f32 %v3695_v23, %v349_v24  ;;  %v379_v47 = vmul.f32 %v3700_v45, %v349_v24  ;;  %v395_v61 = vmul.f32 %v3705_v42, %v349_v24  ;;  %v362_v7 = vmul.f32 %v3695_v23, %v347_v13 }
  0xa8   :  { %v378_v8 = vmul.f32 %v3700_v45, %v347_v13  ;;  %v394_v38 = vmul.f32 %v3705_v42, %v347_v13  ;;  %v328_v26 = vadd.f32 %v324_v0, %v272_v58  ;;  %v344_v62 = vadd.f32 %v340_v22, %v288_v44  ;;  %v5242_v22 = vld [vmem:[#allocation22_spill] sm:$0xff] }
  0xa9   :  { %v383_v60 = vadd.f32 %v379_v47, %v327_v52  ;;  %v399_v63 = vadd.f32 %v395_v61, %v343_v46  ;;  %v367_v5 = vadd.f32 %v363_v25, %v311_v29  ;;  %v366_v55 = vadd.f32 %v362_v7, %v310_v54  ;;  %v5243_v47 = vld [vmem:[#allocation23_spill] sm:$0xff] }
  0xaa   :  { %v382_v9 = vadd.f32 %v378_v8, %v326_v32  ;;  %v398_v17 = vadd.f32 %v394_v38, %v342_v1  ;;  %v353_v30 = vpop.permute.xlu1 %352  ;;  %v351_v18 = vpop.permute.xlu0 %350  ;;  %v312_v54 = vadd.f32 %v308_v6, %v256_v53  ;;  %v417_v24 = vmul.f32 %v5242_v22, %v3463_v10 }
  0xab   :  { %v381_v12 = vmul.f32 %v3700_v45, %v353_v30  ;;  %v397_v40 = vmul.f32 %v3705_v42, %v353_v30  ;;  %v380_v28 = vmul.f32 %v3700_v45, %v351_v18  ;;  %v396_v20 = vmul.f32 %v3705_v42, %v351_v18 }
  0xac   :  { %v435_v43 = vadd.f32 %v3593_v51, %v383_v60  ;;  %v434_v21 = vadd.f32 %v3598_v56, %v382_v9  ;;  %v365_v27 = vmul.f32 %v3695_v23, %v353_v30  ;;  %v364_v58 = vmul.f32 %v3695_v23, %v351_v18  ;;  %v3735_v56 = vld [vmem:[%s5185_s1 + $0x10] ss:$0 sm:$0xff] }
  0xad   :  { %v385_v41 = vadd.f32 %v381_v12, %v329_v15  ;;  %v401_v52 = vadd.f32 %v397_v40, %v345_v16  ;;  %v384_v29 = vadd.f32 %v380_v28, %v328_v26  ;;  %v400_v44 = vadd.f32 %v396_v20, %v344_v62  ;;  %v3793_v20 = vld [vmem:[%s5185_s1 + $0x19] ss:$0 sm:$0xff] }
  0xae   :  { %v3725_v46 = vpop.permute.xlu1 %456  ;;  %v3727_v49 = vpop.permute.xlu0 %454  ;;  %v451_v50 = vadd.f32 %v3601_v57, %v399_v63  ;;  %v450_v0 = vadd.f32 %v3604_v59, %v398_v17  ;;  %v313_v51 = vadd.f32 %v309_v14, %v3667_v19  ;;  %v416_v57 = vmul.f32 %v5242_v22, %v3468_v11 }
  0xaf   :  { %v437_v32 = vadd.f32 %v3671_v39, %v385_v41  ;;  %v436_v1 = vadd.f32 %v3675_v34, %v384_v29  ;;  %v368_v59 = vadd.f32 %v364_v58, %v312_v54  ;;  %v453_v19 = vadd.f32 %v3683_v31, %v401_v52  ;;  %v5244_v34 = vld [vmem:[#allocation24_spill] sm:$0xff]  ;;  %v3762_v31 = vld [vmem:[%s5185_s1 + $0x11] ss:$0 sm:$0xff] }
  0xb0   :  { %v369_v13 = vadd.f32 %v365_v27, %v313_v51  ;;  %v452_v53 = vadd.f32 %v3687_v48, %v400_v44  ;;  %v3750_v39 = vadd.f32 %v5243_v47, %v367_v5  ;;  %v3753_v61 = vadd.f32 %v5244_v34, %v366_v55 }
  0xb1   :  { %v487_v10 = vmul.f32 %v3735_v56, %v3725_v46  ;;  %v486_v11 = vmul.f32 %v3735_v56, %v3727_v49  ;;  %v3766_v6 = vadd.f32 %v416_v57, %v368_v59  ;;  %v502_v27 = vmul.f32 %v3793_v20, %v3727_v49  ;;  %v3846_v59 = vld [vmem:[%s5185_s1 + $0x8] ss:$0 sm:$0xff] }
  0xb2   :  { %v3745_v14 = vpop.permute.xlu1 %460  ;;  %v3747_v25 = vpop.permute.xlu0 %458  ;;  %v3764_v48 = vadd.f32 %v417_v24, %v369_v13  ;;  %5247 = vst [vmem:[#allocation24_spill] sm:$0xff] %v3846_v59 }
  0xb3   :  { %v489_v38 = vmul.f32 %v3735_v56, %v3745_v14  ;;  %v491_v16 = vadd.f32 %v487_v10, %v435_v43  ;;  %v488_v26 = vmul.f32 %v3735_v56, %v3747_v25  ;;  %v490_v62 = vadd.f32 %v486_v11, %v434_v21  ;;  %v3800_v43 = vld [vmem:[%s5185_s1 + $0x1a] ss:$0 sm:$0xff] }
  0xb4   :  { %5245 = vst [vmem:[#allocation22_spill] sm:$0xff] %v3800_v43  ;;  %v503_v21 = vmul.f32 %v3793_v20, %v3725_v46  ;;  %v505_v58 = vmul.f32 %v3793_v20, %v3745_v14  ;;  %v504_v44 = vmul.f32 %v3793_v20, %v3747_v25  ;;  %v506_v51 = vadd.f32 %v502_v27, %v450_v0  ;;  %v3839_v0 = vld [vmem:[%s5185_s1 + $0x7] ss:$0 sm:$0xff] }
  0xb5   :  { %v493_v5 = vadd.f32 %v489_v38, %v437_v32  ;;  %v492_v12 = vadd.f32 %v488_v26, %v436_v1  ;;  %5246 = vst [vmem:[#allocation23_spill] sm:$0xff] %v3839_v0  ;;  %v473_v10 = vmul.f32 %v3839_v0, %v3745_v14  ;;  %v472_v11 = vmul.f32 %v3839_v0, %v3747_v25 }
  0xb6   :  { %v513_v7 = vpop.permute.xlu1 %512  ;;  %v511_v8 = vpop.permute.xlu0 %510  ;;  %v507_v29 = vadd.f32 %v503_v21, %v451_v50  ;;  %v509_v24 = vadd.f32 %v505_v58, %v453_v19  ;;  %v508_v50 = vadd.f32 %v504_v44, %v452_v53  ;;  %v471_v19 = vmul.f32 %v3839_v0, %v3725_v46 }
  0xb7   :  { %v543_v15 = vmul.f32 %v3762_v31, %v513_v7  ;;  %v542_v60 = vmul.f32 %v3762_v31, %v511_v8  ;;  %v559_v41 = vmul.f32 %v3800_v43, %v513_v7  ;;  %v558_v52 = vmul.f32 %v3800_v43, %v511_v8 }
  0xb8   :  { %v470_v53 = vmul.f32 %v3839_v0, %v3727_v49  ;;  %v527_v47 = vmul.f32 %v3846_v59, %v513_v7  ;;  %v526_v34 = vmul.f32 %v3846_v59, %v511_v8  ;;  %v475_v46 = vadd.f32 %v471_v19, %v3750_v39 }
  0xb9   :  { %v3774_v63 = vadd.f32 %v543_v15, %v491_v16  ;;  %v3776_v30 = vadd.f32 %v542_v60, %v490_v62  ;;  %v3821_v32 = vadd.f32 %v559_v41, %v507_v29  ;;  %v3824_v22 = vadd.f32 %v558_v52, %v506_v51 }
  0xba   :  { %v517_v9 = vpop.permute.xlu1 %516  ;;  %v515_v17 = vpop.permute.xlu0 %514  ;;  %v474_v49 = vadd.f32 %v470_v53, %v3753_v61  ;;  %v3869_v38 = vadd.f32 %v527_v47, %v475_v46  ;;  %v477_v39 = vadd.f32 %v473_v10, %v3764_v48  ;;  %v476_v25 = vadd.f32 %v472_v11, %v3766_v6 }
  0xbb   :  { %v545_v18 = vmul.f32 %v3762_v31, %v517_v9  ;;  %602 = vrot.lane.b32.xlu1 %v3774_v63, %s3359_s22  ;;  %v544_v55 = vmul.f32 %v3762_v31, %v515_v17  ;;  %600 = vrot.lane.b32.xlu0 %v3776_v30, %s3359_s22  ;;  %v561_v54 = vmul.f32 %v3800_v43, %v517_v9  ;;  %v5205_v16 = vlaneseq }
  0xbc   :  { %v560_v1 = vmul.f32 %v3800_v43, %v515_v17  ;;  %v529_v7 = vmul.f32 %v3846_v59, %v517_v9  ;;  %v528_v8 = vmul.f32 %v3846_v59, %v515_v17  ;;  %v3872_v14 = vadd.f32 %v526_v34, %v474_v49 }
  0xbd   :  { %v3784_v40 = vadd.f32 %v545_v18, %v493_v5  ;;  %v3786_v28 = vadd.f32 %v544_v55, %v492_v12  ;;  %v3830_v57 = vadd.f32 %v561_v54, %v509_v24  ;;  %v3897_v62 = vand.u32 127, %v5205_v16 }
  0xbe   :  { %v3832_v13 = vadd.f32 %v560_v1, %v508_v50  ;;  %v3880_v15 = vadd.f32 %v529_v7, %v477_v39  ;;  %v3882_v61 = vadd.f32 %v528_v8, %v476_v25  ;;  %v5204_v17 = vmov 0.0  }
  0xbf   :  { %606 = vrot.lane.b32.xlu1 %v3784_v40, %s3359_s22  ;;  %604 = vrot.lane.b32.xlu0 %v3786_v28, %s3359_s22  ;;  %5248 = vst [vmem:[#allocation26_spill] sm:$0xff] %v3897_v62  ;;  %78 = vst [vmem:[#allocation4 + $0x20] sm:$0x3] %v5204_v17  ;;  %v3903_v55 = vstv %s3117_s8  ;;  %vm86_vm0 = vcmp.lt.s32.totalorder %v3897_v62, 32  ;;  %v3926_v49 = vstv %s3118_s2 }
  0xc0   :  { %83 = vst [vmem:[#allocation5 + $0x20] sm:$0x3] %v5204_v17  ;;  %5249 = vst [vmem:[#allocation27_spill] sm:$0xff] %v3903_v55 }
  0xc1   :  { %5250 = vst [vmem:[#allocation28_spill] sm:$0xff] %v3926_v49 }
  0xc3   :  { %614 = vrot.lane.b32.xlu1 %v3774_v63, %s3351_s10  ;;  %612 = vrot.lane.b32.xlu0 %v3776_v30, %s3351_s10 }
  0xc7   :  { %618 = vrot.lane.b32.xlu1 %v3784_v40, %s3351_s10  ;;  %616 = vrot.lane.b32.xlu0 %v3786_v28, %s3351_s10 }
  0xcb   :  { %648 = vrot.lane.b32.xlu1 %v3821_v32, %s3359_s22  ;;  %646 = vrot.lane.b32.xlu0 %v3824_v22, %s3359_s22 }
  0xcf   :  { %652 = vrot.lane.b32.xlu1 %v3830_v57, %s3359_s22  ;;  %650 = vrot.lane.b32.xlu0 %v3832_v13, %s3359_s22 }
  0xd3   :  { %660 = vrot.lane.b32.xlu1 %v3821_v32, %s3351_s10  ;;  %658 = vrot.lane.b32.xlu0 %v3824_v22, %s3351_s10 }
  0xd7   :  { %664 = vrot.lane.b32.xlu1 %v3830_v57, %s3351_s10  ;;  %662 = vrot.lane.b32.xlu0 %v3832_v13, %s3351_s10 }
  0xdb   :  { %568 = vrot.lane.b32.xlu1 %v3869_v38, %s3359_s22  ;;  %566 = vrot.lane.b32.xlu0 %v3872_v14, %s3359_s22 }
  0xdf   :  { %572 = vrot.lane.b32.xlu1 %v3880_v15, %s3359_s22  ;;  %570 = vrot.lane.b32.xlu0 %v3882_v61, %s3359_s22 }
  0xe3   :  { %580 = vrot.lane.b32.xlu1 %v3869_v38, %s3351_s10  ;;  %578 = vrot.lane.b32.xlu0 %v3872_v14, %s3351_s10 }
  0xe7   :  { %584 = vrot.lane.b32.xlu1 %v3880_v15, %s3351_s10  ;;  %582 = vrot.lane.b32.xlu0 %v3882_v61, %s3351_s10 }
 0x12d   :  { %v603_v48 = vpop.permute.xlu1 %602  ;;  %v601_v6 = vpop.permute.xlu0 %600 }
 0x12e   :  { %v609_v9 = vadd.f32 %v603_v48, %v3774_v63  ;;  %v608_v18 = vadd.f32 %v601_v6, %v3776_v30 }
 0x131   :  { %v607_v26 = vpop.permute.xlu1 %606  ;;  %v605_v60 = vpop.permute.xlu0 %604 }
 0x132   :  { %v611_v41 = vadd.f32 %v607_v26, %v3784_v40  ;;  %v610_v63 = vadd.f32 %v605_v60, %v3786_v28 }
 0x135   :  { %v615_v5 = vpop.permute.xlu1 %614  ;;  %v613_v21 = vpop.permute.xlu0 %612 }
 0x136   :  { %v621_v12 = vadd.f32 %v615_v5, %v609_v9  ;;  %v620_v27 = vadd.f32 %v613_v21, %v608_v18 }
 0x138   :  { %v627_v52 = vadd.f32 %v3903_v55, %v621_v12  ;;  %v626_v29 = vadd.f32 %v3903_v55, %v620_v27 }
 0x139   :  { %v619_v58 = vpop.permute.xlu1 %618  ;;  %v617_v51 = vpop.permute.xlu0 %616 }
 0x13a   :  { %v623_v44 = vadd.f32 %v619_v58, %v611_v41  ;;  %v631_v30 = vsel %vm86_vm0, %v627_v52, 0.0  ;;  %v622_v54 = vadd.f32 %v617_v51, %v610_v63  ;;  %v630_v1 = vsel %vm86_vm0, %v626_v29, 0.0 }
 0x13b   :  { %636 = vrot.lane.b32.xlu1 %v631_v30, %s3361_s9  ;;  %634 = vrot.lane.b32.xlu0 %v630_v1, %s3361_s9 }
 0x13c   :  { %v629_v40 = vadd.f32 %v3903_v55, %v623_v44  ;;  %v628_v24 = vadd.f32 %v3903_v55, %v622_v54 }
 0x13d   :  { %v649_v28 = vpop.permute.xlu1 %648  ;;  %v647_v50 = vpop.permute.xlu0 %646 }
 0x13e   :  { %v633_v19 = vsel %vm86_vm0, %v629_v40, 0.0  ;;  %v632_v53 = vsel %vm86_vm0, %v628_v24, 0.0  ;;  %v655_v10 = vadd.f32 %v649_v28, %v3821_v32  ;;  %v654_v46 = vadd.f32 %v647_v50, %v3824_v22 }
 0x13f   :  { %640 = vrot.lane.b32.xlu1 %v633_v19, %s3361_s9  ;;  %638 = vrot.lane.b32.xlu0 %v632_v53, %s3361_s9  ;;  %v3948_v28 = vstv %s590_s11 }
 0x140   :  { %5251 = vst [vmem:[#allocation29_spill] sm:$0xff] %v3948_v28 }
 0x141   :  { %v653_v47 = vpop.permute.xlu1 %652  ;;  %v651_v34 = vpop.permute.xlu0 %650 }
 0x142   :  { %v657_v25 = vadd.f32 %v653_v47, %v3830_v57  ;;  %v656_v6 = vadd.f32 %v651_v34, %v3832_v13 }
 0x145   :  { %v661_v11 = vpop.permute.xlu1 %660  ;;  %v659_v8 = vpop.permute.xlu0 %658 }
 0x146   :  { %v667_v7 = vadd.f32 %v661_v11, %v655_v10  ;;  %v666_v39 = vadd.f32 %v659_v8, %v654_v46 }
 0x148   :  { %v673_v48 = vadd.f32 %v3926_v49, %v667_v7  ;;  %v672_v60 = vadd.f32 %v3926_v49, %v666_v39 }
 0x149   :  { %v665_v26 = vpop.permute.xlu1 %664  ;;  %v663_v18 = vpop.permute.xlu0 %662 }
 0x14a   :  { %v669_v9 = vadd.f32 %v665_v26, %v657_v25  ;;  %v677_v32 = vsel %vm86_vm0, %v673_v48, 0.0  ;;  %v668_v22 = vadd.f32 %v663_v18, %v656_v6  ;;  %v676_v5 = vsel %vm86_vm0, %v672_v60, 0.0 }
 0x14b   :  { %682 = vrot.lane.b32.xlu1 %v677_v32, %s3351_s10  ;;  %680 = vrot.lane.b32.xlu0 %v676_v5, %s3351_s10 }
 0x14c   :  { %v675_v57 = vadd.f32 %v3926_v49, %v669_v9  ;;  %v674_v13 = vadd.f32 %v3926_v49, %v668_v22 }
 0x14d   :  { %v569_v27 = vpop.permute.xlu1 %568  ;;  %v567_v41 = vpop.permute.xlu0 %566 }
 0x14e   :  { %v679_v12 = vsel %vm86_vm0, %v675_v57, 0.0  ;;  %v678_v21 = vsel %vm86_vm0, %v674_v13, 0.0  ;;  %v575_v30 = vadd.f32 %v569_v27, %v3869_v38  ;;  %v574_v54 = vadd.f32 %v567_v41, %v3872_v14 }
 0x14f   :  { %686 = vrot.lane.b32.xlu1 %v679_v12, %s3351_s10  ;;  %684 = vrot.lane.b32.xlu0 %v678_v21, %s3351_s10 }
 0x151   :  { %v573_v52 = vpop.permute.xlu1 %572  ;;  %v571_v63 = vpop.permute.xlu0 %570 }
 0x152   :  { %v577_v19 = vadd.f32 %v573_v52, %v3880_v15  ;;  %v576_v53 = vadd.f32 %v571_v63, %v3882_v61 }
 0x155   :  { %v581_v58 = vpop.permute.xlu1 %580  ;;  %v579_v29 = vpop.permute.xlu0 %578 }
 0x156   :  { %v587_v1 = vadd.f32 %v581_v58, %v575_v30  ;;  %v586_v24 = vadd.f32 %v579_v29, %v574_v54 }
 0x158   :  { %v593_v47 = vadd.f32 %v3948_v28, %v587_v1  ;;  %v592_v10 = vadd.f32 %v3948_v28, %v586_v24 }
 0x159   :  { %v585_v44 = vpop.permute.xlu1 %584  ;;  %v583_v51 = vpop.permute.xlu0 %582 }
 0x15a   :  { %v589_v34 = vadd.f32 %v585_v44, %v577_v19  ;;  %v588_v46 = vadd.f32 %v583_v51, %v576_v53  ;;  %v597_v7 = vsel %vm86_vm0, %v593_v47, 0.0  ;;  %v596_v15 = vsel %vm86_vm0, %v592_v10, 0.0 }
 0x15c   :  { %v595_v14 = vadd.f32 %v3948_v28, %v589_v34  ;;  %v594_v8 = vadd.f32 %v3948_v28, %v588_v46 }
 0x15e   :  { %v599_v26 = vsel %vm86_vm0, %v595_v14, 0.0  ;;  %v598_v18 = vsel %vm86_vm0, %v594_v8, 0.0 }
 0x1ad   :  { %v637_v40 = vpop.permute.xlu1 %636  ;;  %v635_v50 = vpop.permute.xlu0 %634 }
 0x1ae   :  { %v643_v39 = vadd.f32 %v637_v40, %v597_v7  ;;  %v642_v61 = vadd.f32 %v635_v50, %v596_v15 }
 0x1b1   :  { %v641_v11 = vpop.permute.xlu1 %640  ;;  %v639_v38 = vpop.permute.xlu0 %638 }
 0x1b2   :  { %v645_v9 = vadd.f32 %v641_v11, %v599_v26  ;;  %v644_v32 = vadd.f32 %v639_v38, %v598_v18  ;;  %v5254_v11 = vld [vmem:[#allocation18_spill] sm:$0xff] }
 0x1bd   :  { %v683_v25 = vpop.permute.xlu1 %682  ;;  %v681_v6 = vpop.permute.xlu0 %680 }
 0x1be   :  { %v3960_v48 = vadd.f32 %v683_v25, %v643_v39  ;;  %v3964_v60 = vadd.f32 %v681_v6, %v642_v61  ;;  %v5255_v6 = vld [vmem:[#allocation17_spill] sm:$0xff] }
 0x1c0   :  { %693 = vst [vmem:[#allocation4 + $0x8] sm:$0xff] %v3960_v48  ;;  %735 = vrot.lane.b32.xlu1 %v3960_v48, %s3357_s24  ;;  %692 = vst [vmem:[#allocation4] sm:$0xff] %v3964_v60  ;;  %733 = vrot.lane.b32.xlu0 %v3964_v60, %s3357_s24  ;;  %v719_v38 = vmul.f32 %v5254_v11, %v3960_v48  ;;  %v718_v7 = vmul.f32 %v5254_v11, %v3964_v60 }
 0x1c1   :  { %v687_v22 = vpop.permute.xlu1 %686  ;;  %v685_v57 = vpop.permute.xlu0 %684  ;;  %v4084_v26 = vmul.f32 %v5255_v6, %v3960_v48 }
 0x1c2   :  { %v3974_v5 = vadd.f32 %v687_v22, %v645_v9  ;;  %v3976_v13 = vadd.f32 %v685_v57, %v644_v32  ;;  %v5257_v9 = vld [vmem:[#allocation19_spill] sm:$0xff]  ;;  %v4092_v57 = vmul.f32 %v5255_v6, %v3964_v60 }
 0x1c3   :  { %5256 = vst [vmem:[#allocation18_spill] sm:$0xff] %v4084_v26  ;;  %v730_v18 = vmul.f32 %v5257_v9, %v3960_v48  ;;  %v729_v16 = vmul.f32 %v5257_v9, %v3964_v60 }
 0x1c4   :  { %695 = vst [vmem:[#allocation4 + $0x18] sm:$0xff] %v3974_v5  ;;  %739 = vrot.lane.b32.xlu1 %v3974_v5, %s3357_s24  ;;  %694 = vst [vmem:[#allocation4 + $0x10] sm:$0xff] %v3976_v13  ;;  %737 = vrot.lane.b32.xlu0 %v3976_v13, %s3357_s24  ;;  %v4108_v28 = vmul.f32 %v5255_v6, %v3974_v5 }
 0x1c5   :  { %5258 = vst [vmem:[#allocation17_spill] sm:$0xff] %v4092_v57 }
 0x1c6   :  { %5259 = vst [vmem:[#allocation19_spill] sm:$0xff] %v4108_v28 }
 0x1c7   :  { %v3996_v21 = vld [vmem:[#allocation4 + $0x1] sm:$0xff] }
 0x1c8   :  { %788 = vrot.lane.b32.xlu1 %v3960_v48, %s3358_s5  ;;  %786 = vrot.lane.b32.xlu0 %v3964_v60, %s3358_s5  ;;  %5253 = vst [vmem:[#allocation31_spill] sm:$0xff] %v3996_v21  ;;  %v4020_v63 = vld [vmem:[#allocation4 + $0x2] sm:$0xff]  ;;  %v720_v48 = vmul.f32 %v5254_v11, %v3976_v13 }
 0x1cb   :  { %v3992_v12 = vld [vmem:[#allocation4 + $0x9] sm:$0xff]  ;;  %v4000_v27 = vld [vmem:[#allocation4 + $0x19] sm:$0xff]  ;;  %v4004_v41 = vld [vmem:[#allocation4 + $0x11] sm:$0xff] }
 0x1cc   :  { %792 = vrot.lane.b32.xlu1 %v3974_v5, %s3358_s5  ;;  %790 = vrot.lane.b32.xlu0 %v3976_v13, %s3358_s5  ;;  %5252 = vst [vmem:[#allocation30_spill] sm:$0xff] %v3992_v12  ;;  %v4016_v52 = vld [vmem:[#allocation4 + $0xa] sm:$0xff]  ;;  %v4024_v58 = vld [vmem:[#allocation4 + $0x1a] sm:$0xff]  ;;  %v4028_v29 = vld [vmem:[#allocation4 + $0x12] sm:$0xff] }
 0x1d0   :  { %890 = vrot.lane.b32.xlu1 %v3992_v12, %s3357_s24  ;;  %888 = vrot.lane.b32.xlu0 %v3996_v21, %s3357_s24 }
 0x1d4   :  { %894 = vrot.lane.b32.xlu1 %v4000_v27, %s3357_s24  ;;  %892 = vrot.lane.b32.xlu0 %v4004_v41, %s3357_s24 }
 0x1d8   :  { %943 = vrot.lane.b32.xlu1 %v3992_v12, %s3358_s5  ;;  %941 = vrot.lane.b32.xlu0 %v3996_v21, %s3358_s5 }
 0x1dc   :  { %947 = vrot.lane.b32.xlu1 %v4000_v27, %s3358_s5  ;;  %945 = vrot.lane.b32.xlu0 %v4004_v41, %s3358_s5 }
 0x1e0   :  { %1045 = vrot.lane.b32.xlu1 %v4016_v52, %s3357_s24  ;;  %1043 = vrot.lane.b32.xlu0 %v4020_v63, %s3357_s24 }
 0x1e4   :  { %1049 = vrot.lane.b32.xlu1 %v4024_v58, %s3357_s24  ;;  %1047 = vrot.lane.b32.xlu0 %v4028_v29, %s3357_s24 }
 0x1e8   :  { %1098 = vrot.lane.b32.xlu1 %v4016_v52, %s3358_s5  ;;  %1096 = vrot.lane.b32.xlu0 %v4020_v63, %s3358_s5 }
 0x1ec   :  { %1102 = vrot.lane.b32.xlu1 %v4024_v58, %s3358_s5  ;;  %1100 = vrot.lane.b32.xlu0 %v4028_v29, %s3358_s5 }
 0x232   :  { %v4040_v44 = vpop.permute.xlu1 %735  ;;  %v4042_v51 = vpop.permute.xlu0 %733 }
 0x233   :  { %v764_v34 = vmul.f32 %v3547_v36, %v4040_v44  ;;  %v763_v46 = vmul.f32 %v3547_v36, %v4042_v51 }
 0x235   :  { %v768_v15 = vadd.f32 %v764_v34, %v719_v38  ;;  %v767_v32 = vadd.f32 %v763_v46, %v718_v7  ;;  %v721_v34 = vmul.f32 %v5254_v11, %v3974_v5  ;;  %v4118_v11 = vmul.f32 %v5257_v9, %v3974_v5 }
 0x236   :  { %v4044_v30 = vpop.permute.xlu1 %739  ;;  %v4046_v54 = vpop.permute.xlu0 %737  ;;  %v4132_v5 = vmul.f32 %v5257_v9, %v3976_v13 }
 0x237   :  { %v766_v61 = vmul.f32 %v3547_v36, %v4044_v30  ;;  %v765_v22 = vmul.f32 %v3547_v36, %v4046_v54  ;;  %v781_v26 = vmul.f32 %v3552_v37, %v4044_v30 }
 0x23a   :  { %v4048_v1 = vpop.permute.xlu1 %788  ;;  %v4050_v40 = vpop.permute.xlu0 %786 }
 0x23b   :  { %v817_v14 = vmul.f32 %v3621_v3, %v4048_v1  ;;  %v816_v8 = vmul.f32 %v3621_v3, %v4050_v40 }
 0x23d   :  { %v821_v38 = vadd.f32 %v817_v14, %v768_v15  ;;  %v820_v46 = vadd.f32 %v816_v8, %v767_v32  ;;  %v770_v14 = vadd.f32 %v766_v61, %v721_v34  ;;  %v5260_v15 = vld [vmem:[#allocation20_spill] sm:$0xff]  ;;  %v4126_v61 = vmul.f32 %v5255_v6, %v3976_v13  ;;  %v5262_v6 = vld [vmem:[#allocation21_spill] sm:$0xff] }
 0x23e   :  { %v4052_v24 = vpop.permute.xlu1 %792  ;;  %v4054_v50 = vpop.permute.xlu0 %790  ;;  %v866_v49 = vmul.f32 %v5260_v15, %v3992_v12  ;;  %v865_v8 = vmul.f32 %v5260_v15, %v3996_v21 }
 0x23f   :  { %v819_v17 = vmul.f32 %v3621_v3, %v4052_v24  ;;  %v818_v36 = vmul.f32 %v3621_v3, %v4054_v50  ;;  %v769_v3 = vadd.f32 %v765_v22, %v720_v48  ;;  %5261 = vst [vmem:[#allocation20_spill] sm:$0xff] %v4126_v61  ;;  %v4140_v61 = vmul.f32 %v5262_v6, %v3996_v21 }
 0x240   :  { %v870_v55 = vadd.f32 %v866_v49, %v821_v38  ;;  %v869_v48 = vadd.f32 %v865_v8, %v820_v46  ;;  %v867_v38 = vmul.f32 %v5260_v15, %v4004_v41  ;;  %v778_v8 = vmul.f32 %v3552_v37, %v4042_v51 }
 0x241   :  { %v823_v34 = vadd.f32 %v819_v17, %v770_v14  ;;  %v822_v22 = vadd.f32 %v818_v36, %v769_v3  ;;  %v868_v17 = vmul.f32 %v5260_v15, %v4000_v27  ;;  %v779_v36 = vmul.f32 %v3552_v37, %v4040_v44 }
 0x242   :  { %v4056_v19 = vpop.permute.xlu1 %890  ;;  %v4058_v53 = vpop.permute.xlu0 %888  ;;  %v881_v21 = vmul.f32 %v5262_v6, %v3992_v12  ;;  %v831_v12 = vmul.f32 %v3626_v4, %v4050_v40 }
 0x243   :  { %v919_v60 = vmul.f32 %v3652_v2, %v4056_v19  ;;  %v918_v32 = vmul.f32 %v3652_v2, %v4058_v53  ;;  %v872_v14 = vadd.f32 %v868_v17, %v823_v34  ;;  %v1021_v34 = vmul.f32 %v3542_v35, %v4016_v52 }
 0x244   :  { %v783_v6 = vadd.f32 %v779_v36, %v730_v18 }
 0x245   :  { %v923_v28 = vadd.f32 %v919_v60, %v870_v55  ;;  %v922_v9 = vadd.f32 %v918_v32, %v869_v48  ;;  %v1020_v55 = vmul.f32 %v3542_v35, %v4020_v63  ;;  %v871_v32 = vadd.f32 %v867_v38, %v822_v22 }
 0x246   :  { %v4060_v47 = vpop.permute.xlu1 %894  ;;  %v4064_v10 = vpop.permute.xlu0 %892  ;;  %v1022_v22 = vmul.f32 %v3542_v35, %v4028_v29 }
 0x247   :  { %v921_v49 = vmul.f32 %v3652_v2, %v4060_v47  ;;  %v920_v46 = vmul.f32 %v3652_v2, %v4064_v10 }
 0x249   :  { %v925_v57 = vadd.f32 %v921_v49, %v872_v14  ;;  %v924_v17 = vadd.f32 %v920_v46, %v871_v32  ;;  %v832_v49 = vmul.f32 %v3626_v4, %v4048_v1  ;;  %v782_v14 = vadd.f32 %v778_v8, %v729_v16 }
 0x24a   :  { %v4076_v39 = vpop.permute.xlu1 %943  ;;  %v4080_v25 = vpop.permute.xlu0 %941  ;;  %v780_v16 = vmul.f32 %v3552_v37, %v4046_v54 }
 0x24b   :  { %v972_v59 = vmul.f32 %v3700_v45, %v4076_v39  ;;  %v971_v0 = vmul.f32 %v3700_v45, %v4080_v25  ;;  %v836_v8 = vadd.f32 %v832_v49, %v783_v6 }
 0x24d   :  { %v976_v60 = vadd.f32 %v972_v59, %v923_v28  ;;  %v975_v48 = vadd.f32 %v971_v0, %v922_v9  ;;  %v885_v49 = vadd.f32 %v881_v21, %v836_v8 }
 0x24e   :  { %v4104_v7 = vpop.permute.xlu1 %947  ;;  %v4114_v62 = vpop.permute.xlu0 %945 }
 0x24f   :  { %v974_v3 = vmul.f32 %v3700_v45, %v4104_v7  ;;  %v973_v15 = vmul.f32 %v3700_v45, %v4114_v62  ;;  %v1023_v45 = vmul.f32 %v3542_v35, %v4024_v58  ;;  %v1025_v38 = vadd.f32 %v1021_v34, %v976_v60 }
 0x250   :  { %v1024_v43 = vadd.f32 %v1020_v55, %v975_v48  ;;  %v834_v48 = vmul.f32 %v3626_v4, %v4052_v24 }
 0x251   :  { %v978_v9 = vadd.f32 %v974_v3, %v925_v57  ;;  %v977_v46 = vadd.f32 %v973_v15, %v924_v17  ;;  %v835_v17 = vadd.f32 %v831_v12, %v782_v14 }
 0x252   :  { %v4136_v23 = vpop.permute.xlu1 %1045  ;;  %v4146_v13 = vpop.permute.xlu0 %1043 }
 0x253   :  { %v1074_v59 = vmul.f32 %v3735_v56, %v4136_v23  ;;  %v1073_v0 = vmul.f32 %v3735_v56, %v4146_v13  ;;  %v1027_v34 = vadd.f32 %v1023_v45, %v978_v9  ;;  %v933_v45 = vmul.f32 %v3658_v33, %v4058_v53 }
 0x254   :  { %v987_v9 = vmul.f32 %v3705_v42, %v4076_v39 }
 0x255   :  { %v1078_v57 = vadd.f32 %v1074_v59, %v1025_v38  ;;  %v1077_v3 = vadd.f32 %v1073_v0, %v1024_v43  ;;  %v833_v59 = vmul.f32 %v3626_v4, %v4054_v50  ;;  %v934_v43 = vmul.f32 %v3658_v33, %v4056_v19 }
 0x256   :  { %v4162_v2 = vpop.permute.xlu1 %1049  ;;  %v4168_v28 = vpop.permute.xlu0 %1047  ;;  %v784_v4 = vadd.f32 %v780_v16, %v4132_v5  ;;  %v884_v5 = vadd.f32 %v4140_v61, %v835_v17  ;;  %v3301_v61 = vld [vmem:[%s5185_s1 + $0x18] ss:$0 sm:$0xff] }
 0x257   :  { %5263 = vst [vmem:[#allocation21_spill] sm:$0xff] %v4168_v28  ;;  %v1076_v35 = vmul.f32 %v3735_v56, %v4162_v2  ;;  %v1075_v60 = vmul.f32 %v3735_v56, %v4168_v28  ;;  %v1026_v56 = vadd.f32 %v1022_v22, %v977_v46  ;;  %v785_v28 = vadd.f32 %v781_v26, %v4118_v11 }
 0x258   :  { %v837_v46 = vadd.f32 %v833_v59, %v784_v4  ;;  %v1035_v16 = vmul.f32 %v3301_v61, %v4020_v63  ;;  %v1036_v8 = vmul.f32 %v3301_v61, %v4016_v52 }
 0x259   :  { %v1080_v12 = vadd.f32 %v1076_v35, %v1027_v34  ;;  %v1079_v11 = vadd.f32 %v1075_v60, %v1026_v56  ;;  %v838_v22 = vadd.f32 %v834_v48, %v785_v28  ;;  %v986_v35 = vmul.f32 %v3705_v42, %v4080_v25  ;;  %v3302_v48 = vld [vmem:[%s5185_s1 + $0x1] ss:$0 sm:$0xff] }
 0x25a   :  { %v4182_v32 = vpop.permute.xlu1 %1098  ;;  %v4190_v36 = vpop.permute.xlu0 %1096  ;;  %v936_v28 = vmul.f32 %v3658_v33, %v4060_v47  ;;  %v937_v60 = vadd.f32 %v933_v45, %v884_v5  ;;  %v749_v34 = vmul.f32 %v3302_v48, %v4040_v44  ;;  %v989_v56 = vmul.f32 %v3705_v42, %v4104_v7 }
 0x25b   :  { %v1127_v18 = vmul.f32 %v3762_v31, %v4182_v32  ;;  %v1126_v55 = vmul.f32 %v3762_v31, %v4190_v36  ;;  %v1089_v45 = vmul.f32 %v3793_v20, %v4136_v23  ;;  %v1038_v44 = vmul.f32 %v3301_v61, %v4024_v58 }
 0x25d   :  { %v4200_v15 = vadd.f32 %v1127_v18, %v1078_v57  ;;  %v4206_v37 = vadd.f32 %v1126_v55, %v1077_v3  ;;  %v3300_v57 = vld [vmem:[%s5185_s1 + $0x15] ss:$0 sm:$0xff]  ;;  %v935_v3 = vmul.f32 %v3658_v33, %v4064_v10  ;;  %v990_v33 = vadd.f32 %v986_v35, %v937_v60  ;;  %v5265_v35 = vld [vmem:[#allocation22_spill] sm:$0xff] }
 0x25e   :  { %v4204_v38 = vpop.permute.xlu1 %1102  ;;  %v4213_v6 = vpop.permute.xlu0 %1100  ;;  %v883_v21 = vmul.f32 %v3300_v57, %v4000_v27  ;;  %v882_v55 = vmul.f32 %v3300_v57, %v4004_v41  ;;  %v751_v60 = vmul.f32 %v3302_v48, %v4044_v30 }
 0x25f   :  { %v1129_v0 = vmul.f32 %v3762_v31, %v4204_v38  ;;  %1185 = vrot.lane.b32.xlu1 %v4200_v15, %s3359_s22  ;;  %v1128_v26 = vmul.f32 %v3762_v31, %v4213_v6  ;;  %1183 = vrot.lane.b32.xlu0 %v4206_v37, %s3359_s22  ;;  %v938_v31 = vadd.f32 %v934_v43, %v885_v49 }
 0x260   :  { %v887_v17 = vadd.f32 %v883_v21, %v838_v22  ;;  %v748_v43 = vmul.f32 %v3302_v48, %v4042_v51  ;;  %v3303_v51 = vld [vmem:[%s5185_s1 + $0x2] ss:$0 sm:$0xff]  ;;  %v1088_v49 = vmul.f32 %v3793_v20, %v4146_v13  ;;  %v5266_v21 = vld [vmem:[#allocation17_spill] sm:$0xff] }
 0x261   :  { %v4226_v14 = vadd.f32 %v1129_v0, %v1080_v12  ;;  %v4231_v18 = vadd.f32 %v1128_v26, %v1079_v11  ;;  %v991_v59 = vadd.f32 %v987_v9, %v938_v31  ;;  %v886_v0 = vadd.f32 %v882_v55, %v837_v46  ;;  %v5264_v9 = vld [vmem:[#allocation18_spill] sm:$0xff] }
 0x262   :  { %v988_v12 = vmul.f32 %v3705_v42, %v4114_v62  ;;  %v940_v4 = vadd.f32 %v936_v28, %v887_v17  ;;  %v1037_v26 = vmul.f32 %v3301_v61, %v4028_v29  ;;  %v802_v11 = vmul.f32 %v3303_v51, %v4048_v1 }
 0x263   :  { %1189 = vrot.lane.b32.xlu1 %v4226_v14, %s3359_s22  ;;  %1187 = vrot.lane.b32.xlu0 %v4231_v18, %s3359_s22  ;;  %v801_v22 = vmul.f32 %v3303_v51, %v4050_v40  ;;  %v939_v42 = vadd.f32 %v935_v3, %v886_v0  ;;  %v753_v46 = vadd.f32 %v749_v34, %v5264_v9 }
 0x264   :  { %v993_v5 = vadd.f32 %v989_v56, %v940_v4  ;;  %v1142_v31 = vmul.f32 %v5265_v35, %v4182_v32  ;;  %v1040_v57 = vadd.f32 %v1036_v8, %v991_v59  ;;  %v752_v28 = vadd.f32 %v748_v43, %v5266_v21  ;;  %v5267_v59 = vld [vmem:[#allocation21_spill] sm:$0xff]  ;;  %v5268_v4 = vld [vmem:[#allocation19_spill] sm:$0xff] }
 0x265   :  { %v992_v61 = vadd.f32 %v988_v12, %v939_v42  ;;  %v1141_v1 = vmul.f32 %v5265_v35, %v4190_v36  ;;  %v1039_v40 = vadd.f32 %v1035_v16, %v990_v33  ;;  %v750_v55 = vmul.f32 %v3302_v48, %v4046_v54  ;;  %v5270_v42 = vld [vmem:[#allocation20_spill] sm:$0xff] }
 0x266   :  { %v1091_v3 = vmul.f32 %v3793_v20, %v4162_v2  ;;  %v1093_v34 = vadd.f32 %v1089_v45, %v1040_v57  ;;  %v806_v17 = vadd.f32 %v802_v11, %v753_v46  ;;  %v805_v8 = vadd.f32 %v801_v22, %v752_v28  ;;  %v5269_v11 = vld [vmem:[#allocation30_spill] sm:$0xff]  ;;  %v5272_v57 = vld [vmem:[#allocation25_spill] sm:$0xff] }
 0x267   :  { %1197 = vrot.lane.b32.xlu1 %v4200_v15, %s3351_s10  ;;  %1195 = vrot.lane.b32.xlu0 %v4206_v37, %s3351_s10  ;;  %v1090_v56 = vmul.f32 %v3793_v20, %v5267_v59  ;;  %v1092_v16 = vadd.f32 %v1088_v49, %v1039_v40  ;;  %v804_v30 = vmul.f32 %v3303_v51, %v4052_v24  ;;  %v3304_v24 = vld [vmem:[%s5185_s1 + $0x3] ss:$0 sm:$0xff]  ;;  %v5271_v49 = vld [vmem:[#allocation31_spill] sm:$0xff] }
 0x268   :  { %v1144_v54 = vmul.f32 %v5265_v35, %v4204_v38  ;;  %v4294_v48 = vadd.f32 %v1142_v31, %v1093_v34  ;;  %v1042_v43 = vadd.f32 %v1038_v44, %v993_v5  ;;  %v803_v0 = vmul.f32 %v3303_v51, %v4054_v50  ;;  %v3305_v44 = vld [vmem:[%s5185_s1 + $0x4] ss:$0 sm:$0xff] }
 0x269   :  { %v1143_v33 = vmul.f32 %v5265_v35, %v4213_v6  ;;  %v4299_v12 = vadd.f32 %v1141_v1, %v1092_v16  ;;  %v1041_v20 = vadd.f32 %v1037_v26, %v992_v61  ;;  %v755_v45 = vadd.f32 %v751_v60, %v5268_v4 }
 0x26a   :  { %v851_v22 = vmul.f32 %v3304_v24, %v5269_v11  ;;  %v904_v50 = vmul.f32 %v3305_v44, %v4056_v19  ;;  %v1095_v51 = vadd.f32 %v1091_v3, %v1042_v43  ;;  %v754_v26 = vadd.f32 %v750_v55, %v5270_v42 }
 0x26b   :  { %1201 = vrot.lane.b32.xlu1 %v4226_v14, %s3351_s10  ;;  %1199 = vrot.lane.b32.xlu0 %v4231_v18, %s3351_s10  ;;  %v850_v9 = vmul.f32 %v3304_v24, %v5271_v49  ;;  %v903_v46 = vmul.f32 %v3305_v44, %v4058_v53  ;;  %v1094_v5 = vadd.f32 %v1090_v56, %v1041_v20 }
 0x26c   :  { %v808_v35 = vadd.f32 %v804_v30, %v755_v45  ;;  %v855_v31 = vadd.f32 %v851_v22, %v806_v17  ;;  %v957_v21 = vmul.f32 %v5272_v57, %v4076_v39  ;;  %v4319_v19 = vadd.f32 %v1144_v54, %v1095_v51  ;;  %v5273_v30 = vld [vmem:[#allocation23_spill] sm:$0xff] }
 0x26d   :  { %v807_v28 = vadd.f32 %v803_v0, %v754_v26  ;;  %v854_v61 = vadd.f32 %v850_v9, %v805_v8  ;;  %v956_v1 = vmul.f32 %v5272_v57, %v4080_v25  ;;  %v4323_v40 = vadd.f32 %v1143_v33, %v1094_v5 }
 0x26e   :  { %v908_v60 = vadd.f32 %v904_v50, %v855_v31  ;;  %v853_v53 = vmul.f32 %v3304_v24, %v4000_v27  ;;  %v906_v55 = vmul.f32 %v3305_v44, %v4060_v47  ;;  %v852_v39 = vmul.f32 %v3304_v24, %v4004_v41  ;;  %v3306_v41 = vld [vmem:[%s5185_s1 + $0x6] ss:$0 sm:$0xff] }
 0x26f   :  { %1231 = vrot.lane.b32.xlu1 %v4294_v48, %s3359_s22  ;;  %1229 = vrot.lane.b32.xlu0 %v4299_v12, %s3359_s22  ;;  %v907_v3 = vadd.f32 %v903_v46, %v854_v61  ;;  %v905_v34 = vmul.f32 %v3305_v44, %v4064_v10  ;;  %v959_v8 = vmul.f32 %v5272_v57, %v4104_v7  ;;  %v5275_v61 = vld [vmem:[#allocation27_spill] sm:$0xff] }
 0x270   :  { %v857_v17 = vadd.f32 %v853_v53, %v808_v35  ;;  %v961_v25 = vadd.f32 %v957_v21, %v908_v60  ;;  %v856_v56 = vadd.f32 %v852_v39, %v807_v28  ;;  %v958_v47 = vmul.f32 %v5272_v57, %v4114_v62 }
 0x271   :  { %v960_v27 = vadd.f32 %v956_v1, %v907_v3  ;;  %v1059_v54 = vmul.f32 %v5273_v30, %v4136_v23  ;;  %v1006_v10 = vmul.f32 %v3306_v41, %v4016_v52  ;;  %v1058_v7 = vmul.f32 %v5273_v30, %v4146_v13  ;;  %v5274_v23 = vld [vmem:[#allocation24_spill] sm:$0xff] }
 0x272   :  { %v910_v16 = vadd.f32 %v906_v55, %v857_v17  ;;  %v909_v43 = vadd.f32 %v905_v34, %v856_v56  ;;  %v1005_v62 = vmul.f32 %v3306_v41, %v4020_v63  ;;  %v1112_v33 = vmul.f32 %v5274_v23, %v4182_v32 }
 0x273   :  { %1235 = vrot.lane.b32.xlu1 %v4319_v19, %s3359_s22  ;;  %1233 = vrot.lane.b32.xlu0 %v4323_v40, %s3359_s22  ;;  %v1010_v20 = vadd.f32 %v1006_v10, %v961_v25  ;;  %v1111_v45 = vmul.f32 %v5274_v23, %v4190_v36  ;;  %v1008_v52 = vmul.f32 %v3306_v41, %v4024_v58 }
 0x274   :  { %v963_v0 = vadd.f32 %v959_v8, %v910_v16  ;;  %v962_v4 = vadd.f32 %v958_v47, %v909_v43  ;;  %v1009_v24 = vadd.f32 %v1005_v62, %v960_v27  ;;  %v1061_v13 = vmul.f32 %v5273_v30, %v4162_v2 }
 0x275   :  { %v1063_v11 = vadd.f32 %v1059_v54, %v1010_v20  ;;  %v1007_v63 = vmul.f32 %v3306_v41, %v4028_v29  ;;  %v1060_v32 = vmul.f32 %v5273_v30, %v5267_v59  ;;  %v1114_v58 = vmul.f32 %v5274_v23, %v4204_v38 }
 0x276   :  { %v1062_v22 = vadd.f32 %v1058_v7, %v1009_v24  ;;  %v1012_v36 = vadd.f32 %v1008_v52, %v963_v0  ;;  %v1113_v50 = vmul.f32 %v5274_v23, %v4213_v6  ;;  %v5277_v0 = vld [vmem:[#allocation28_spill] sm:$0xff] }
 0x277   :  { %1243 = vrot.lane.b32.xlu1 %v4294_v48, %s3351_s10  ;;  %1241 = vrot.lane.b32.xlu0 %v4299_v12, %s3351_s10  ;;  %v4366_v44 = vadd.f32 %v1112_v33, %v1063_v11  ;;  %v1011_v2 = vadd.f32 %v1007_v63, %v962_v4 }
 0x278   :  { %v4370_v51 = vadd.f32 %v1111_v45, %v1062_v22  ;;  %v1065_v29 = vadd.f32 %v1061_v13, %v1012_v36 }
 0x279   :  { %v1064_v59 = vadd.f32 %v1060_v32, %v1011_v2 }
 0x27a   :  { %v4376_v42 = vadd.f32 %v1114_v58, %v1065_v29 }
 0x27b   :  { %1247 = vrot.lane.b32.xlu1 %v4319_v19, %s3351_s10  ;;  %1245 = vrot.lane.b32.xlu0 %v4323_v40, %s3351_s10  ;;  %v4378_v26 = vadd.f32 %v1113_v50, %v1064_v59 }
 0x27f   :  { %1151 = vrot.lane.b32.xlu1 %v4366_v44, %s3359_s22  ;;  %1149 = vrot.lane.b32.xlu0 %v4370_v51, %s3359_s22 }
 0x283   :  { %1155 = vrot.lane.b32.xlu1 %v4376_v42, %s3359_s22  ;;  %1153 = vrot.lane.b32.xlu0 %v4378_v26, %s3359_s22 }
 0x287   :  { %1163 = vrot.lane.b32.xlu1 %v4366_v44, %s3351_s10  ;;  %1161 = vrot.lane.b32.xlu0 %v4370_v51, %s3351_s10 }
 0x28b   :  { %1167 = vrot.lane.b32.xlu1 %v4376_v42, %s3351_s10  ;;  %1165 = vrot.lane.b32.xlu0 %v4378_v26, %s3351_s10 }
 0x2d1   :  { %v1186_v38 = vpop.permute.xlu1 %1185  ;;  %v1184_v6 = vpop.permute.xlu0 %1183 }
 0x2d2   :  { %v1192_v46 = vadd.f32 %v1186_v38, %v4200_v15  ;;  %v1191_v5 = vadd.f32 %v1184_v6, %v4206_v37 }
 0x2d5   :  { %v1190_v49 = vpop.permute.xlu1 %1189  ;;  %v1188_v9 = vpop.permute.xlu0 %1187 }
 0x2d6   :  { %v1194_v28 = vadd.f32 %v1190_v49, %v4226_v14  ;;  %v1193_v60 = vadd.f32 %v1188_v9, %v4231_v18 }
 0x2d9   :  { %v1198_v35 = vpop.permute.xlu1 %1197  ;;  %v1196_v57 = vpop.permute.xlu0 %1195 }
 0x2da   :  { %v1204_v31 = vadd.f32 %v1198_v35, %v1192_v46  ;;  %v1203_v21 = vadd.f32 %v1196_v57, %v1191_v5 }
 0x2dc   :  { %v1210_v1 = vadd.f32 %v1204_v31, %v5275_v61  ;;  %v1209_v53 = vadd.f32 %v1203_v21, %v5275_v61  ;;  %v5278_v31 = vld [vmem:[#allocation29_spill] sm:$0xff] }
 0x2dd   :  { %v1202_v55 = vpop.permute.xlu1 %1201  ;;  %v1200_v39 = vpop.permute.xlu0 %1199 }
 0x2de   :  { %v1206_v3 = vadd.f32 %v1202_v55, %v1194_v28  ;;  %v1214_v15 = vsel %vm86_vm0, %v1210_v1, 0.0  ;;  %v1205_v17 = vadd.f32 %v1200_v39, %v1193_v60  ;;  %v1213_v37 = vsel %vm86_vm0, %v1209_v53, 0.0 }
 0x2df   :  { %1219 = vrot.lane.b32.xlu1 %v1214_v15, %s3361_s9  ;;  %1217 = vrot.lane.b32.xlu0 %v1213_v37, %s3361_s9 }
 0x2e0   :  { %v1212_v14 = vadd.f32 %v1206_v3, %v5275_v61  ;;  %v1211_v18 = vadd.f32 %v1205_v17, %v5275_v61 }
 0x2e1   :  { %v1232_v25 = vpop.permute.xlu1 %1231  ;;  %v1230_v8 = vpop.permute.xlu0 %1229 }
 0x2e2   :  { %v1216_v56 = vsel %vm86_vm0, %v1212_v14, 0.0  ;;  %v1215_v27 = vsel %vm86_vm0, %v1211_v18, 0.0  ;;  %v1238_v30 = vadd.f32 %v1232_v25, %v4294_v48  ;;  %v1237_v54 = vadd.f32 %v1230_v8, %v4299_v12 }
 0x2e3   :  { %1223 = vrot.lane.b32.xlu1 %v1216_v56, %s3361_s9  ;;  %1221 = vrot.lane.b32.xlu0 %v1215_v27, %s3361_s9 }
 0x2e5   :  { %v1236_v47 = vpop.permute.xlu1 %1235  ;;  %v1234_v16 = vpop.permute.xlu0 %1233 }
 0x2e6   :  { %v1240_v62 = vadd.f32 %v1236_v47, %v4319_v19  ;;  %v1239_v33 = vadd.f32 %v1234_v16, %v4323_v40 }
 0x2e9   :  { %v1244_v41 = vpop.permute.xlu1 %1243  ;;  %v1242_v43 = vpop.permute.xlu0 %1241 }
 0x2ea   :  { %v1250_v10 = vadd.f32 %v1244_v41, %v1238_v30  ;;  %v1249_v7 = vadd.f32 %v1242_v43, %v1237_v54 }
 0x2ec   :  { %v1256_v23 = vadd.f32 %v1250_v10, %v5277_v0  ;;  %v1255_v20 = vadd.f32 %v1249_v7, %v5277_v0 }
 0x2ed   :  { %v1248_v4 = vpop.permute.xlu1 %1247  ;;  %v1246_v24 = vpop.permute.xlu0 %1245 }
 0x2ee   :  { %v1252_v45 = vadd.f32 %v1248_v4, %v1240_v62  ;;  %v1260_v48 = vsel %vm86_vm0, %v1256_v23, 0.0  ;;  %v1251_v52 = vadd.f32 %v1246_v24, %v1239_v33  ;;  %v1259_v12 = vsel %vm86_vm0, %v1255_v20, 0.0 }
 0x2ef   :  { %1265 = vrot.lane.b32.xlu1 %v1260_v48, %s3351_s10  ;;  %1263 = vrot.lane.b32.xlu0 %v1259_v12, %s3351_s10 }
 0x2f0   :  { %v1258_v19 = vadd.f32 %v1252_v45, %v5277_v0  ;;  %v1257_v40 = vadd.f32 %v1251_v52, %v5277_v0 }
 0x2f1   :  { %v1152_v63 = vpop.permute.xlu1 %1151  ;;  %v1150_v32 = vpop.permute.xlu0 %1149 }
 0x2f2   :  { %v1262_v13 = vsel %vm86_vm0, %v1258_v19, 0.0  ;;  %v1261_v11 = vsel %vm86_vm0, %v1257_v40, 0.0  ;;  %v1158_v59 = vadd.f32 %v1152_v63, %v4366_v44  ;;  %v1157_v38 = vadd.f32 %v1150_v32, %v4370_v51 }
 0x2f3   :  { %1269 = vrot.lane.b32.xlu1 %v1262_v13, %s3351_s10  ;;  %1267 = vrot.lane.b32.xlu0 %v1261_v11, %s3351_s10 }
 0x2f5   :  { %v1156_v22 = vpop.permute.xlu1 %1155  ;;  %v1154_v36 = vpop.permute.xlu0 %1153 }
 0x2f6   :  { %v1160_v5 = vadd.f32 %v1156_v22, %v4376_v42  ;;  %v1159_v35 = vadd.f32 %v1154_v36, %v4378_v26 }
 0x2f9   :  { %v1164_v58 = vpop.permute.xlu1 %1163  ;;  %v1162_v2 = vpop.permute.xlu0 %1161 }
 0x2fa   :  { %v1170_v6 = vadd.f32 %v1164_v58, %v1158_v59  ;;  %v1169_v9 = vadd.f32 %v1162_v2, %v1157_v38 }
 0x2fc   :  { %v1176_v57 = vadd.f32 %v1170_v6, %v5278_v31  ;;  %v1175_v28 = vadd.f32 %v1169_v9, %v5278_v31 }
 0x2fd   :  { %v1168_v50 = vpop.permute.xlu1 %1167  ;;  %v1166_v29 = vpop.permute.xlu0 %1165 }
 0x2fe   :  { %v1172_v21 = vadd.f32 %v1168_v50, %v1160_v5  ;;  %v1171_v61 = vadd.f32 %v1166_v29, %v1159_v35  ;;  %v1180_v51 = vsel %vm86_vm0, %v1176_v57, 0.0  ;;  %v1179_v42 = vsel %vm86_vm0, %v1175_v28, 0.0  ;;  %v3176_v5 = vld [vmem:[%s5185_s1 + $0x9] ss:$0 sm:$0xff]  ;;  %v3188_v35 = vld [vmem:[%s5185_s1 + $0xb] ss:$0 sm:$0xff] }
 0x300   :  { %v1178_v44 = vadd.f32 %v1172_v21, %v5278_v31  ;;  %v1177_v53 = vadd.f32 %v1171_v61, %v5278_v31 }
 0x302   :  { %v1182_v17 = vsel %vm86_vm0, %v1178_v44, 0.0  ;;  %v1181_v18 = vsel %vm86_vm0, %v1177_v53, 0.0  ;;  %v3178_v44 = vld [vmem:[%s5185_s1 + $0x12] ss:$0 sm:$0xff] }
 0x351   :  { %v1220_v49 = vpop.permute.xlu1 %1219  ;;  %v1218_v46 = vpop.permute.xlu0 %1217 }
 0x352   :  { %v1226_v55 = vadd.f32 %v1220_v49, %v1180_v51  ;;  %v1225_v26 = vadd.f32 %v1218_v46, %v1179_v42  ;;  %v3182_v49 = vld [vmem:[%s5185_s1 + $0xa] ss:$0 sm:$0xff] }
 0x355   :  { %v1224_v1 = vpop.permute.xlu1 %1223  ;;  %v1222_v60 = vpop.permute.xlu0 %1221 }
 0x356   :  { %v1228_v14 = vadd.f32 %v1224_v1, %v1182_v17  ;;  %v1227_v25 = vadd.f32 %v1222_v60, %v1181_v18  ;;  %v3174_v1 = vld [vmem:[%s5185_s1] ss:$0 sm:$0xff] }
 0x361   :  { %v1266_v3 = vpop.permute.xlu1 %1265  ;;  %v1264_v15 = vpop.permute.xlu0 %1263 }
 0x362   :  { %v1272_v39 = vadd.f32 %v1266_v3, %v1226_v55  ;;  %v1271_v37 = vadd.f32 %v1264_v15, %v1225_v26  ;;  %v3200_v26 = vld [vmem:[%s5185_s1 + $0xd] ss:$0 sm:$0xff]  ;;  %v3194_v3 = vld [vmem:[%s5185_s1 + $0xc] ss:$0 sm:$0xff] }
 0x364   :  { %1276 = vst [vmem:[#allocation5 + $0x8] sm:$0xff] %v1272_v39  ;;  %1275 = vst [vmem:[#allocation5] sm:$0xff] %v1271_v37 }
 0x365   :  { %v1270_v8 = vpop.permute.xlu1 %1269  ;;  %v1268_v27 = vpop.permute.xlu0 %1267 }
 0x366   :  { %v1274_v56 = vadd.f32 %v1270_v8, %v1228_v14  ;;  %v1273_v47 = vadd.f32 %v1268_v27, %v1227_v25 }
 0x368   :  { %1278 = vst [vmem:[#allocation5 + $0x18] sm:$0xff] %v1274_v56  ;;  %1277 = vst [vmem:[#allocation5 + $0x10] sm:$0xff] %v1273_v47 }
 0x36b   :  { %v1283_v16 = vld [vmem:[#allocation5 + $0x1] sm:$0xff] }
 0x36c   :  { %v1287_v30 = vmax.f32 %v1271_v37, %v1283_v16 }
 0x36e   :  { %1291 = vrot.lane.b32.xlu0 %v1287_v30, %s3357_s24 }
 0x36f   :  { %v1284_v54 = vld [vmem:[#allocation5 + $0x9] sm:$0xff]  ;;  %v1285_v41 = vld [vmem:[#allocation5 + $0x11] sm:$0xff]  ;;  %v1286_v7 = vld [vmem:[#allocation5 + $0x19] sm:$0xff] }
 0x370   :  { %v1288_v10 = vmax.f32 %v1272_v39, %v1284_v54  ;;  %v1289_v43 = vmax.f32 %v1273_v47, %v1285_v41  ;;  %v1290_v62 = vmax.f32 %v1274_v56, %v1286_v7  ;;  %v3206_v47 = vld [vmem:[%s5185_s1 + $0xe] ss:$0 sm:$0xff] }
 0x372   :  { %1293 = vrot.lane.b32.xlu1 %v1288_v10, %s3357_s24  ;;  %1295 = vrot.lane.b32.xlu0 %v1289_v43, %s3357_s24 }
 0x376   :  { %1297 = vrot.lane.b32.xlu1 %v1290_v62, %s3357_s24 }
 0x3e0   :  { %v1292_v0 = vpop.permute.xlu0 %1291 }
 0x3e1   :  { %v4452_v23 = vmax.f32 %v1287_v30, %v1292_v0 }
 0x3e3   :  { %1303 = vst [vmem:[#allocation4] sm:$0xff] %v4452_v23  ;;  %1344 = vrot.lane.b32.xlu0 %v4452_v23, %s3357_s24  ;;  %v1329_v57 = vmul.f32 %v3176_v5, %v4452_v23  ;;  %v4583_v39 = vmul.f32 %v3174_v1, %v4452_v23  ;;  %v1340_v25 = vmul.f32 %v3178_v44, %v4452_v23 }
 0x3e4   :  { %v1294_v33 = vpop.permute.xlu1 %1293  ;;  %v1296_v20 = vpop.permute.xlu0 %1295 }
 0x3e5   :  { %v4457_v4 = vmax.f32 %v1288_v10, %v1294_v33  ;;  %v4459_v45 = vmax.f32 %v1289_v43, %v1296_v20  ;;  %v4615_v33 = vld [vmem:[%s5185_s1 + $0x15] ss:$0 sm:$0xff] }
 0x3e7   :  { %1304 = vst [vmem:[#allocation4 + $0x8] sm:$0xff] %v4457_v4  ;;  %1305 = vst [vmem:[#allocation4 + $0x10] sm:$0xff] %v4459_v45  ;;  %1346 = vrot.lane.b32.xlu1 %v4457_v4, %s3357_s24  ;;  %1348 = vrot.lane.b32.xlu0 %v4459_v45, %s3357_s24  ;;  %v1330_v55 = vmul.f32 %v3176_v5, %v4457_v4  ;;  %v1331_v15 = vmul.f32 %v3176_v5, %v4459_v45 }
 0x3e8   :  { %v1298_v24 = vpop.permute.xlu1 %1297  ;;  %v4593_v8 = vmul.f32 %v3174_v1, %v4457_v4  ;;  %v4600_v16 = vmul.f32 %v3178_v44, %v4457_v4  ;;  %v4605_v10 = vmul.f32 %v3174_v1, %v4459_v45  ;;  %v4610_v0 = vmul.f32 %v3178_v44, %v4459_v45 }
 0x3e9   :  { %v4467_v48 = vmax.f32 %v1290_v62, %v1298_v24 }
 0x3ea   :  { %5281 = vst [vmem:[#allocation17_spill] sm:$0xff] %v4593_v8  ;;  %5282 = vst [vmem:[#allocation21_spill] sm:$0xff] %v4605_v10 }
 0x3eb   :  { %1306 = vst [vmem:[#allocation4 + $0x18] sm:$0xff] %v4467_v48  ;;  %1350 = vrot.lane.b32.xlu1 %v4467_v48, %s3357_s24  ;;  %1397 = vrot.lane.b32.xlu0 %v4452_v23, %s3358_s5  ;;  %v1332_v43 = vmul.f32 %v3176_v5, %v4467_v48  ;;  %v4623_v5 = vmul.f32 %v3174_v1, %v4467_v48 }
 0x3ed   :  { %5283 = vst [vmem:[#allocation19_spill] sm:$0xff] %v4623_v5 }
 0x3ee   :  { %v4478_v52 = vld [vmem:[#allocation4 + $0x1] sm:$0xff]  ;;  %v4484_v12 = vld [vmem:[#allocation4 + $0x9] sm:$0xff] }
 0x3ef   :  { %1399 = vrot.lane.b32.xlu1 %v4457_v4, %s3358_s5  ;;  %1401 = vrot.lane.b32.xlu0 %v4459_v45, %s3358_s5  ;;  %5279 = vst [vmem:[#allocation18_spill] sm:$0xff] %v4484_v12  ;;  %v4502_v13 = vld [vmem:[#allocation4 + $0x2] sm:$0xff]  ;;  %v4508_v11 = vld [vmem:[#allocation4 + $0xa] sm:$0xff]  ;;  %v1476_v41 = vmul.f32 %v3194_v3, %v4478_v52  ;;  %v4637_v1 = vmul.f32 %v4615_v33, %v4478_v52 }
 0x3f2   :  { %v4486_v19 = vld [vmem:[#allocation4 + $0x11] sm:$0xff]  ;;  %v4492_v40 = vld [vmem:[#allocation4 + $0x19] sm:$0xff] }
 0x3f3   :  { %1403 = vrot.lane.b32.xlu1 %v4467_v48, %s3358_s5  ;;  %1499 = vrot.lane.b32.xlu0 %v4478_v52, %s3357_s24  ;;  %v4510_v63 = vld [vmem:[#allocation4 + $0x12] sm:$0xff]  ;;  %v4516_v32 = vld [vmem:[#allocation4 + $0x1a] sm:$0xff] }
 0x3f4   :  { %5280 = vst [vmem:[#allocation22_spill] sm:$0xff] %v4516_v32 }
 0x3f7   :  { %1501 = vrot.lane.b32.xlu1 %v4484_v12, %s3357_s24  ;;  %1503 = vrot.lane.b32.xlu0 %v4486_v19, %s3357_s24 }
 0x3fb   :  { %1505 = vrot.lane.b32.xlu1 %v4492_v40, %s3357_s24  ;;  %1552 = vrot.lane.b32.xlu0 %v4478_v52, %s3358_s5 }
 0x3ff   :  { %1554 = vrot.lane.b32.xlu1 %v4484_v12, %s3358_s5  ;;  %1556 = vrot.lane.b32.xlu0 %v4486_v19, %s3358_s5 }
 0x403   :  { %1558 = vrot.lane.b32.xlu1 %v4492_v40, %s3358_s5  ;;  %1654 = vrot.lane.b32.xlu0 %v4502_v13, %s3357_s24 }
 0x407   :  { %1656 = vrot.lane.b32.xlu1 %v4508_v11, %s3357_s24  ;;  %1658 = vrot.lane.b32.xlu0 %v4510_v63, %s3357_s24 }
 0x40b   :  { %1660 = vrot.lane.b32.xlu1 %v4516_v32, %s3357_s24  ;;  %1707 = vrot.lane.b32.xlu0 %v4502_v13, %s3358_s5 }
 0x40f   :  { %1709 = vrot.lane.b32.xlu1 %v4508_v11, %s3358_s5  ;;  %1711 = vrot.lane.b32.xlu0 %v4510_v63, %s3358_s5 }
 0x413   :  { %1713 = vrot.lane.b32.xlu1 %v4516_v32, %s3358_s5 }
 0x455   :  { %v4528_v22 = vpop.permute.xlu0 %1344 }
 0x456   :  { %v1374_v31 = vmul.f32 %v3182_v49, %v4528_v22 }
 0x458   :  { %v1378_v51 = vadd.f32 %v1374_v31, %v1329_v57  ;;  %v1477_v31 = vmul.f32 %v3194_v3, %v4484_v12  ;;  %v3184_v57 = vld [vmem:[%s5185_s1 + $0x13] ss:$0 sm:$0xff] }
 0x459   :  { %v4530_v36 = vpop.permute.xlu1 %1346  ;;  %v4532_v58 = vpop.permute.xlu0 %1348 }
 0x45a   :  { %v1375_v60 = vmul.f32 %v3182_v49, %v4530_v36  ;;  %v1376_v53 = vmul.f32 %v3182_v49, %v4532_v58 }
 0x45c   :  { %v1379_v56 = vadd.f32 %v1375_v60, %v1330_v55  ;;  %v1380_v30 = vadd.f32 %v1376_v53, %v1331_v15  ;;  %v1478_v60 = vmul.f32 %v3194_v3, %v4486_v19 }
 0x45d   :  { %v4534_v2 = vpop.permute.xlu1 %1350  ;;  %v4536_v50 = vpop.permute.xlu0 %1397 }
 0x45e   :  { %v1427_v21 = vmul.f32 %v3188_v35, %v4536_v50  ;;  %v1377_v27 = vmul.f32 %v3182_v49, %v4534_v2 }
 0x460   :  { %v1431_v17 = vadd.f32 %v1427_v21, %v1378_v51  ;;  %v4631_v21 = vmul.f32 %v3178_v44, %v4467_v48  ;;  %v3218_v48 = vld [vmem:[%s5185_s1 + $0x10] ss:$0 sm:$0xff] }
 0x461   :  { %v4538_v29 = vpop.permute.xlu1 %1399  ;;  %v4540_v59 = vpop.permute.xlu0 %1401 }
 0x462   :  { %v1428_v42 = vmul.f32 %v3188_v35, %v4538_v29  ;;  %v1429_v37 = vmul.f32 %v3188_v35, %v4540_v59  ;;  %v1480_v20 = vadd.f32 %v1476_v41, %v1431_v17  ;;  %v3212_v17 = vld [vmem:[%s5185_s1 + $0xf] ss:$0 sm:$0xff]  ;;  %v1389_v41 = vmul.f32 %v3184_v57, %v4528_v22 }
 0x464   :  { %v1432_v7 = vadd.f32 %v1428_v42, %v1379_v56  ;;  %v1433_v23 = vadd.f32 %v1429_v37, %v1380_v30  ;;  %v4648_v56 = vmul.f32 %v4615_v33, %v4484_v12  ;;  %v1393_v10 = vadd.f32 %v1389_v41, %v1340_v25  ;;  %v3202_v25 = vld [vmem:[%s5185_s1 + $0x16] ss:$0 sm:$0xff] }
 0x465   :  { %v4542_v38 = vpop.permute.xlu1 %1403  ;;  %v4544_v6 = vpop.permute.xlu0 %1499 }
 0x466   :  { %v1529_v54 = vmul.f32 %v3200_v26, %v4544_v6  ;;  %v1430_v62 = vmul.f32 %v3188_v35, %v4542_v38  ;;  %v1381_v35 = vadd.f32 %v1377_v27, %v1332_v43  ;;  %v1481_v42 = vadd.f32 %v1477_v31, %v1432_v7  ;;  %v3190_v43 = vld [vmem:[%s5185_s1 + $0x14] ss:$0 sm:$0xff] }
 0x467   :  { %v1482_v44 = vadd.f32 %v1478_v60, %v1433_v23  ;;  %v1479_v7 = vmul.f32 %v3194_v3, %v4492_v40  ;;  %v1632_v31 = vmul.f32 %v3212_v17, %v4508_v11  ;;  %v1390_v60 = vmul.f32 %v3184_v57, %v4530_v36  ;;  %v3224_v3 = vld [vmem:[%s5185_s1 + $0x11] ss:$0 sm:$0xff] }
 0x468   :  { %v1533_v53 = vadd.f32 %v1529_v54, %v1480_v20  ;;  %v1434_v55 = vadd.f32 %v1430_v62, %v1381_v35 }
 0x469   :  { %v4549_v9 = vpop.permute.xlu1 %1501  ;;  %v4551_v46 = vpop.permute.xlu0 %1503 }
 0x46a   :  { %v1530_v45 = vmul.f32 %v3200_v26, %v4549_v9  ;;  %v1531_v51 = vmul.f32 %v3200_v26, %v4551_v46 }
 0x46c   :  { %v1534_v23 = vadd.f32 %v1530_v45, %v1481_v42  ;;  %v1535_v20 = vadd.f32 %v1531_v51, %v1482_v44  ;;  %v1633_v42 = vmul.f32 %v3212_v17, %v4510_v63 }
 0x46d   :  { %v4562_v28 = vpop.permute.xlu1 %1505  ;;  %v4564_v61 = vpop.permute.xlu0 %1552 }
 0x46e   :  { %v1582_v4 = vmul.f32 %v3206_v47, %v4564_v61  ;;  %v1532_v62 = vmul.f32 %v3200_v26, %v4562_v28  ;;  %v1442_v26 = vmul.f32 %v3190_v43, %v4536_v50 }
 0x470   :  { %v1586_v37 = vadd.f32 %v1582_v4, %v1533_v53  ;;  %v1631_v4 = vmul.f32 %v3212_v17, %v4502_v13  ;;  %v1483_v53 = vadd.f32 %v1479_v7, %v1434_v55 }
 0x471   :  { %v4587_v14 = vpop.permute.xlu1 %1554  ;;  %v4589_v18 = vpop.permute.xlu0 %1556 }
 0x472   :  { %v1583_v15 = vmul.f32 %v3206_v47, %v4587_v14  ;;  %v1584_v27 = vmul.f32 %v3206_v47, %v4589_v18  ;;  %v1635_v51 = vadd.f32 %v1631_v4, %v1586_v37  ;;  %v1536_v8 = vadd.f32 %v1532_v62, %v1483_v53 }
 0x473   :  { %v1394_v37 = vadd.f32 %v1390_v60, %v4600_v16  ;;  %v1446_v4 = vadd.f32 %v1442_v26, %v1393_v10  ;;  %v1392_v16 = vmul.f32 %v3184_v57, %v4534_v2  ;;  %v3208_v60 = vld [vmem:[%s5185_s1 + $0x17] ss:$0 sm:$0xff]  ;;  %v1544_v10 = vmul.f32 %v3202_v25, %v4544_v6 }
 0x474   :  { %v1587_v34 = vadd.f32 %v1583_v15, %v1534_v23  ;;  %v1588_v45 = vadd.f32 %v1584_v27, %v1535_v20  ;;  %v1391_v15 = vmul.f32 %v3184_v57, %v4532_v58  ;;  %v1443_v20 = vmul.f32 %v3190_v43, %v4538_v29 }
 0x475   :  { %v4618_v24 = vpop.permute.xlu1 %1558  ;;  %v4620_v49 = vpop.permute.xlu0 %1654 }
 0x476   :  { %v1684_v35 = vmul.f32 %v3218_v48, %v4620_v49  ;;  %v1585_v12 = vmul.f32 %v3206_v47, %v4618_v24  ;;  %v1634_v47 = vmul.f32 %v3212_v17, %v4516_v32  ;;  %v1636_v62 = vadd.f32 %v1632_v31, %v1587_v34 }
 0x477   :  { %v1444_v17 = vmul.f32 %v3190_v43, %v4540_v59  ;;  %v1637_v53 = vadd.f32 %v1633_v42, %v1588_v45  ;;  %v1447_v57 = vadd.f32 %v1443_v20, %v1394_v37  ;;  %v1445_v45 = vmul.f32 %v3190_v43, %v4542_v38  ;;  %v4707_v42 = vld [vmem:[%s5185_s1 + $0x3] ss:$0 sm:$0xff]  ;;  %v3214_v20 = vld [vmem:[%s5185_s1 + $0x18] ss:$0 sm:$0xff] }
 0x478   :  { %v1688_v7 = vadd.f32 %v1684_v35, %v1635_v51  ;;  %v1589_v41 = vadd.f32 %v1585_v12, %v1536_v8  ;;  %v1395_v8 = vadd.f32 %v1391_v15, %v4610_v0  ;;  %v1495_v15 = vadd.f32 %v4637_v1, %v1446_v4  ;;  %v3180_v1 = vld [vmem:[%s5185_s1 + $0x1] ss:$0 sm:$0xff] }
 0x479   :  { %v4651_v30 = vpop.permute.xlu1 %1656  ;;  %v4653_v54 = vpop.permute.xlu0 %1658  ;;  %v1396_v37 = vadd.f32 %v1392_v16, %v4631_v21  ;;  %v1545_v43 = vmul.f32 %v3202_v25, %v4549_v9  ;;  %v1546_v21 = vmul.f32 %v3202_v25, %v4551_v46  ;;  %v3220_v16 = vld [vmem:[%s5185_s1 + $0x19] ss:$0 sm:$0xff] }
 0x47a   :  { %5284 = vst [vmem:[#allocation30_spill] sm:$0xff] %v4653_v54  ;;  %v1685_v55 = vmul.f32 %v3218_v48, %v4651_v30  ;;  %v1686_v23 = vmul.f32 %v3218_v48, %v4653_v54  ;;  %v1448_v0 = vadd.f32 %v1444_v17, %v1395_v8  ;;  %v1548_v4 = vadd.f32 %v1544_v10, %v1495_v15 }
 0x47b   :  { %v1496_v17 = vadd.f32 %v4648_v56, %v1447_v57  ;;  %v1599_v10 = vmul.f32 %v3208_v60, %v4589_v18  ;;  %v1359_v56 = vmul.f32 %v3180_v1, %v4528_v22  ;;  %v1547_v57 = vmul.f32 %v3202_v25, %v4562_v28 }
 0x47c   :  { %v1689_v54 = vadd.f32 %v1685_v55, %v1636_v62  ;;  %v1690_v31 = vadd.f32 %v1686_v23, %v1637_v53  ;;  %v4733_v62 = vmul.f32 %v4707_v42, %v4478_v52  ;;  %v1598_v53 = vmul.f32 %v3208_v60, %v4587_v14  ;;  %v3186_v52 = vld [vmem:[%s5185_s1 + $0x2] ss:$0 sm:$0xff] }
 0x47d   :  { %v4671_v44 = vpop.permute.xlu1 %1660  ;;  %v4673_v5 = vpop.permute.xlu0 %1707  ;;  %v1647_v22 = vmul.f32 %v3214_v20, %v4508_v11 }
 0x47e   :  { %v1737_v27 = vmul.f32 %v3224_v3, %v4673_v5  ;;  %v1687_v12 = vmul.f32 %v3218_v48, %v4671_v44  ;;  %v1638_v48 = vadd.f32 %v1634_v47, %v1589_v41  ;;  %v1493_v41 = vmul.f32 %v4615_v33, %v4486_v19 }
 0x480   :  { %v4686_v32 = vadd.f32 %v1737_v27, %v1688_v7  ;;  %v1597_v7 = vmul.f32 %v3208_v60, %v4564_v61  ;;  %v1691_v47 = vadd.f32 %v1687_v12, %v1638_v48  ;;  %v3226_v48 = vld [vmem:[%s5185_s1 + $0x1a] ss:$0 sm:$0xff] }
 0x481   :  { %v4688_v35 = vpop.permute.xlu1 %1709  ;;  %v4690_v51 = vpop.permute.xlu0 %1711 }
 0x482   :  { %v1738_v34 = vmul.f32 %v3224_v3, %v4688_v35  ;;  %v1739_v26 = vmul.f32 %v3224_v3, %v4690_v51  ;;  %1794 = vrot.lane.b32.xlu0 %v4686_v32, %s3359_s22  ;;  %v1601_v8 = vadd.f32 %v1597_v7, %v1548_v4  ;;  %v1699_v7 = vmul.f32 %v3220_v16, %v4620_v49 }
 0x483   :  { %v1361_v4 = vmul.f32 %v3180_v1, %v4532_v58  ;;  %v3198_v58 = vld [vmem:[%s5185_s1 + $0x4] ss:$0 sm:$0xff] }
 0x484   :  { %v4709_v55 = vadd.f32 %v1738_v34, %v1689_v54  ;;  %v4713_v23 = vadd.f32 %v1739_v26, %v1690_v31  ;;  %v1497_v34 = vadd.f32 %v1493_v41, %v1448_v0  ;;  %v1646_v31 = vmul.f32 %v3214_v20, %v4502_v13 }
 0x485   :  { %v4715_v27 = vpop.permute.xlu1 %1713  ;;  %v1494_v26 = vmul.f32 %v4615_v33, %v4492_v40  ;;  %v1360_v0 = vmul.f32 %v3180_v1, %v4530_v36  ;;  %v1412_v33 = vmul.f32 %v3186_v52, %v4536_v50  ;;  %v1648_v41 = vmul.f32 %v3214_v20, %v4510_v63  ;;  %v5285_v50 = vld [vmem:[#allocation17_spill] sm:$0xff] }
 0x486   :  { %v1740_v54 = vmul.f32 %v3224_v3, %v4715_v27  ;;  %1796 = vrot.lane.b32.xlu1 %v4709_v55, %s3359_s22  ;;  %1798 = vrot.lane.b32.xlu0 %v4713_v23, %s3359_s22  ;;  %v1449_v3 = vadd.f32 %v1445_v45, %v1396_v37  ;;  %v1549_v45 = vadd.f32 %v1545_v43, %v1496_v17 }
 0x487   :  { %v1550_v15 = vadd.f32 %v1546_v21, %v1497_v34  ;;  %v1600_v43 = vmul.f32 %v3208_v60, %v4618_v24  ;;  %v1752_v36 = vmul.f32 %v3226_v48, %v4673_v5  ;;  %v1363_v21 = vadd.f32 %v1359_v56, %v4583_v39 }
 0x488   :  { %v4742_v12 = vadd.f32 %v1740_v54, %v1691_v47  ;;  %v1498_v25 = vadd.f32 %v1494_v26, %v1449_v3  ;;  %v1602_v37 = vadd.f32 %v1598_v53, %v1549_v45  ;;  %v1650_v54 = vadd.f32 %v1646_v31, %v1601_v8  ;;  %v5286_v8 = vld [vmem:[#allocation30_spill] sm:$0xff] }
 0x489   :  { %v1603_v47 = vadd.f32 %v1599_v10, %v1550_v15  ;;  %v1700_v34 = vmul.f32 %v3220_v16, %v4651_v30  ;;  %v1364_v3 = vadd.f32 %v1360_v0, %v5285_v50  ;;  %v1413_v60 = vmul.f32 %v3186_v52, %v4538_v29 }
 0x48a   :  { %1800 = vrot.lane.b32.xlu1 %v4742_v12, %s3359_s22  ;;  %1806 = vrot.lane.b32.xlu0 %v4686_v32, %s3351_s10  ;;  %v1551_v17 = vadd.f32 %v1547_v57, %v1498_v25  ;;  %v1703_v53 = vadd.f32 %v1699_v7, %v1650_v54  ;;  %v1701_v10 = vmul.f32 %v3220_v16, %v5286_v8  ;;  %v3204_v7 = vld [vmem:[%s5185_s1 + $0x5] ss:$0 sm:$0xff] }
 0x48b   :  { %v1416_v31 = vadd.f32 %v1412_v33, %v1363_v21  ;;  %v1651_v56 = vadd.f32 %v1647_v22, %v1602_v37  ;;  %v1753_v26 = vmul.f32 %v3226_v48, %v4688_v35  ;;  %v1414_v57 = vmul.f32 %v3186_v52, %v4540_v59  ;;  %v5287_v25 = vld [vmem:[#allocation22_spill] sm:$0xff]  ;;  %v5288_v59 = vld [vmem:[#allocation21_spill] sm:$0xff] }
 0x48c   :  { %v1604_v39 = vadd.f32 %v1600_v43, %v1551_v17  ;;  %v1652_v45 = vadd.f32 %v1648_v41, %v1603_v47  ;;  %v4782_v0 = vadd.f32 %v1752_v36, %v1703_v53  ;;  %v1754_v29 = vmul.f32 %v3226_v48, %v4690_v51 }
 0x48d   :  { %v1362_v15 = vmul.f32 %v3180_v1, %v4534_v2  ;;  %v1704_v33 = vadd.f32 %v1700_v34, %v1651_v56  ;;  %v1649_v54 = vmul.f32 %v3214_v20, %v5287_v25  ;;  %v1702_v22 = vmul.f32 %v3220_v16, %v4671_v44  ;;  %v5289_v34 = vld [vmem:[#allocation19_spill] sm:$0xff] }
 0x48e   :  { %1808 = vrot.lane.b32.xlu1 %v4709_v55, %s3351_s10  ;;  %1810 = vrot.lane.b32.xlu0 %v4713_v23, %s3351_s10  ;;  %v1365_v37 = vadd.f32 %v1361_v4, %v5288_v59  ;;  %v1417_v43 = vadd.f32 %v1413_v60, %v1364_v3  ;;  %v1514_v47 = vmul.f32 %v3198_v58, %v4544_v6  ;;  %v5290_v3 = vld [vmem:[#allocation18_spill] sm:$0xff] }
 0x48f   :  { %v1705_v41 = vadd.f32 %v1701_v10, %v1652_v45  ;;  %v1415_v2 = vmul.f32 %v3186_v52, %v4542_v38  ;;  %v1653_v1 = vadd.f32 %v1649_v54, %v1604_v39  ;;  %v4798_v36 = vadd.f32 %v1753_v26, %v1704_v33  ;;  %v3210_v10 = vld [vmem:[%s5185_s1 + $0x6] ss:$0 sm:$0xff]  ;;  %v3222_v45 = vld [vmem:[%s5185_s1 + $0x8] ss:$0 sm:$0xff] }
 0x490   :  { %v1755_v20 = vmul.f32 %v3226_v48, %v4715_v27  ;;  %v1418_v16 = vadd.f32 %v1414_v57, %v1365_v37  ;;  %v1465_v21 = vadd.f32 %v4733_v62, %v1416_v31  ;;  %v1567_v17 = vmul.f32 %v3204_v7, %v4564_v61  ;;  %v3216_v31 = vld [vmem:[%s5185_s1 + $0x7] ss:$0 sm:$0xff]  ;;  %s3227_s1 = sld [smem:[#allocation8 + $0x1]] }
 0x491   :  { %v4803_v4 = vadd.f32 %v1754_v29, %v1705_v41  ;;  %v1366_v6 = vadd.f32 %v1362_v15, %v5289_v34  ;;  %v1515_v50 = vmul.f32 %v3198_v58, %v4549_v9  ;;  %v1462_v60 = vmul.f32 %v4707_v42, %v5290_v3 }
 0x492   :  { %1812 = vrot.lane.b32.xlu1 %v4742_v12, %s3351_s10  ;;  %1840 = vrot.lane.b32.xlu0 %v4782_v0, %s3359_s22  ;;  %v1706_v38 = vadd.f32 %v1702_v22, %v1653_v1  ;;  %v1463_v52 = vmul.f32 %v4707_v42, %v4486_v19  ;;  %v1516_v62 = vmul.f32 %v3198_v58, %v4551_v46 }
 0x493   :  { %v1518_v48 = vadd.f32 %v1514_v47, %v1465_v21  ;;  %v1419_v61 = vadd.f32 %v1415_v2, %v1366_v6  ;;  %v1466_v53 = vadd.f32 %v1462_v60, %v1417_v43  ;;  %v1568_v9 = vmul.f32 %v3204_v7, %v4587_v14 }
 0x494   :  { %v4823_v39 = vadd.f32 %v1755_v20, %v1706_v38  ;;  %v1467_v19 = vadd.f32 %v1463_v52, %v1418_v16  ;;  %v1569_v56 = vmul.f32 %v3204_v7, %v4589_v18  ;;  %v1464_v26 = vmul.f32 %v4707_v42, %v4492_v40 }
 0x495   :  { %v1571_v46 = vadd.f32 %v1567_v17, %v1518_v48  ;;  %v1517_v57 = vmul.f32 %v3198_v58, %v4562_v28  ;;  %v1519_v14 = vadd.f32 %v1515_v50, %v1466_v53  ;;  %v1616_v15 = vmul.f32 %v3210_v10, %v4502_v13 }
 0x496   :  { %1842 = vrot.lane.b32.xlu1 %v4798_v36, %s3359_s22  ;;  %1844 = vrot.lane.b32.xlu0 %v4803_v4, %s3359_s22  ;;  %v1520_v29 = vadd.f32 %v1516_v62, %v1467_v19  ;;  %v1669_v33 = vmul.f32 %v3216_v31, %v4620_v49  ;;  %v1468_v18 = vadd.f32 %v1464_v26, %v1419_v61  ;;  %v1819_v6 = vstv %s3227_s1 }
 0x497   :  { %v1572_v40 = vadd.f32 %v1568_v9, %v1519_v14  ;;  %v1570_v28 = vmul.f32 %v3204_v7, %v4618_v24  ;;  %v1620_v58 = vadd.f32 %v1616_v15, %v1571_v46  ;;  %v1722_v54 = vmul.f32 %v3222_v45, %v4673_v5 }
 0x498   :  { %v1573_v42 = vadd.f32 %v1569_v56, %v1520_v29  ;;  %v1521_v22 = vadd.f32 %v1517_v57, %v1468_v18  ;;  %v1617_v59 = vmul.f32 %v3210_v10, %v4508_v11  ;;  %v1670_v37 = vmul.f32 %v3216_v31, %v4651_v30 }
 0x499   :  { %v1673_v13 = vadd.f32 %v1669_v33, %v1620_v58  ;;  %v1618_v49 = vmul.f32 %v3210_v10, %v4510_v63  ;;  %v1671_v43 = vmul.f32 %v3216_v31, %v5286_v8  ;;  %v1723_v5 = vmul.f32 %v3222_v45, %v4688_v35 }
 0x49a   :  { %1846 = vrot.lane.b32.xlu1 %v4823_v39, %s3359_s22  ;;  %1852 = vrot.lane.b32.xlu0 %v4782_v0, %s3351_s10  ;;  %v1574_v24 = vadd.f32 %v1570_v28, %v1521_v22  ;;  %v1621_v7 = vadd.f32 %v1617_v59, %v1572_v40  ;;  %v1724_v11 = vmul.f32 %v3222_v45, %v4690_v51  ;;  %v1865_v33 = vstv %s3228_s17 }
 0x49b   :  { %v1622_v47 = vadd.f32 %v1618_v49, %v1573_v42  ;;  %v4849_v41 = vadd.f32 %v1722_v54, %v1673_v13  ;;  %v1619_v2 = vmul.f32 %v3210_v10, %v5287_v25  ;;  %v1672_v1 = vmul.f32 %v3216_v31, %v4671_v44 }
 0x49c   :  { %v1674_v30 = vadd.f32 %v1670_v37, %v1621_v7  ;;  %v1725_v35 = vmul.f32 %v3222_v45, %v4715_v27  ;;  %v5293_v9 = vmov 0.0  }
 0x49d   :  { %v1675_v63 = vadd.f32 %v1671_v43, %v1622_v47  ;;  %v1623_v8 = vadd.f32 %v1619_v2, %v1574_v24 }
 0x49e   :  { %1854 = vrot.lane.b32.xlu1 %v4798_v36, %s3351_s10  ;;  %1856 = vrot.lane.b32.xlu0 %v4803_v4, %s3351_s10  ;;  %v4858_v20 = vadd.f32 %v1723_v5, %v1674_v30 }
 0x49f   :  { %v4861_v16 = vadd.f32 %v1724_v11, %v1675_v63  ;;  %v1676_v51 = vadd.f32 %v1672_v1, %v1623_v8 }
 0x4a1   :  { %v4867_v44 = vadd.f32 %v1725_v35, %v1676_v51 }
 0x4a2   :  { %1858 = vrot.lane.b32.xlu1 %v4823_v39, %s3351_s10  ;;  %1760 = vrot.lane.b32.xlu0 %v4849_v41, %s3359_s22 }
 0x4a6   :  { %1762 = vrot.lane.b32.xlu1 %v4858_v20, %s3359_s22  ;;  %1764 = vrot.lane.b32.xlu0 %v4861_v16, %s3359_s22 }
 0x4aa   :  { %1766 = vrot.lane.b32.xlu1 %v4867_v44, %s3359_s22  ;;  %1772 = vrot.lane.b32.xlu0 %v4849_v41, %s3351_s10 }
 0x4ae   :  { %1774 = vrot.lane.b32.xlu1 %v4858_v20, %s3351_s10  ;;  %1776 = vrot.lane.b32.xlu0 %v4861_v16, %s3351_s10 }
 0x4b2   :  { %1778 = vrot.lane.b32.xlu1 %v4867_v44, %s3351_s10 }
 0x4f4   :  { %v1795_v27 = vpop.permute.xlu0 %1794 }
 0x4f5   :  { %v1802_v17 = vadd.f32 %v1795_v27, %v4686_v32 }
 0x4f8   :  { %v1797_v25 = vpop.permute.xlu1 %1796  ;;  %v1799_v21 = vpop.permute.xlu0 %1798 }
 0x4f9   :  { %v1803_v60 = vadd.f32 %v1797_v25, %v4709_v55  ;;  %v1804_v38 = vadd.f32 %v1799_v21, %v4713_v23 }
 0x4fc   :  { %v1801_v34 = vpop.permute.xlu1 %1800  ;;  %v1807_v50 = vpop.permute.xlu0 %1806 }
 0x4fd   :  { %v1814_v3 = vadd.f32 %v1807_v50, %v1802_v17  ;;  %v1805_v31 = vadd.f32 %v1801_v34, %v4742_v12  ;;  %v1785_v17 = vstv %s1784_s18 }
 0x4ff   :  { %v1820_v52 = vadd.f32 %v1819_v6, %v1814_v3 }
 0x500   :  { %v1809_v62 = vpop.permute.xlu1 %1808  ;;  %v1811_v61 = vpop.permute.xlu0 %1810 }
 0x501   :  { %v1815_v48 = vadd.f32 %v1809_v62, %v1803_v60  ;;  %v1816_v53 = vadd.f32 %v1811_v61, %v1804_v38  ;;  %v1824_v10 = vsel %vm86_vm0, %v1820_v52, 0.0 }
 0x502   :  { %1828 = vrot.lane.b32.xlu0 %v1824_v10, %s3361_s9 }
 0x503   :  { %v1821_v19 = vadd.f32 %v1819_v6, %v1815_v48  ;;  %v1822_v32 = vadd.f32 %v1819_v6, %v1816_v53 }
 0x504   :  { %v1813_v46 = vpop.permute.xlu1 %1812  ;;  %v1841_v26 = vpop.permute.xlu0 %1840 }
 0x505   :  { %v1817_v56 = vadd.f32 %v1813_v46, %v1805_v31  ;;  %v1825_v55 = vsel %vm86_vm0, %v1821_v19, 0.0  ;;  %v1826_v23 = vsel %vm86_vm0, %v1822_v32, 0.0  ;;  %v1848_v29 = vadd.f32 %v1841_v26, %v4782_v0 }
 0x506   :  { %1830 = vrot.lane.b32.xlu1 %v1825_v55, %s3361_s9  ;;  %1832 = vrot.lane.b32.xlu0 %v1826_v23, %s3361_s9 }
 0x507   :  { %v1823_v57 = vadd.f32 %v1819_v6, %v1817_v56 }
 0x508   :  { %v1843_v12 = vpop.permute.xlu1 %1842  ;;  %v1845_v14 = vpop.permute.xlu0 %1844 }
 0x509   :  { %v1827_v45 = vsel %vm86_vm0, %v1823_v57, 0.0  ;;  %v1849_v28 = vadd.f32 %v1843_v12, %v4798_v36  ;;  %v1850_v42 = vadd.f32 %v1845_v14, %v4803_v4 }
 0x50a   :  { %1834 = vrot.lane.b32.xlu1 %v1827_v45, %s3361_s9 }
 0x50c   :  { %v1847_v15 = vpop.permute.xlu1 %1846  ;;  %v1853_v18 = vpop.permute.xlu0 %1852 }
 0x50d   :  { %v1860_v40 = vadd.f32 %v1853_v18, %v1848_v29  ;;  %v1851_v49 = vadd.f32 %v1847_v15, %v4823_v39 }
 0x50f   :  { %v1866_v58 = vadd.f32 %v1865_v33, %v1860_v40 }
 0x510   :  { %v1855_v54 = vpop.permute.xlu1 %1854  ;;  %v1857_v59 = vpop.permute.xlu0 %1856 }
 0x511   :  { %v1861_v22 = vadd.f32 %v1855_v54, %v1849_v28  ;;  %v1862_v37 = vadd.f32 %v1857_v59, %v1850_v42  ;;  %v1870_v13 = vsel %vm86_vm0, %v1866_v58, 0.0 }
 0x512   :  { %1874 = vrot.lane.b32.xlu0 %v1870_v13, %s3351_s10 }
 0x513   :  { %v1867_v43 = vadd.f32 %v1865_v33, %v1861_v22  ;;  %v1868_v0 = vadd.f32 %v1865_v33, %v1862_v37 }
 0x514   :  { %v1859_v24 = vpop.permute.xlu1 %1858  ;;  %v1761_v47 = vpop.permute.xlu0 %1760 }
 0x515   :  { %v1863_v7 = vadd.f32 %v1859_v24, %v1851_v49  ;;  %v1871_v36 = vsel %vm86_vm0, %v1867_v43, 0.0  ;;  %v1872_v4 = vsel %vm86_vm0, %v1868_v0, 0.0  ;;  %v1768_v35 = vadd.f32 %v1761_v47, %v4849_v41 }
 0x516   :  { %1876 = vrot.lane.b32.xlu1 %v1871_v36, %s3351_s10  ;;  %1878 = vrot.lane.b32.xlu0 %v1872_v4, %s3351_s10  ;;  %v3229_v4 = vld [vmem:[%s5187_s3] ss:$0 sm:$0xff] }
 0x517   :  { %v1869_v5 = vadd.f32 %v1865_v33, %v1863_v7  ;;  %v3231_v7 = vld [vmem:[%s5187_s3 + $0x1] ss:$0 sm:$0xff] }
 0x518   :  { %v1763_v11 = vpop.permute.xlu1 %1762  ;;  %v1765_v30 = vpop.permute.xlu0 %1764 }
 0x519   :  { %v1873_v39 = vsel %vm86_vm0, %v1869_v5, 0.0  ;;  %v1769_v21 = vadd.f32 %v1763_v11, %v4858_v20  ;;  %v1770_v34 = vadd.f32 %v1765_v30, %v4861_v16  ;;  %v3233_v5 = vld [vmem:[%s5187_s3 + $0x2] ss:$0 sm:$0xff] }
 0x51a   :  { %1880 = vrot.lane.b32.xlu1 %v1873_v39, %s3351_s10 }
 0x51c   :  { %v1767_v2 = vpop.permute.xlu1 %1766  ;;  %v1773_v1 = vpop.permute.xlu0 %1772 }
 0x51d   :  { %v1780_v27 = vadd.f32 %v1773_v1, %v1768_v35  ;;  %v1771_v38 = vadd.f32 %v1767_v2, %v4867_v44 }
 0x51f   :  { %v1786_v3 = vadd.f32 %v1785_v17, %v1780_v27 }
 0x520   :  { %v1775_v63 = vpop.permute.xlu1 %1774  ;;  %v1777_v8 = vpop.permute.xlu0 %1776 }
 0x521   :  { %v1781_v6 = vadd.f32 %v1775_v63, %v1769_v21  ;;  %v1782_v60 = vadd.f32 %v1777_v8, %v1770_v34  ;;  %v1790_v41 = vsel %vm86_vm0, %v1786_v3, 0.0  ;;  %v3237_v21 = vld [vmem:[%s5187_s3 + $0x4] ss:$0 sm:$0xff] }
 0x523   :  { %v1787_v62 = vadd.f32 %v1785_v17, %v1781_v6  ;;  %v1788_v61 = vadd.f32 %v1785_v17, %v1782_v60 }
 0x524   :  { %v1779_v51 = vpop.permute.xlu1 %1778 }
 0x525   :  { %v1783_v48 = vadd.f32 %v1779_v51, %v1771_v38  ;;  %v1791_v16 = vsel %vm86_vm0, %v1787_v62, 0.0  ;;  %v1792_v44 = vsel %vm86_vm0, %v1788_v61, 0.0  ;;  %v3239_v38 = vld [vmem:[%s5187_s3 + $0x5] ss:$0 sm:$0xff] }
 0x527   :  { %v1789_v20 = vadd.f32 %v1785_v17, %v1783_v48 }
 0x529   :  { %v1793_v23 = vsel %vm86_vm0, %v1789_v20, 0.0 }
 0x574   :  { %v1829_v25 = vpop.permute.xlu0 %1828 }
 0x575   :  { %v1836_v53 = vadd.f32 %v1829_v25, %v1790_v41  ;;  %v3235_v25 = vld [vmem:[%s5187_s3 + $0x3] ss:$0 sm:$0xff] }
 0x578   :  { %v1831_v50 = vpop.permute.xlu1 %1830  ;;  %v1833_v52 = vpop.permute.xlu0 %1832 }
 0x579   :  { %v1837_v32 = vadd.f32 %v1831_v50, %v1791_v16  ;;  %v1838_v46 = vadd.f32 %v1833_v52, %v1792_v44 }
 0x57c   :  { %v1835_v10 = vpop.permute.xlu1 %1834 }
 0x57d   :  { %v1839_v12 = vadd.f32 %v1835_v10, %v1793_v23 }
 0x584   :  { %v1875_v31 = vpop.permute.xlu0 %1874 }
 0x585   :  { %v4919_v19 = vadd.f32 %v1875_v31, %v1836_v53 }
 0x587   :  { %1886 = vst [vmem:[#allocation5] sm:$0xff] %v4919_v19  ;;  %1905 = vrot.lane.b32.xlu0 %v4919_v19, %s3357_s24  ;;  %v1901_v11 = vmul.f32 %v3229_v4, %v4919_v19 }
 0x588   :  { %v1877_v56 = vpop.permute.xlu1 %1876  ;;  %v1879_v55 = vpop.permute.xlu0 %1878 }
 0x589   :  { %v4926_v26 = vadd.f32 %v1877_v56, %v1837_v32  ;;  %v4930_v57 = vadd.f32 %v1879_v55, %v1838_v46 }
 0x58b   :  { %1887 = vst [vmem:[#allocation5 + $0x8] sm:$0xff] %v4926_v26  ;;  %1907 = vrot.lane.b32.xlu1 %v4926_v26, %s3357_s24  ;;  %1888 = vst [vmem:[#allocation5 + $0x10] sm:$0xff] %v4930_v57  ;;  %1909 = vrot.lane.b32.xlu0 %v4930_v57, %s3357_s24  ;;  %v1902_v51 = vmul.f32 %v3229_v4, %v4926_v26  ;;  %v1903_v17 = vmul.f32 %v3229_v4, %v4930_v57 }
 0x58c   :  { %v1881_v14 = vpop.permute.xlu1 %1880 }
 0x58d   :  { %v4938_v45 = vadd.f32 %v1881_v14, %v1839_v12 }
 0x58f   :  { %1889 = vst [vmem:[#allocation5 + $0x18] sm:$0xff] %v4938_v45  ;;  %1911 = vrot.lane.b32.xlu1 %v4938_v45, %s3357_s24  ;;  %1929 = vrot.lane.b32.xlu0 %v4919_v19, %s3358_s5  ;;  %v1904_v41 = vmul.f32 %v3229_v4, %v4938_v45 }
 0x592   :  { %v1953_v29 = vld [vmem:[#allocation5 + $0x1] sm:$0xff]  ;;  %v4952_v15 = vld [vmem:[#allocation5 + $0x9] sm:$0xff] }
 0x593   :  { %1931 = vrot.lane.b32.xlu1 %v4926_v26, %s3358_s5  ;;  %1933 = vrot.lane.b32.xlu0 %v4930_v57, %s3358_s5  ;;  %v4971_v40 = vld [vmem:[#allocation5 + $0x2] sm:$0xff]  ;;  %v4975_v28 = vld [vmem:[#allocation5 + $0xa] sm:$0xff]  ;;  %v1965_v48 = vmul.f32 %v3235_v25, %v1953_v29  ;;  %v1966_v44 = vmul.f32 %v3235_v25, %v4952_v15 }
 0x596   :  { %v4956_v33 = vld [vmem:[#allocation5 + $0x11] sm:$0xff]  ;;  %v4960_v18 = vld [vmem:[#allocation5 + $0x19] sm:$0xff] }
 0x597   :  { %1935 = vrot.lane.b32.xlu1 %v4938_v45, %s3358_s5  ;;  %1973 = vrot.lane.b32.xlu0 %v1953_v29, %s3357_s24  ;;  %v4979_v42 = vld [vmem:[#allocation5 + $0x12] sm:$0xff]  ;;  %v4983_v58 = vld [vmem:[#allocation5 + $0x1a] sm:$0xff]  ;;  %v1967_v55 = vmul.f32 %v3235_v25, %v4956_v33 }
 0x598   :  { %v3241_v45 = vld [vmem:[%s5187_s3 + $0x6] ss:$0 sm:$0xff] }
 0x59b   :  { %1975 = vrot.lane.b32.xlu1 %v4952_v15, %s3357_s24  ;;  %1977 = vrot.lane.b32.xlu0 %v4956_v33, %s3357_s24 }
 0x59f   :  { %1979 = vrot.lane.b32.xlu1 %v4960_v18, %s3357_s24  ;;  %1997 = vrot.lane.b32.xlu0 %v1953_v29, %s3358_s5  ;;  %v3243_v29 = vld [vmem:[%s5187_s3 + $0x7] ss:$0 sm:$0xff] }
 0x5a3   :  { %1999 = vrot.lane.b32.xlu1 %v4952_v15, %s3358_s5  ;;  %2001 = vrot.lane.b32.xlu0 %v4956_v33, %s3358_s5 }
 0x5a7   :  { %2003 = vrot.lane.b32.xlu1 %v4960_v18, %s3358_s5  ;;  %2041 = vrot.lane.b32.xlu0 %v4971_v40, %s3357_s24 }
 0x5ab   :  { %2043 = vrot.lane.b32.xlu1 %v4975_v28, %s3357_s24  ;;  %2045 = vrot.lane.b32.xlu0 %v4979_v42, %s3357_s24 }
 0x5af   :  { %2047 = vrot.lane.b32.xlu1 %v4983_v58, %s3357_s24  ;;  %2065 = vrot.lane.b32.xlu0 %v4971_v40, %s3358_s5 }
 0x5b3   :  { %2067 = vrot.lane.b32.xlu1 %v4975_v28, %s3358_s5  ;;  %2069 = vrot.lane.b32.xlu0 %v4979_v42, %s3358_s5 }
 0x5b7   :  { %2071 = vrot.lane.b32.xlu1 %v4983_v58, %s3358_s5 }
 0x5f9   :  { %v1906_v54 = vpop.permute.xlu0 %1905 }
 0x5fa   :  { %v1921_v47 = vmul.f32 %v3231_v7, %v1906_v54 }
 0x5fc   :  { %v1925_v8 = vadd.f32 %v1921_v47, %v1901_v11 }
 0x5fd   :  { %v1908_v22 = vpop.permute.xlu1 %1907  ;;  %v1910_v59 = vpop.permute.xlu0 %1909 }
 0x5fe   :  { %v1922_v1 = vmul.f32 %v3231_v7, %v1908_v22  ;;  %v1923_v35 = vmul.f32 %v3231_v7, %v1910_v59 }
 0x600   :  { %v1926_v3 = vadd.f32 %v1922_v1, %v1902_v51  ;;  %v1927_v62 = vadd.f32 %v1923_v35, %v1903_v17  ;;  %v2034_v1 = vmul.f32 %v3241_v45, %v4975_v28 }
 0x601   :  { %v1912_v37 = vpop.permute.xlu1 %1911  ;;  %v1930_v13 = vpop.permute.xlu0 %1929 }
 0x602   :  { %v1945_v30 = vmul.f32 %v3233_v5, %v1930_v13  ;;  %v1924_v60 = vmul.f32 %v3231_v7, %v1912_v37  ;;  %v1968_v13 = vmul.f32 %v3235_v25, %v4960_v18 }
 0x604   :  { %v1949_v34 = vadd.f32 %v1945_v30, %v1925_v8  ;;  %v1928_v32 = vadd.f32 %v1924_v60, %v1904_v41  ;;  %v2035_v8 = vmul.f32 %v3241_v45, %v4979_v42 }
 0x605   :  { %v1932_v49 = vpop.permute.xlu1 %1931  ;;  %v1934_v43 = vpop.permute.xlu0 %1933 }
 0x606   :  { %v1946_v27 = vmul.f32 %v3233_v5, %v1932_v49  ;;  %v1947_v6 = vmul.f32 %v3233_v5, %v1934_v43  ;;  %v1969_v20 = vadd.f32 %v1965_v48, %v1949_v34 }
 0x608   :  { %v1950_v53 = vadd.f32 %v1946_v27, %v1926_v3  ;;  %v1951_v31 = vadd.f32 %v1947_v6, %v1927_v62  ;;  %v2036_v6 = vmul.f32 %v3241_v45, %v4983_v58 }
 0x609   :  { %v1936_v0 = vpop.permute.xlu1 %1935  ;;  %v1974_v24 = vpop.permute.xlu0 %1973 }
 0x60a   :  { %v1989_v61 = vmul.f32 %v3237_v21, %v1974_v24  ;;  %v1948_v10 = vmul.f32 %v3233_v5, %v1936_v0  ;;  %v1970_v12 = vadd.f32 %v1966_v44, %v1950_v53  ;;  %v1971_v54 = vadd.f32 %v1967_v55, %v1951_v31  ;;  %v3245_v5 = vld [vmem:[%s5187_s3 + $0x8] ss:$0 sm:$0xff] }
 0x60b   :  { %v2033_v0 = vmul.f32 %v3241_v45, %v4971_v40 }
 0x60c   :  { %v1993_v26 = vadd.f32 %v1989_v61, %v1969_v20  ;;  %v1952_v57 = vadd.f32 %v1948_v10, %v1928_v32 }
 0x60d   :  { %v1976_v36 = vpop.permute.xlu1 %1975  ;;  %v1978_v39 = vpop.permute.xlu0 %1977 }
 0x60e   :  { %v1990_v46 = vmul.f32 %v3237_v21, %v1976_v36  ;;  %v1991_v23 = vmul.f32 %v3237_v21, %v1978_v39  ;;  %v1972_v7 = vadd.f32 %v1968_v13, %v1952_v57 }
 0x610   :  { %v1994_v37 = vadd.f32 %v1990_v46, %v1970_v12  ;;  %v1995_v43 = vadd.f32 %v1991_v23, %v1971_v54 }
 0x611   :  { %v1980_v2 = vpop.permute.xlu1 %1979  ;;  %v1998_v63 = vpop.permute.xlu0 %1997 }
 0x612   :  { %v2013_v16 = vmul.f32 %v3239_v38, %v1998_v63  ;;  %v1992_v33 = vmul.f32 %v3237_v21, %v1980_v2 }
 0x614   :  { %v2017_v22 = vadd.f32 %v2013_v16, %v1993_v26  ;;  %v1996_v30 = vadd.f32 %v1992_v33, %v1972_v7 }
 0x615   :  { %v2000_v50 = vpop.permute.xlu1 %1999  ;;  %v2002_v52 = vpop.permute.xlu0 %2001 }
 0x616   :  { %v2014_v14 = vmul.f32 %v3239_v38, %v2000_v50  ;;  %v2015_v15 = vmul.f32 %v3239_v38, %v2002_v52  ;;  %v2037_v47 = vadd.f32 %v2033_v0, %v2017_v22 }
 0x618   :  { %v2018_v36 = vadd.f32 %v2014_v14, %v1994_v37  ;;  %v2019_v39 = vadd.f32 %v2015_v15, %v1995_v43 }
 0x619   :  { %v2004_v19 = vpop.permute.xlu1 %2003  ;;  %v2042_v56 = vpop.permute.xlu0 %2041 }
 0x61a   :  { %v2057_v24 = vmul.f32 %v3243_v29, %v2042_v56  ;;  %v2016_v4 = vmul.f32 %v3239_v38, %v2004_v19  ;;  %v2038_v27 = vadd.f32 %v2034_v1, %v2018_v36  ;;  %v2039_v25 = vadd.f32 %v2035_v8, %v2019_v39 }
 0x61b   :  { %v2114_v19 = vstv %s5188_s4  ;;  %v5292_v39 = vlaneseq }
 0x61c   :  { %v2061_v63 = vadd.f32 %v2057_v24, %v2037_v47  ;;  %v2020_v51 = vadd.f32 %v2016_v4, %v1996_v30  ;;  %v3362_v47 = vmov 1966171168  }
 0x61d   :  { %v2044_v59 = vpop.permute.xlu1 %2043  ;;  %v2046_v49 = vpop.permute.xlu0 %2045  ;;  %vm2157_vm1 = vcmp.lt.s32.totalorder %v5292_v39, 768  ;;  %v5059_v8 = vshrl.u32 %v5292_v39, 7  ;;  %vm5065_vm2 = vcmp.lt.s32.totalorder %v5292_v39, 32  ;;  %vm2183_vm3 = vcmp.ge.s32.totalorder %v5292_v39, 32 }
 0x61e   :  { %v2058_v18 = vmul.f32 %v3243_v29, %v2044_v59  ;;  %v2059_v40 = vmul.f32 %v3243_v29, %v2046_v49  ;;  %v2040_v52 = vadd.f32 %v2036_v6, %v2020_v51  ;;  %2159 = vst.msk [vmem:[#allocation6] sm:$0x3f] %vm2157_vm1, %v5293_v9  ;;  %vm2184_vm4 = vcmp.lt.s32.totalorder %v5292_v39, 64 }
 0x61f   :  { %vm5115_vm5 = vmand %vm2183_vm3, %vm2184_vm4  ;;  %vm2206_vm6 = vcmp.ge.s32.totalorder %v5292_v39, 64  ;;  %vm2207_vm7 = vcmp.lt.s32.totalorder %v5292_v39, 96  ;;  %vm2229_vm9 = vcmp.ge.s32.totalorder %v5292_v39, 96  ;;  %vm2230_vm10 = vcmp.lt.s32.totalorder %v5292_v39, 128 }
 0x620   :  { %v2062_v34 = vadd.f32 %v2058_v18, %v2038_v27  ;;  %v2063_v38 = vadd.f32 %v2059_v40, %v2039_v25  ;;  %vm2208_vm8 = vmand %vm2206_vm6, %vm2207_vm7 }
 0x621   :  { %v2048_v11 = vpop.permute.xlu1 %2047  ;;  %v2066_v2 = vpop.permute.xlu0 %2065  ;;  %vm2231_vm11 = vmand %vm2229_vm9, %vm2230_vm10 }
 0x622   :  { %v2081_v35 = vmul.f32 %v3245_v5, %v2066_v2  ;;  %v2060_v50 = vmul.f32 %v3243_v29, %v2048_v11  ;;  %v2174_v11 = vunpack.c.l.s4 %v3362_v47 }
 0x624   :  { %v2085_v21 = vadd.f32 %v2081_v35, %v2061_v63  ;;  %v2064_v61 = vadd.f32 %v2060_v50, %v2040_v52  ;;  %v2175_v63 = vunpack.c.0.s8 %v2174_v11 }
 0x625   :  { %v2068_v17 = vpop.permute.xlu1 %2067  ;;  %v2070_v60 = vpop.permute.xlu0 %2069 }
 0x626   :  { %v2082_v3 = vmul.f32 %v3245_v5, %v2068_v17  ;;  %v2083_v28 = vmul.f32 %v3245_v5, %v2070_v60  ;;  %2089 = vrot.lane.b32.xlu0 %v2085_v21, %s3359_s22  ;;  %v5062_v25 = vsub.s32 %v2175_v63, %v5059_v8 }
 0x628   :  { %v2086_v62 = vadd.f32 %v2082_v3, %v2062_v34  ;;  %v2087_v42 = vadd.f32 %v2083_v28, %v2063_v38 }
 0x629   :  { %v2072_v48 = vpop.permute.xlu1 %2071 }
 0x62a   :  { %v2084_v41 = vmul.f32 %v3245_v5, %v2072_v48  ;;  %2091 = vrot.lane.b32.xlu1 %v2086_v62, %s3359_s22  ;;  %2093 = vrot.lane.b32.xlu0 %v2087_v42, %s3359_s22 }
 0x62c   :  { %v2088_v53 = vadd.f32 %v2084_v41, %v2064_v61 }
 0x62e   :  { %2095 = vrot.lane.b32.xlu1 %v2088_v53, %s3359_s22  ;;  %2101 = vrot.lane.b32.xlu0 %v2085_v21, %s3351_s10 }
 0x632   :  { %2103 = vrot.lane.b32.xlu1 %v2086_v62, %s3351_s10  ;;  %2105 = vrot.lane.b32.xlu0 %v2087_v42, %s3351_s10 }
 0x636   :  { %2107 = vrot.lane.b32.xlu1 %v2088_v53, %s3351_s10 }
 0x698   :  { %v2090_v58 = vpop.permute.xlu0 %2089 }
 0x699   :  { %v2097_v20 = vadd.f32 %v2090_v58, %v2085_v21 }
 0x69c   :  { %v2092_v10 = vpop.permute.xlu1 %2091  ;;  %v2094_v31 = vpop.permute.xlu0 %2093 }
 0x69d   :  { %v2098_v46 = vadd.f32 %v2092_v10, %v2086_v62  ;;  %v2099_v56 = vadd.f32 %v2094_v31, %v2087_v42 }
 0x6a0   :  { %v2096_v16 = vpop.permute.xlu1 %2095  ;;  %v2102_v32 = vpop.permute.xlu0 %2101 }
 0x6a1   :  { %v2109_v44 = vadd.f32 %v2102_v32, %v2097_v20  ;;  %v2100_v45 = vadd.f32 %v2096_v16, %v2088_v53 }
 0x6a3   :  { %v2115_v26 = vadd.f32 %v2114_v19, %v2109_v44 }
 0x6a4   :  { %v2104_v55 = vpop.permute.xlu1 %2103  ;;  %v2106_v57 = vpop.permute.xlu0 %2105 }
 0x6a5   :  { %v2110_v23 = vadd.f32 %v2104_v55, %v2098_v46  ;;  %v2119_v12 = vsel %vm86_vm0, %v2115_v26, 0.0  ;;  %v2111_v14 = vadd.f32 %v2106_v57, %v2099_v56 }
 0x6a6   :  { %2123 = vst [vmem:[#allocation4] sm:$0xff] %v2119_v12 }
 0x6a7   :  { %v2116_v29 = vadd.f32 %v2114_v19, %v2110_v23  ;;  %v2117_v54 = vadd.f32 %v2114_v19, %v2111_v14 }
 0x6a8   :  { %v2108_v22 = vpop.permute.xlu1 %2107 }
 0x6a9   :  { %v2120_v15 = vsel %vm86_vm0, %v2116_v29, 0.0  ;;  %v2112_v59 = vadd.f32 %v2108_v22, %v2100_v45  ;;  %v2121_v37 = vsel %vm86_vm0, %v2117_v54, 0.0 }
 0x6aa   :  { %2124 = vst [vmem:[#allocation4 + $0x8] sm:$0xff] %v2120_v15  ;;  %2125 = vst [vmem:[#allocation4 + $0x10] sm:$0xff] %v2121_v37 }
 0x6ab   :  { %v2118_v13 = vadd.f32 %v2114_v19, %v2112_v59 }
 0x6ad   :  { %v2122_v33 = vsel %vm86_vm0, %v2118_v13, 0.0 }
 0x6ae   :  { %2126 = vst [vmem:[#allocation4 + $0x18] sm:$0xff] %v2122_v33 }
 0x6b1   :  { %v2131_v49 = vld [vmem:[#allocation4 + $0x1] sm:$0xff]  ;;  %v2132_v0 = vld [vmem:[#allocation4 + $0x9] sm:$0xff] }
 0x6b2   :  { %v2135_v43 = vmax.f32 %v2119_v12, %v2131_v49  ;;  %v2136_v24 = vmax.f32 %v2120_v15, %v2132_v0 }
 0x6b4   :  { %2139 = vrot.lane.b32.xlu0 %v2135_v43, %s3357_s24  ;;  %2141 = vrot.lane.b32.xlu1 %v2136_v24, %s3357_s24 }
 0x6b5   :  { %v2134_v7 = vld [vmem:[#allocation4 + $0x19] sm:$0xff]  ;;  %v2133_v36 = vld [vmem:[#allocation4 + $0x11] sm:$0xff] }
 0x6b6   :  { %v2138_v4 = vmax.f32 %v2122_v33, %v2134_v7  ;;  %v2137_v5 = vmax.f32 %v2121_v37, %v2133_v36 }
 0x6b8   :  { %2143 = vrot.lane.b32.xlu0 %v2137_v5, %s3357_s24  ;;  %2145 = vrot.lane.b32.xlu1 %v2138_v4, %s3357_s24 }
 0x726   :  { %v2140_v30 = vpop.permute.xlu0 %2139  ;;  %v2142_v1 = vpop.permute.xlu1 %2141 }
 0x727   :  { %v2147_v18 = vmax.f32 %v2135_v43, %v2140_v30  ;;  %v2148_v2 = vmax.f32 %v2136_v24, %v2142_v1 }
 0x729   :  { %2151 = vst [vmem:[#allocation5] sm:$0xff] %v2147_v18  ;;  %2152 = vst [vmem:[#allocation5 + $0x8] sm:$0xff] %v2148_v2 }
 0x72a   :  { %v2144_v40 = vpop.permute.xlu0 %2143  ;;  %v2146_v35 = vpop.permute.xlu1 %2145 }
 0x72b   :  { %v2149_v51 = vmax.f32 %v2137_v5, %v2144_v40  ;;  %v2150_v27 = vmax.f32 %v2138_v4, %v2146_v35 }
 0x72d   :  { %2153 = vst [vmem:[#allocation5 + $0x10] sm:$0xff] %v2149_v51  ;;  %2154 = vst [vmem:[#allocation5 + $0x18] sm:$0xff] %v2150_v27 }
 0x730   :  { %v3249_v17 = vld.sshfl [vmem:[#allocation5 + $0x5] sm:$0x1 pattern:$0x75316420]  ;;  %v2233_v34 = vld [vmem:[#allocation5 + $0x4] sm:$0x1] }
 0x731   :  { %v2250_v6 = vrot.slane %v3249_v17, %v5062_v25  ;;  %v3246_v50 = vld.sshfl [vmem:[#allocation5 + $0x1] sm:$0x1 pattern:$0x75316420]  ;;  %2234 = vst.msk [vmem:[#allocation6 + $0x1] sm:$0x1] %vm5065_vm2, %v2233_v34 }
 0x732   :  { %v2160_v3 = vld [vmem:[#allocation5] sm:$0x1]  ;;  %v2179_v60 = vrot.slane %v3246_v50, %v5062_v25  ;;  %v3255_v38 = vld.sshfl [vmem:[#allocation5 + $0xd] sm:$0x1 pattern:$0x75316420] }
 0x733   :  { %2163 = vst.msk [vmem:[#allocation6] sm:$0x1] %vm5065_vm2, %v2160_v3  ;;  %v2357_v28 = vld [vmem:[#allocation5 + $0xc] sm:$0x1]  ;;  %2251 = vrot.lane.b32.xlu1 %v2250_v6, %s3361_s9  ;;  %v2295_v62 = vld [vmem:[#allocation5 + $0x8] sm:$0x1]  ;;  %v2374_v48 = vrot.slane %v3255_v38, %v5062_v25 }
 0x734   :  { %v3252_v52 = vld.sshfl [vmem:[#allocation5 + $0x9] sm:$0x1 pattern:$0x75316420]  ;;  %2358 = vst.msk [vmem:[#allocation6 + $0x3] sm:$0x1] %vm5065_vm2, %v2357_v28  ;;  %2180 = vrot.lane.b32.xlu0 %v2179_v60, %s3361_s9 }
 0x735   :  { %2296 = vst.msk [vmem:[#allocation6 + $0x2] sm:$0x1] %vm5065_vm2, %v2295_v62  ;;  %v2419_v42 = vld [vmem:[#allocation5 + $0x10] sm:$0x1]  ;;  %v2481_v61 = vld [vmem:[#allocation5 + $0x14] sm:$0x1]  ;;  %v2312_v41 = vrot.slane %v3252_v52, %v5062_v25 }
 0x736   :  { %2420 = vst.msk [vmem:[#allocation6 + $0x4] sm:$0x1] %vm5065_vm2, %v2419_v42  ;;  %v3247_v53 = vld.sshfl [vmem:[#allocation5 + $0x2] sm:$0x1 pattern:$0x75316420] }
 0x737   :  { %2482 = vst.msk [vmem:[#allocation6 + $0x5] sm:$0x1] %vm5065_vm2, %v2481_v61  ;;  %2375 = vrot.lane.b32.xlu1 %v2374_v48, %s3361_s9  ;;  %v3258_v58 = vld.sshfl [vmem:[#allocation5 + $0x11] sm:$0x1 pattern:$0x75316420]  ;;  %v2202_v10 = vrot.slane %v3247_v53, %v5062_v25 }
 0x738   :  { %2313 = vrot.lane.b32.xlu0 %v2312_v41, %s3361_s9  ;;  %v2436_v31 = vrot.slane %v3258_v58, %v5062_v25  ;;  %v3253_v20 = vld.sshfl [vmem:[#allocation5 + $0xa] sm:$0x1 pattern:$0x75316420] }
 0x739   :  { %v3250_v16 = vld.sshfl [vmem:[#allocation5 + $0x6] sm:$0x1 pattern:$0x75316420]  ;;  %v2332_v19 = vrot.slane %v3253_v20, %v5062_v25 }
 0x73a   :  { %v2270_v32 = vrot.slane %v3250_v16, %v5062_v25  ;;  %v3259_v44 = vld.sshfl [vmem:[#allocation5 + $0x12] sm:$0x1 pattern:$0x75316420] }
 0x73b   :  { %2203 = vrot.lane.b32.xlu1 %v2202_v10, %s3351_s10  ;;  %v3256_v46 = vld.sshfl [vmem:[#allocation5 + $0xe] sm:$0x1 pattern:$0x75316420]  ;;  %v2456_v56 = vrot.slane %v3259_v44, %v5062_v25 }
 0x73c   :  { %2437 = vrot.lane.b32.xlu0 %v2436_v31, %s3361_s9  ;;  %v2394_v26 = vrot.slane %v3256_v46, %v5062_v25  ;;  %v3251_v55 = vld.sshfl [vmem:[#allocation5 + $0x7] sm:$0x1 pattern:$0x75316420] }
 0x73d   :  { %v3248_v23 = vld.sshfl [vmem:[#allocation5 + $0x3] sm:$0x1 pattern:$0x75316420]  ;;  %v2290_v57 = vrot.slane %v3251_v55, %v5062_v25 }
 0x73e   :  { %v2225_v12 = vrot.slane %v3248_v23, %v5062_v25  ;;  %v3257_v14 = vld.sshfl [vmem:[#allocation5 + $0xf] sm:$0x1 pattern:$0x75316420] }
 0x73f   :  { %2333 = vrot.lane.b32.xlu1 %v2332_v19, %s3351_s10  ;;  %v3254_v45 = vld.sshfl [vmem:[#allocation5 + $0xb] sm:$0x1 pattern:$0x75316420]  ;;  %v2414_v29 = vrot.slane %v3257_v14, %v5062_v25 }
 0x740   :  { %2271 = vrot.lane.b32.xlu0 %v2270_v32, %s3351_s10  ;;  %v2352_v54 = vrot.slane %v3254_v45, %v5062_v25  ;;  %v3261_v22 = vld.sshfl [vmem:[#allocation5 + $0x15] sm:$0x1 pattern:$0x75316420] }
 0x741   :  { %v3260_v15 = vld.sshfl [vmem:[#allocation5 + $0x13] sm:$0x1 pattern:$0x75316420]  ;;  %v2498_v59 = vrot.slane %v3261_v22, %v5062_v25 }
 0x742   :  { %v2476_v37 = vrot.slane %v3260_v15, %v5062_v25 }
 0x743   :  { %2457 = vrot.lane.b32.xlu1 %v2456_v56, %s3351_s10 }
 0x744   :  { %2395 = vrot.lane.b32.xlu0 %v2394_v26, %s3351_s10 }
 0x747   :  { %2291 = vrot.lane.b32.xlu1 %v2290_v57, %s3359_s22 }
 0x748   :  { %2226 = vrot.lane.b32.xlu0 %v2225_v12, %s3359_s22 }
 0x74b   :  { %2415 = vrot.lane.b32.xlu1 %v2414_v29, %s3359_s22 }
 0x74c   :  { %2353 = vrot.lane.b32.xlu0 %v2352_v54, %s3359_s22 }
 0x74f   :  { %2499 = vrot.lane.b32.xlu1 %v2498_v59, %s3361_s9 }
 0x750   :  { %2477 = vrot.lane.b32.xlu0 %v2476_v37, %s3359_s22 }
 0x7a5   :  { %v2252_v33 = vpop.permute.xlu1 %2251 }
 0x7a6   :  { %2254 = vst.msk [vmem:[#allocation6 + $0x1] sm:$0x1] %vm5115_vm5, %v2252_v33  ;;  %v2181_v49 = vpop.permute.xlu0 %2180 }
 0x7a7   :  { %2186 = vst.msk [vmem:[#allocation6] sm:$0x1] %vm5115_vm5, %v2181_v49 }
 0x7a9   :  { %v2376_v43 = vpop.permute.xlu1 %2375 }
 0x7aa   :  { %2378 = vst.msk [vmem:[#allocation6 + $0x3] sm:$0x1] %vm5115_vm5, %v2376_v43  ;;  %v2314_v0 = vpop.permute.xlu0 %2313 }
 0x7ab   :  { %2316 = vst.msk [vmem:[#allocation6 + $0x2] sm:$0x1] %vm5115_vm5, %v2314_v0 }
 0x7ad   :  { %v2204_v24 = vpop.permute.xlu1 %2203 }
 0x7ae   :  { %2209 = vst.msk [vmem:[#allocation6] sm:$0x1] %vm2208_vm8, %v2204_v24  ;;  %v2438_v7 = vpop.permute.xlu0 %2437 }
 0x7af   :  { %2440 = vst.msk [vmem:[#allocation6 + $0x4] sm:$0x1] %vm5115_vm5, %v2438_v7 }
 0x7b1   :  { %v2334_v36 = vpop.permute.xlu1 %2333 }
 0x7b2   :  { %2336 = vst.msk [vmem:[#allocation6 + $0x2] sm:$0x1] %vm2208_vm8, %v2334_v36  ;;  %v2272_v4 = vpop.permute.xlu0 %2271 }
 0x7b3   :  { %2274 = vst.msk [vmem:[#allocation6 + $0x1] sm:$0x1] %vm2208_vm8, %v2272_v4 }
 0x7b5   :  { %v2458_v5 = vpop.permute.xlu1 %2457 }
 0x7b6   :  { %2460 = vst.msk [vmem:[#allocation6 + $0x4] sm:$0x1] %vm2208_vm8, %v2458_v5  ;;  %v2396_v9 = vpop.permute.xlu0 %2395 }
 0x7b7   :  { %2398 = vst.msk [vmem:[#allocation6 + $0x3] sm:$0x1] %vm2208_vm8, %v2396_v9 }
 0x7b9   :  { %v2292_v47 = vpop.permute.xlu1 %2291 }
 0x7ba   :  { %2294 = vst.msk [vmem:[#allocation6 + $0x1] sm:$0x1] %vm2231_vm11, %v2292_v47  ;;  %v2227_v11 = vpop.permute.xlu0 %2226 }
 0x7bb   :  { %2232 = vst.msk [vmem:[#allocation6] sm:$0x1] %vm2231_vm11, %v2227_v11 }
 0x7bd   :  { %v2416_v30 = vpop.permute.xlu1 %2415 }
 0x7be   :  { %2418 = vst.msk [vmem:[#allocation6 + $0x3] sm:$0x1] %vm2231_vm11, %v2416_v30  ;;  %v2354_v1 = vpop.permute.xlu0 %2353 }
 0x7bf   :  { %2356 = vst.msk [vmem:[#allocation6 + $0x2] sm:$0x1] %vm2231_vm11, %v2354_v1 }
 0x7c1   :  { %v2500_v18 = vpop.permute.xlu1 %2499 }
 0x7c2   :  { %2502 = vst.msk [vmem:[#allocation6 + $0x5] sm:$0x1] %vm5115_vm5, %v2500_v18  ;;  %v2478_v2 = vpop.permute.xlu0 %2477 }
 0x7c3   :  { %2480 = vst.msk [vmem:[#allocation6 + $0x4] sm:$0x1] %vm2231_vm11, %v2478_v2 }
 0x7c4   :  { %3343 = dma.done.wait [#allocation3], 24576 }
 0x7c5   :  { %3344 = vsyncadd [#allocation3], 4294942720  ;;  %v2546_v63 = vld [vmem:[#allocation2 + $0x8] sm:$0xff]  ;;  %v2548_v40 = vld [vmem:[#allocation2 + $0x18] sm:$0xff]  ;;  %v2515_v10 = vsub.s32 1, %v5059_v8  ;;  %vm3038_vm12 = vcmp.lt.s32.totalorder %v5292_v39, 512 }
 0x7c6   :  { %v2545_v35 = vld [vmem:[#allocation2] sm:$0xff]  ;;  %2759 = vmatprep.subr.bf16.mxu0 %v2546_v63  ;;  %2882 = vmatprep.subr.bf16.mxu1 %v2548_v40  ;;  %v2547_v51 = vld [vmem:[#allocation2 + $0x10] sm:$0xff]  ;;  %v2550_v27 = vld [vmem:[#allocation2 + $0x28] sm:$0xff]  ;;  %v2511_v40 = vsub.s32 0, %v5059_v8 }
 0x7c7   :  { %v2552_v21 = vld [vmem:[#allocation2 + $0x38] sm:$0xff]  ;;  %2760 = vmatpush1.bf16.msra.mxu0 %v2545_v35  ;;  %2883 = vmatpush1.bf16.msra.mxu1 %v2547_v51  ;;  %v2549_v17 = vld [vmem:[#allocation2 + $0x20] sm:$0xff]  ;;  %v2551_v34 = vld [vmem:[#allocation2 + $0x30] sm:$0xff] }
 0x7c8   :  { %2761 = vmatprep.subr.bf16.mxu0 %v2550_v27  ;;  %2884 = vmatprep.subr.bf16.mxu1 %v2552_v21  ;;  %v2554_v6 = vld [vmem:[#allocation2 + $0x48] sm:$0xff]  ;;  %v2556_v50 = vld [vmem:[#allocation2 + $0x58] sm:$0xff]  ;;  %v2553_v3 = vld [vmem:[#allocation2 + $0x40] sm:$0xff] }
 0x7c9   :  { %v2555_v60 = vld [vmem:[#allocation2 + $0x50] sm:$0xff]  ;;  %v2558_v38 = vld [vmem:[#allocation2 + $0x68] sm:$0xff]  ;;  %v2560_v28 = vld [vmem:[#allocation2 + $0x78] sm:$0xff] }
 0x7ca   :  { %v2557_v52 = vld [vmem:[#allocation2 + $0x60] sm:$0xff]  ;;  %v2559_v62 = vld [vmem:[#allocation2 + $0x70] sm:$0xff]  ;;  %v2562_v42 = vld [vmem:[#allocation2 + $0x88] sm:$0xff] }
 0x7cb   :  { %2762 = vmatpush1.bf16.msra.mxu0 %v2549_v17  ;;  %2885 = vmatpush1.bf16.msra.mxu1 %v2551_v34  ;;  %v2564_v48 = vld [vmem:[#allocation2 + $0x98] sm:$0xff]  ;;  %v2561_v61 = vld [vmem:[#allocation2 + $0x80] sm:$0xff]  ;;  %v2563_v41 = vld [vmem:[#allocation2 + $0x90] sm:$0xff]  ;;  %v2523_v17 = vsub.s32 3, %v5059_v8 }
 0x7cc   :  { %2763 = vmatprep.subr.bf16.mxu0 %v2554_v6  ;;  %2886 = vmatprep.subr.bf16.mxu1 %v2556_v50  ;;  %v2566_v53 = vld [vmem:[#allocation2 + $0xa8] sm:$0xff]  ;;  %v2568_v58 = vld [vmem:[#allocation2 + $0xb8] sm:$0xff]  ;;  %v2565_v31 = vld [vmem:[#allocation2 + $0xa0] sm:$0xff] }
 0x7cd   :  { %v2567_v20 = vld [vmem:[#allocation2 + $0xb0] sm:$0xff]  ;;  %v2570_v16 = vld [vmem:[#allocation2 + $0xc8] sm:$0xff]  ;;  %v2572_v19 = vld [vmem:[#allocation2 + $0xd8] sm:$0xff] }
 0x7ce   :  { %v5136_v32 = vld [vmem:[#allocation6] sm:$0x3f]  ;;  %v2569_v46 = vld [vmem:[#allocation2 + $0xc0] sm:$0xff]  ;;  %v2574_v26 = vld [vmem:[#allocation2 + $0xe8] sm:$0xff] }
 0x7cf   :  { %2764 = vmatpush1.bf16.msra.mxu0 %v2553_v3  ;;  %2887 = vmatpush1.bf16.msra.mxu1 %v2555_v60  ;;  %v2516_v44 = vrot.slane %v5136_v32, %v2515_v10  ;;  %v2571_v56 = vld [vmem:[#allocation2 + $0xd0] sm:$0xff]  ;;  %v2576_v55 = vld [vmem:[#allocation2 + $0xf8] sm:$0xff]  ;;  %v2573_v57 = vld [vmem:[#allocation2 + $0xe0] sm:$0xff]  ;;  %v2512_v34 = vrot.slane %v5136_v32, %v2511_v40 }
 0x7d0   :  { %2765 = vmatprep.subr.bf16.mxu0 %v2558_v38  ;;  %2888 = vmatprep.subr.bf16.mxu1 %v2560_v28  ;;  %v2575_v12 = vld [vmem:[#allocation2 + $0xf0] sm:$0xff]  ;;  %v2578_v14 = vld [vmem:[#allocation2 + $0x108] sm:$0xff]  ;;  %v2580_v45 = vld [vmem:[#allocation2 + $0x118] sm:$0xff]  ;;  %v2524_v38 = vrot.slane %v5136_v32, %v2523_v17 }
 0x7d1   :  { %v2540_v23 = vpack.c.bf16 %v2516_v44, %v2516_v44  ;;  %v2577_v29 = vld [vmem:[#allocation2 + $0x100] sm:$0xff]  ;;  %v2579_v54 = vld [vmem:[#allocation2 + $0x110] sm:$0xff]  ;;  %v2582_v22 = vld [vmem:[#allocation2 + $0x128] sm:$0xff]  ;;  %v2539_v28 = vpack.c.bf16 %v2512_v34, %v2512_v34 }
 0x7d2   :  { %v2584_v15 = vld [vmem:[#allocation2 + $0x138] sm:$0xff]  ;;  %v2581_v59 = vld [vmem:[#allocation2 + $0x120] sm:$0xff]  ;;  %v2583_v37 = vld [vmem:[#allocation2 + $0x130] sm:$0xff] }
 0x7d3   :  { %2766 = vmatpush1.bf16.msra.mxu0 %v2557_v52  ;;  %2889 = vmatpush1.bf16.msra.mxu1 %v2559_v62  ;;  %v2586_v13 = vld [vmem:[#allocation2 + $0x148] sm:$0xff]  ;;  %v2588_v33 = vld [vmem:[#allocation2 + $0x158] sm:$0xff]  ;;  %v2585_v49 = vld [vmem:[#allocation2 + $0x140] sm:$0xff] }
 0x7d4   :  { %2767 = vmatprep.subr.bf16.mxu0 %v2562_v42  ;;  %2890 = vmatprep.subr.bf16.mxu1 %v2564_v48  ;;  %v2587_v43 = vld [vmem:[#allocation2 + $0x150] sm:$0xff]  ;;  %v2590_v0 = vld [vmem:[#allocation2 + $0x168] sm:$0xff]  ;;  %v2592_v24 = vld [vmem:[#allocation2 + $0x178] sm:$0xff] }
 0x7d5   :  { %2791 = vmatprep.mubr.bf16.mxu0 %v2540_v23  ;;  %2914 = vmatprep.mubr.bf16.mxu1 %v2540_v23  ;;  %v2589_v7 = vld [vmem:[#allocation2 + $0x160] sm:$0xff]  ;;  %v2591_v36 = vld [vmem:[#allocation2 + $0x170] sm:$0xff]  ;;  %v2594_v4 = vld [vmem:[#allocation2 + $0x188] sm:$0xff] }
 0x7d6   :  { %v2596_v5 = vld [vmem:[#allocation2 + $0x198] sm:$0xff]  ;;  %v2593_v9 = vld [vmem:[#allocation2 + $0x180] sm:$0xff]  ;;  %v2595_v47 = vld [vmem:[#allocation2 + $0x190] sm:$0xff] }
 0x7d7   :  { %2768 = vmatpush1.bf16.msra.mxu0 %v2561_v61  ;;  %2891 = vmatpush1.bf16.msra.mxu1 %v2563_v41  ;;  %v2598_v11 = vld [vmem:[#allocation2 + $0x1a8] sm:$0xff]  ;;  %v2600_v30 = vld [vmem:[#allocation2 + $0x1b8] sm:$0xff]  ;;  %v2597_v1 = vld [vmem:[#allocation2 + $0x1a0] sm:$0xff]  ;;  %v2542_v61 = vpack.c.bf16 %v2524_v38, %v2524_v38 }
 0x7d8   :  { %2769 = vmatprep.subr.bf16.mxu0 %v2566_v53  ;;  %2892 = vmatprep.subr.bf16.mxu1 %v2568_v58  ;;  %v2599_v18 = vld [vmem:[#allocation2 + $0x1b0] sm:$0xff]  ;;  %v2602_v2 = vld [vmem:[#allocation2 + $0x1c8] sm:$0xff]  ;;  %v2604_v63 = vld [vmem:[#allocation2 + $0x1d8] sm:$0xff] }
 0x7d9   :  { %v2601_v35 = vld [vmem:[#allocation2 + $0x1c0] sm:$0xff]  ;;  %v2603_v51 = vld [vmem:[#allocation2 + $0x1d0] sm:$0xff]  ;;  %v2606_v27 = vld [vmem:[#allocation2 + $0x1e8] sm:$0xff] }
 0x7da   :  { %v2608_v21 = vld [vmem:[#allocation2 + $0x1f8] sm:$0xff]  ;;  %v2605_v6 = vld [vmem:[#allocation2 + $0x1e0] sm:$0xff]  ;;  %v2607_v50 = vld [vmem:[#allocation2 + $0x1f0] sm:$0xff] }
 0x7db   :  { %2770 = vmatpush1.bf16.msra.mxu0 %v2565_v31  ;;  %2893 = vmatpush1.bf16.msra.mxu1 %v2567_v20  ;;  %v2610_v3 = vld [vmem:[#allocation2 + $0x208] sm:$0xff]  ;;  %v2612_v60 = vld [vmem:[#allocation2 + $0x218] sm:$0xff]  ;;  %v2609_v52 = vld [vmem:[#allocation2 + $0x200] sm:$0xff] }
 0x7dc   :  { %2771 = vmatprep.subr.bf16.mxu0 %v2570_v16  ;;  %2894 = vmatprep.subr.bf16.mxu1 %v2572_v19  ;;  %v2611_v62 = vld [vmem:[#allocation2 + $0x210] sm:$0xff]  ;;  %v2614_v42 = vld [vmem:[#allocation2 + $0x228] sm:$0xff]  ;;  %v2616_v48 = vld [vmem:[#allocation2 + $0x238] sm:$0xff] }
 0x7dd   :  { %v2613_v41 = vld [vmem:[#allocation2 + $0x220] sm:$0xff]  ;;  %v2615_v53 = vld [vmem:[#allocation2 + $0x230] sm:$0xff]  ;;  %v2618_v58 = vld [vmem:[#allocation2 + $0x248] sm:$0xff] }
 0x7de   :  { %v2620_v31 = vld [vmem:[#allocation2 + $0x258] sm:$0xff]  ;;  %v2617_v20 = vld [vmem:[#allocation2 + $0x240] sm:$0xff]  ;;  %v2619_v16 = vld [vmem:[#allocation2 + $0x250] sm:$0xff] }
 0x7df   :  { %2772 = vmatpush1.bf16.msra.mxu0 %v2569_v46  ;;  %2895 = vmatpush1.bf16.msra.mxu1 %v2571_v56  ;;  %v2622_v19 = vld [vmem:[#allocation2 + $0x268] sm:$0xff]  ;;  %v2624_v44 = vld [vmem:[#allocation2 + $0x278] sm:$0xff]  ;;  %v2621_v46 = vld [vmem:[#allocation2 + $0x260] sm:$0xff] }
 0x7e0   :  { %2773 = vmatprep.subr.bf16.mxu0 %v2574_v26  ;;  %2896 = vmatprep.subr.bf16.mxu1 %v2576_v55  ;;  %v2623_v56 = vld [vmem:[#allocation2 + $0x270] sm:$0xff]  ;;  %v2626_v26 = vld [vmem:[#allocation2 + $0x288] sm:$0xff]  ;;  %v2628_v55 = vld [vmem:[#allocation2 + $0x298] sm:$0xff] }
 0x7e1   :  { %v2625_v23 = vld [vmem:[#allocation2 + $0x280] sm:$0xff]  ;;  %v2659_v34 = vld [vmem:[#allocation2 + $0x390] sm:$0xff]  ;;  %v2666_v38 = vld [vmem:[#allocation2 + $0x3c8] sm:$0xff] }
 0x7e3   :  { %2774 = vmatpush1.bf16.msra.mxu0 %v2573_v57  ;;  %2897 = vmatpush1.bf16.msra.mxu1 %v2575_v12  ;;  %v2627_v57 = vld [vmem:[#allocation2 + $0x290] sm:$0xff]  ;;  %v2630_v12 = vld [vmem:[#allocation2 + $0x2a8] sm:$0xff] }
 0x7e4   :  { %2775 = vmatprep.subr.bf16.mxu0 %v2578_v14  ;;  %2898 = vmatprep.subr.bf16.mxu1 %v2580_v45  ;;  %v2632_v14 = vld [vmem:[#allocation2 + $0x2b8] sm:$0xff]  ;;  %v2629_v45 = vld [vmem:[#allocation2 + $0x2a0] sm:$0xff] }
 0x7e7   :  { %2776 = vmatpush1.bf16.msra.mxu0 %v2577_v29  ;;  %2899 = vmatpush1.bf16.msra.mxu1 %v2579_v54  ;;  %v2631_v29 = vld [vmem:[#allocation2 + $0x2b0] sm:$0xff]  ;;  %v2634_v54 = vld [vmem:[#allocation2 + $0x2c8] sm:$0xff] }
 0x7e8   :  { %2777 = vmatprep.subr.bf16.mxu0 %v2582_v22  ;;  %2900 = vmatprep.subr.bf16.mxu1 %v2584_v15  ;;  %v2636_v22 = vld [vmem:[#allocation2 + $0x2d8] sm:$0xff]  ;;  %v2633_v15 = vld [vmem:[#allocation2 + $0x2c0] sm:$0xff] }
 0x7eb   :  { %2778 = vmatpush1.bf16.msra.mxu0 %v2581_v59  ;;  %2901 = vmatpush1.bf16.msra.mxu1 %v2583_v37  ;;  %v2635_v59 = vld [vmem:[#allocation2 + $0x2d0] sm:$0xff]  ;;  %v2638_v37 = vld [vmem:[#allocation2 + $0x2e8] sm:$0xff] }
 0x7ec   :  { %2779 = vmatprep.subr.bf16.mxu0 %v2586_v13  ;;  %2902 = vmatprep.subr.bf16.mxu1 %v2588_v33  ;;  %v2640_v13 = vld [vmem:[#allocation2 + $0x2f8] sm:$0xff]  ;;  %v2637_v33 = vld [vmem:[#allocation2 + $0x2e0] sm:$0xff] }
 0x7ef   :  { %2780 = vmatpush1.bf16.msra.mxu0 %v2585_v49  ;;  %2903 = vmatpush1.bf16.msra.mxu1 %v2587_v43  ;;  %v2639_v49 = vld [vmem:[#allocation2 + $0x2f0] sm:$0xff]  ;;  %v2642_v43 = vld [vmem:[#allocation2 + $0x308] sm:$0xff] }
 0x7f0   :  { %2781 = vmatprep.subr.bf16.mxu0 %v2590_v0  ;;  %2904 = vmatprep.subr.bf16.mxu1 %v2592_v24  ;;  %v2644_v0 = vld [vmem:[#allocation2 + $0x318] sm:$0xff]  ;;  %v2641_v24 = vld [vmem:[#allocation2 + $0x300] sm:$0xff] }
 0x7f3   :  { %2782 = vmatpush1.bf16.msra.mxu0 %v2589_v7  ;;  %2905 = vmatpush1.bf16.msra.mxu1 %v2591_v36  ;;  %v2643_v7 = vld [vmem:[#allocation2 + $0x310] sm:$0xff]  ;;  %v2646_v36 = vld [vmem:[#allocation2 + $0x328] sm:$0xff] }
 0x7f4   :  { %2783 = vmatprep.subr.bf16.mxu0 %v2594_v4  ;;  %2906 = vmatprep.subr.bf16.mxu1 %v2596_v5  ;;  %v2648_v4 = vld [vmem:[#allocation2 + $0x338] sm:$0xff]  ;;  %v2645_v5 = vld [vmem:[#allocation2 + $0x320] sm:$0xff] }
 0x7f7   :  { %2784 = vmatpush1.bf16.msra.mxu0 %v2593_v9  ;;  %2907 = vmatpush1.bf16.msra.mxu1 %v2595_v47  ;;  %v2647_v9 = vld [vmem:[#allocation2 + $0x330] sm:$0xff]  ;;  %v2650_v47 = vld [vmem:[#allocation2 + $0x348] sm:$0xff] }
 0x7f8   :  { %2785 = vmatprep.subr.bf16.mxu0 %v2598_v11  ;;  %2908 = vmatprep.subr.bf16.mxu1 %v2600_v30  ;;  %v2652_v11 = vld [vmem:[#allocation2 + $0x358] sm:$0xff]  ;;  %v2649_v30 = vld [vmem:[#allocation2 + $0x340] sm:$0xff] }
 0x7fb   :  { %2786 = vmatpush1.bf16.msra.mxu0 %v2597_v1  ;;  %2909 = vmatpush1.bf16.msra.mxu1 %v2599_v18  ;;  %v2651_v1 = vld [vmem:[#allocation2 + $0x350] sm:$0xff]  ;;  %v2654_v18 = vld [vmem:[#allocation2 + $0x368] sm:$0xff] }
 0x7fc   :  { %2787 = vmatprep.subr.bf16.mxu0 %v2602_v2  ;;  %2910 = vmatprep.subr.bf16.mxu1 %v2604_v63  ;;  %v2656_v2 = vld [vmem:[#allocation2 + $0x378] sm:$0xff]  ;;  %v2653_v63 = vld [vmem:[#allocation2 + $0x360] sm:$0xff] }
 0x7ff   :  { %2788 = vmatpush1.bf16.msra.mxu0 %v2601_v35  ;;  %2911 = vmatpush1.bf16.msra.mxu1 %v2603_v51  ;;  %v2655_v35 = vld [vmem:[#allocation2 + $0x370] sm:$0xff]  ;;  %v2658_v51 = vld [vmem:[#allocation2 + $0x388] sm:$0xff] }
 0x800   :  { %2789 = vmatprep.subr.bf16.mxu0 %v2606_v27  ;;  %2912 = vmatprep.subr.bf16.mxu1 %v2608_v21  ;;  %v2660_v27 = vld [vmem:[#allocation2 + $0x398] sm:$0xff]  ;;  %v2657_v21 = vld [vmem:[#allocation2 + $0x380] sm:$0xff] }
 0x803   :  { %2790 = vmatpush1.bf16.msra.mxu0 %v2605_v6  ;;  %2913 = vmatpush1.bf16.msra.mxu1 %v2607_v50  ;;  %v2662_v6 = vld [vmem:[#allocation2 + $0x3a8] sm:$0xff]  ;;  %v2664_v50 = vld [vmem:[#allocation2 + $0x3b8] sm:$0xff] }
 0x804   :  { %2800 = vmatprep.subr.bf16.mxu0 %v2610_v3  ;;  %2923 = vmatprep.subr.bf16.mxu1 %v2612_v60  ;;  %v2661_v3 = vld [vmem:[#allocation2 + $0x3a0] sm:$0xff]  ;;  %v2663_v60 = vld [vmem:[#allocation2 + $0x3b0] sm:$0xff] }
 0x806   :  { %2792 = vmatmul.mubr.bf16.vlgmr.msra.gmra.mrb[0].mxu0 %v2539_v28  ;;  %2915 = vmatmul.mubr.bf16.vlgmr.msra.gmra.mrb[0].mxu1 %v2539_v28  ;;  %v2668_v28 = vld [vmem:[#allocation2 + $0x3d8] sm:$0xff] }
 0x807   :  { %2801 = vmatpush1.bf16.msra.mxu0 %v2609_v52  ;;  %2924 = vmatpush1.bf16.msra.mxu1 %v2611_v62  ;;  %v2519_v52 = vsub.s32 2, %v5059_v8  ;;  %v2665_v62 = vld [vmem:[#allocation2 + $0x3c0] sm:$0xff] }
 0x808   :  { %2802 = vmatprep.subr.bf16.mxu0 %v2614_v42  ;;  %2925 = vmatprep.subr.bf16.mxu1 %v2616_v48  ;;  %v2667_v42 = vld [vmem:[#allocation2 + $0x3d0] sm:$0xff]  ;;  %v2670_v48 = vld [vmem:[#allocation2 + $0x3e8] sm:$0xff] }
 0x809   :  { %2832 = vmatprep.mubr.bf16.mxu0 %v2542_v61  ;;  %2955 = vmatprep.mubr.bf16.mxu1 %v2542_v61  ;;  %v2672_v61 = vld [vmem:[#allocation2 + $0x3f8] sm:$0xff] }
 0x80b   :  { %2803 = vmatpush1.bf16.msra.mxu0 %v2613_v41  ;;  %2926 = vmatpush1.bf16.msra.mxu1 %v2615_v53  ;;  %v2531_v41 = vsub.s32 5, %v5059_v8  ;;  %v2520_v53 = vrot.slane %v5136_v32, %v2519_v52 }
 0x80c   :  { %2804 = vmatprep.subr.bf16.mxu0 %v2618_v58  ;;  %2927 = vmatprep.subr.bf16.mxu1 %v2620_v31  ;;  %v2669_v58 = vld [vmem:[#allocation2 + $0x3e0] sm:$0xff]  ;;  %v2671_v31 = vld [vmem:[#allocation2 + $0x3f0] sm:$0xff] }
 0x80f   :  { %2805 = vmatpush1.bf16.msra.mxu0 %v2617_v20  ;;  %2928 = vmatpush1.bf16.msra.mxu1 %v2619_v16  ;;  %v2674_v20 = vld [vmem:[#allocation2 + $0x408] sm:$0xff]  ;;  %v2676_v16 = vld [vmem:[#allocation2 + $0x418] sm:$0xff] }
 0x810   :  { %2806 = vmatprep.subr.bf16.mxu0 %v2622_v19  ;;  %2929 = vmatprep.subr.bf16.mxu1 %v2624_v44  ;;  %v2532_v19 = vrot.slane %v5136_v32, %v2531_v41  ;;  %v2541_v44 = vpack.c.bf16 %v2520_v53, %v2520_v53  ;;  %v2724_v41 = vld [vmem:[#allocation2 + $0x598] sm:$0xff]  ;;  %v2721_v53 = vld [vmem:[#allocation2 + $0x580] sm:$0xff] }
 0x813   :  { %2807 = vmatpush1.bf16.msra.mxu0 %v2621_v46  ;;  %2930 = vmatpush1.bf16.msra.mxu1 %v2623_v56  ;;  %v2673_v46 = vld [vmem:[#allocation2 + $0x400] sm:$0xff]  ;;  %v2675_v56 = vld [vmem:[#allocation2 + $0x410] sm:$0xff] }
 0x814   :  { %2808 = vmatprep.subr.bf16.mxu0 %v2626_v26  ;;  %2931 = vmatprep.subr.bf16.mxu1 %v2628_v55  ;;  %v2678_v26 = vld [vmem:[#allocation2 + $0x428] sm:$0xff]  ;;  %v2680_v55 = vld [vmem:[#allocation2 + $0x438] sm:$0xff] }
 0x817   :  { %2809 = vmatpush1.bf16.msra.mxu0 %v2625_v23  ;;  %2932 = vmatpush1.bf16.msra.mxu1 %v2627_v57  ;;  %v2544_v23 = vpack.c.bf16 %v2532_v19, %v2532_v19  ;;  %v2677_v57 = vld [vmem:[#allocation2 + $0x420] sm:$0xff]  ;;  %v2727_v19 = vld [vmem:[#allocation2 + $0x5b0] sm:$0xff] }
 0x818   :  { %2810 = vmatprep.subr.bf16.mxu0 %v2630_v12  ;;  %2933 = vmatprep.subr.bf16.mxu1 %v2632_v14  ;;  %v2679_v12 = vld [vmem:[#allocation2 + $0x430] sm:$0xff]  ;;  %v2682_v14 = vld [vmem:[#allocation2 + $0x448] sm:$0xff] }
 0x81b   :  { %2811 = vmatpush1.bf16.msra.mxu0 %v2629_v45  ;;  %2934 = vmatpush1.bf16.msra.mxu1 %v2631_v29  ;;  %v2684_v45 = vld [vmem:[#allocation2 + $0x458] sm:$0xff]  ;;  %v2681_v29 = vld [vmem:[#allocation2 + $0x440] sm:$0xff] }
 0x81c   :  { %2812 = vmatprep.subr.bf16.mxu0 %v2634_v54  ;;  %2935 = vmatprep.subr.bf16.mxu1 %v2636_v22  ;;  %v2683_v54 = vld [vmem:[#allocation2 + $0x450] sm:$0xff]  ;;  %v2686_v22 = vld [vmem:[#allocation2 + $0x468] sm:$0xff] }
 0x81f   :  { %2813 = vmatpush1.bf16.msra.mxu0 %v2633_v15  ;;  %2936 = vmatpush1.bf16.msra.mxu1 %v2635_v59  ;;  %v2688_v15 = vld [vmem:[#allocation2 + $0x478] sm:$0xff]  ;;  %v2685_v59 = vld [vmem:[#allocation2 + $0x460] sm:$0xff] }
 0x820   :  { %2814 = vmatprep.subr.bf16.mxu0 %v2638_v37  ;;  %2937 = vmatprep.subr.bf16.mxu1 %v2640_v13  ;;  %v2687_v37 = vld [vmem:[#allocation2 + $0x470] sm:$0xff]  ;;  %v2690_v13 = vld [vmem:[#allocation2 + $0x488] sm:$0xff] }
 0x823   :  { %2815 = vmatpush1.bf16.msra.mxu0 %v2637_v33  ;;  %2938 = vmatpush1.bf16.msra.mxu1 %v2639_v49  ;;  %v2692_v33 = vld [vmem:[#allocation2 + $0x498] sm:$0xff]  ;;  %v2689_v49 = vld [vmem:[#allocation2 + $0x480] sm:$0xff] }
 0x824   :  { %2816 = vmatprep.subr.bf16.mxu0 %v2642_v43  ;;  %2939 = vmatprep.subr.bf16.mxu1 %v2644_v0  ;;  %v2691_v43 = vld [vmem:[#allocation2 + $0x490] sm:$0xff]  ;;  %v2694_v0 = vld [vmem:[#allocation2 + $0x4a8] sm:$0xff] }
 0x827   :  { %2817 = vmatpush1.bf16.msra.mxu0 %v2641_v24  ;;  %2940 = vmatpush1.bf16.msra.mxu1 %v2643_v7  ;;  %v2696_v24 = vld [vmem:[#allocation2 + $0x4b8] sm:$0xff]  ;;  %v2693_v7 = vld [vmem:[#allocation2 + $0x4a0] sm:$0xff] }
 0x828   :  { %2818 = vmatprep.subr.bf16.mxu0 %v2646_v36  ;;  %2941 = vmatprep.subr.bf16.mxu1 %v2648_v4  ;;  %v2695_v36 = vld [vmem:[#allocation2 + $0x4b0] sm:$0xff]  ;;  %v2698_v4 = vld [vmem:[#allocation2 + $0x4c8] sm:$0xff] }
 0x82b   :  { %2819 = vmatpush1.bf16.msra.mxu0 %v2645_v5  ;;  %2942 = vmatpush1.bf16.msra.mxu1 %v2647_v9  ;;  %v2700_v5 = vld [vmem:[#allocation2 + $0x4d8] sm:$0xff]  ;;  %v2697_v9 = vld [vmem:[#allocation2 + $0x4c0] sm:$0xff] }
 0x82c   :  { %2820 = vmatprep.subr.bf16.mxu0 %v2650_v47  ;;  %2943 = vmatprep.subr.bf16.mxu1 %v2652_v11  ;;  %v2699_v47 = vld [vmem:[#allocation2 + $0x4d0] sm:$0xff]  ;;  %v2702_v11 = vld [vmem:[#allocation2 + $0x4e8] sm:$0xff] }
 0x82f   :  { %2821 = vmatpush1.bf16.msra.mxu0 %v2649_v30  ;;  %2944 = vmatpush1.bf16.msra.mxu1 %v2651_v1  ;;  %v2704_v30 = vld [vmem:[#allocation2 + $0x4f8] sm:$0xff]  ;;  %v2701_v1 = vld [vmem:[#allocation2 + $0x4e0] sm:$0xff] }
 0x830   :  { %2822 = vmatprep.subr.bf16.mxu0 %v2654_v18  ;;  %2945 = vmatprep.subr.bf16.mxu1 %v2656_v2  ;;  %v2703_v18 = vld [vmem:[#allocation2 + $0x4f0] sm:$0xff]  ;;  %v2706_v2 = vld [vmem:[#allocation2 + $0x508] sm:$0xff] }
 0x833   :  { %2823 = vmatpush1.bf16.msra.mxu0 %v2653_v63  ;;  %2946 = vmatpush1.bf16.msra.mxu1 %v2655_v35  ;;  %v2708_v63 = vld [vmem:[#allocation2 + $0x518] sm:$0xff]  ;;  %v2705_v35 = vld [vmem:[#allocation2 + $0x500] sm:$0xff] }
 0x834   :  { %2824 = vmatprep.subr.bf16.mxu0 %v2658_v51  ;;  %2947 = vmatprep.subr.bf16.mxu1 %v2660_v27  ;;  %v2707_v51 = vld [vmem:[#allocation2 + $0x510] sm:$0xff]  ;;  %v2710_v27 = vld [vmem:[#allocation2 + $0x528] sm:$0xff] }
 0x837   :  { %2825 = vmatpush1.bf16.msra.mxu0 %v2657_v21  ;;  %2948 = vmatpush1.bf16.msra.mxu1 %v2659_v34  ;;  %v2712_v21 = vld [vmem:[#allocation2 + $0x538] sm:$0xff]  ;;  %v2709_v34 = vld [vmem:[#allocation2 + $0x520] sm:$0xff] }
 0x838   :  { %2826 = vmatprep.subr.bf16.mxu0 %v2662_v6  ;;  %2949 = vmatprep.subr.bf16.mxu1 %v2664_v50  ;;  %v2711_v6 = vld [vmem:[#allocation2 + $0x530] sm:$0xff]  ;;  %v2714_v50 = vld [vmem:[#allocation2 + $0x548] sm:$0xff] }
 0x83b   :  { %2827 = vmatpush1.bf16.msra.mxu0 %v2661_v3  ;;  %2950 = vmatpush1.bf16.msra.mxu1 %v2663_v60  ;;  %v2716_v3 = vld [vmem:[#allocation2 + $0x558] sm:$0xff]  ;;  %v2713_v60 = vld [vmem:[#allocation2 + $0x540] sm:$0xff] }
 0x83c   :  { %2828 = vmatprep.subr.bf16.mxu0 %v2666_v38  ;;  %2951 = vmatprep.subr.bf16.mxu1 %v2668_v28  ;;  %v2715_v38 = vld [vmem:[#allocation2 + $0x550] sm:$0xff]  ;;  %v2718_v28 = vld [vmem:[#allocation2 + $0x568] sm:$0xff] }
 0x83f   :  { %2829 = vmatpush1.bf16.msra.mxu0 %v2665_v62  ;;  %2952 = vmatpush1.bf16.msra.mxu1 %v2667_v42  ;;  %v2720_v62 = vld [vmem:[#allocation2 + $0x578] sm:$0xff]  ;;  %v2717_v42 = vld [vmem:[#allocation2 + $0x560] sm:$0xff] }
 0x840   :  { %2830 = vmatprep.subr.bf16.mxu0 %v2670_v48  ;;  %2953 = vmatprep.subr.bf16.mxu1 %v2672_v61  ;;  %v2719_v48 = vld [vmem:[#allocation2 + $0x570] sm:$0xff]  ;;  %v2722_v61 = vld [vmem:[#allocation2 + $0x588] sm:$0xff] }
 0x843   :  { %2831 = vmatpush1.bf16.msra.mxu0 %v2669_v58  ;;  %2954 = vmatpush1.bf16.msra.mxu1 %v2671_v31  ;;  %v2723_v58 = vld [vmem:[#allocation2 + $0x590] sm:$0xff]  ;;  %v2726_v31 = vld [vmem:[#allocation2 + $0x5a8] sm:$0xff] }
 0x844   :  { %2841 = vmatprep.subr.bf16.mxu0 %v2674_v20  ;;  %2964 = vmatprep.subr.bf16.mxu1 %v2676_v16  ;;  %v2728_v20 = vld [vmem:[#allocation2 + $0x5b8] sm:$0xff]  ;;  %v2725_v16 = vld [vmem:[#allocation2 + $0x5a0] sm:$0xff] }
 0x846   :  { %2833 = vmatmul.mubr.bf16.vlgmr.msra.gmra.mrb[0].mxu0 %v2541_v44  ;;  %2956 = vmatmul.mubr.bf16.vlgmr.msra.gmra.mrb[0].mxu1 %v2541_v44  ;;  %v2730_v44 = vld [vmem:[#allocation2 + $0x5c8] sm:$0xff] }
 0x847   :  { %2842 = vmatpush1.bf16.msra.mxu0 %v2673_v46  ;;  %2965 = vmatpush1.bf16.msra.mxu1 %v2675_v56  ;;  %v2732_v46 = vld [vmem:[#allocation2 + $0x5d8] sm:$0xff]  ;;  %v2527_v56 = vsub.s32 4, %v5059_v8 }
 0x848   :  { %2843 = vmatprep.subr.bf16.mxu0 %v2678_v26  ;;  %2966 = vmatprep.subr.bf16.mxu1 %v2680_v55  ;;  %v2729_v26 = vld [vmem:[#allocation2 + $0x5c0] sm:$0xff]  ;;  %v2731_v55 = vld [vmem:[#allocation2 + $0x5d0] sm:$0xff] }
 0x849   :  { %2873 = vmatprep.mubr.bf16.mxu0 %v2544_v23  ;;  %2996 = vmatprep.mubr.bf16.mxu1 %v2544_v23  ;;  %v2734_v23 = vld [vmem:[#allocation2 + $0x5e8] sm:$0xff] }
 0x84b   :  { %2844 = vmatpush1.bf16.msra.mxu0 %v2677_v57  ;;  %2967 = vmatpush1.bf16.msra.mxu1 %v2679_v12  ;;  %v2736_v57 = vld [vmem:[#allocation2 + $0x5f8] sm:$0xff]  ;;  %v2528_v12 = vrot.slane %v5136_v32, %v2527_v56 }
 0x84c   :  { %2845 = vmatprep.subr.bf16.mxu0 %v2682_v14  ;;  %2968 = vmatprep.subr.bf16.mxu1 %v2684_v45  ;;  %v2733_v14 = vld [vmem:[#allocation2 + $0x5e0] sm:$0xff]  ;;  %v2735_v45 = vld [vmem:[#allocation2 + $0x5f0] sm:$0xff] }
 0x84f   :  { %2846 = vmatpush1.bf16.msra.mxu0 %v2681_v29  ;;  %2969 = vmatpush1.bf16.msra.mxu1 %v2683_v54  ;;  %v2543_v29 = vpack.c.bf16 %v2528_v12, %v2528_v12  ;;  %v2737_v54 = vld [vmem:[%s5190_s6] sm:$0xf]  ;;  %s3363_s6 = smov [#allocation11]  }
 0x850   :  { %2847 = vmatprep.subr.bf16.mxu0 %v2686_v22  ;;  %2970 = vmatprep.subr.bf16.mxu1 %v2688_v15  ;;  %v2742_v22 = vrot.slane %v2737_v54, %v2511_v40  ;;  %v2750_v32 = vrot.slane %v2737_v54, %v2519_v52  ;;  %v2746_v15 = vrot.slane %v2737_v54, %v2515_v10  ;;  %s3047_s24 = sshll.u32 %s3363_s6, 4  ;;  %s3048_s24 = int_to_ptr.vmem [resolvable:$true] %s3047_s24 }
 0x851   :  { %s3319_s22 = scalar_lea.vmem %s3048_s24, 64  ;;  %p3324_p6 = scmp.lt.s32.totalorder %s3048_s24, %s3048_s24 }
 0x852   :  { %p3320_p5 = scmp.ne.s32.totalorder %s3048_s24, %s3319_s22  ;;  %p3325_p7 = scmp.lt.s32.totalorder %s3319_s22, %s3319_s22 }
 0x853   :  { %2848 = vmatpush1.bf16.msra.mxu0 %v2685_v59  ;;  %2971 = vmatpush1.bf16.msra.mxu1 %v2687_v37  ;;  %v2754_v59 = vrot.slane %v2737_v54, %v2523_v17 }
 0x854   :  { %2849 = vmatprep.subr.bf16.mxu0 %v2690_v13  ;;  %2972 = vmatprep.subr.bf16.mxu1 %v2692_v33  ;;  %p3326_p8 = por %p3325_p7, %p3324_p6 }
 0x856   :  { %p3327_p9 = pnand %p3326_p8, %p3320_p5 }
 0x857   :  { %2850 = vmatpush1.bf16.msra.mxu0 %v2689_v49  ;;  %2973 = vmatpush1.bf16.msra.mxu1 %v2691_v43 }
 0x858   :  { %2851 = vmatprep.subr.bf16.mxu0 %v2694_v0  ;;  %2974 = vmatprep.subr.bf16.mxu1 %v2696_v24 }
 0x85b   :  { %2852 = vmatpush1.bf16.msra.mxu0 %v2693_v7  ;;  %2975 = vmatpush1.bf16.msra.mxu1 %v2695_v36 }
 0x85c   :  { %2853 = vmatprep.subr.bf16.mxu0 %v2698_v4  ;;  %2976 = vmatprep.subr.bf16.mxu1 %v2700_v5 }
 0x85f   :  { %2854 = vmatpush1.bf16.msra.mxu0 %v2697_v9  ;;  %2977 = vmatpush1.bf16.msra.mxu1 %v2699_v47 }
 0x860   :  { %2855 = vmatprep.subr.bf16.mxu0 %v2702_v11  ;;  %2978 = vmatprep.subr.bf16.mxu1 %v2704_v30 }
 0x863   :  { %2856 = vmatpush1.bf16.msra.mxu0 %v2701_v1  ;;  %2979 = vmatpush1.bf16.msra.mxu1 %v2703_v18 }
 0x864   :  { %2857 = vmatprep.subr.bf16.mxu0 %v2706_v2  ;;  %2980 = vmatprep.subr.bf16.mxu1 %v2708_v63 }
 0x867   :  { %2858 = vmatpush1.bf16.msra.mxu0 %v2705_v35  ;;  %2981 = vmatpush1.bf16.msra.mxu1 %v2707_v51 }
 0x868   :  { %2859 = vmatprep.subr.bf16.mxu0 %v2710_v27  ;;  %2982 = vmatprep.subr.bf16.mxu1 %v2712_v21 }
 0x86b   :  { %2860 = vmatpush1.bf16.msra.mxu0 %v2709_v34  ;;  %2983 = vmatpush1.bf16.msra.mxu1 %v2711_v6 }
 0x86c   :  { %2861 = vmatprep.subr.bf16.mxu0 %v2714_v50  ;;  %2984 = vmatprep.subr.bf16.mxu1 %v2716_v3 }
 0x86f   :  { %2862 = vmatpush1.bf16.msra.mxu0 %v2713_v60  ;;  %2985 = vmatpush1.bf16.msra.mxu1 %v2715_v38 }
 0x870   :  { %2863 = vmatprep.subr.bf16.mxu0 %v2718_v28  ;;  %2986 = vmatprep.subr.bf16.mxu1 %v2720_v62 }
 0x873   :  { %2864 = vmatpush1.bf16.msra.mxu0 %v2717_v42  ;;  %2987 = vmatpush1.bf16.msra.mxu1 %v2719_v48 }
 0x874   :  { %2865 = vmatprep.subr.bf16.mxu0 %v2722_v61  ;;  %2988 = vmatprep.subr.bf16.mxu1 %v2724_v41 }
 0x877   :  { %2866 = vmatpush1.bf16.msra.mxu0 %v2721_v53  ;;  %2989 = vmatpush1.bf16.msra.mxu1 %v2723_v58 }
 0x878   :  { %2867 = vmatprep.subr.bf16.mxu0 %v2726_v31  ;;  %2990 = vmatprep.subr.bf16.mxu1 %v2728_v20 }
 0x87b   :  { %2868 = vmatpush1.bf16.msra.mxu0 %v2725_v16  ;;  %2991 = vmatpush1.bf16.msra.mxu1 %v2727_v19 }
 0x87c   :  { %2869 = vmatprep.subr.bf16.mxu0 %v2730_v44  ;;  %2992 = vmatprep.subr.bf16.mxu1 %v2732_v46 }
 0x87f   :  { %2870 = vmatpush1.bf16.msra.mxu0 %v2729_v26  ;;  %2993 = vmatpush1.bf16.msra.mxu1 %v2731_v55 }
 0x880   :  { %2871 = vmatprep.subr.bf16.mxu0 %v2734_v23  ;;  %2994 = vmatprep.subr.bf16.mxu1 %v2736_v57 }
 0x883   :  { %2872 = vmatpush1.bf16.msra.mxu0 %v2733_v14  ;;  %2995 = vmatpush1.bf16.msra.mxu1 %v2735_v45 }
 0x886   :  { %2874 = vmatmul.mubr.bf16.vlgmr.msra.gmra.mrb[0].mxu0 %v2543_v29  ;;  %2997 = vmatmul.mubr.bf16.vlgmr.msra.gmra.mrb[0].mxu1 %v2543_v29 }
 0x959   :  { %v2875_v37 = vpop.f32.mrb[0].mxu0  ;;  %v2998_v13 = vpop.f32.mrb[0].mxu1 }
 0x95a   :  { %v3263_v33 = vadd.f32 %v2875_v37, %v2742_v22  ;;  %v3265_v49 = vadd.f32 %v2998_v13, %v2750_v32  ;;  %v2877_v43 = vpop.f32.mrb[1].mxu0  ;;  %v3000_v0 = vpop.f32.mrb[1].mxu1 }
 0x95b   :  { %v3264_v24 = vadd.f32 %v2877_v43, %v2746_v15  ;;  %v3266_v7 = vadd.f32 %v3000_v0, %v2754_v59  ;;  %v2879_v36 = vpop.f32.mrb[2].mxu0  ;;  %v3002_v4 = vpop.f32.mrb[2].mxu1 }
 0x95c   :  { %v3005_v40 = vmax.f32 %v3263_v33, 0.0  ;;  %v3007_v5 = vmax.f32 %v3265_v49, 0.0  ;;  %v2880_v9 = vpop.f32.mrb[3].mxu0  ;;  %v3003_v52 = vpop.f32.mrb[3].mxu1 }
 0x95d   :  { %v3006_v47 = vmax.f32 %v3264_v24, 0.0  ;;  %v3008_v11 = vmax.f32 %v3266_v7, 0.0 }
 0x95f   :  { %v3013_v10 = vcombine.low %v3005_v40, %v3006_v47  ;;  %v3014_v30 = vcombine.low %v3007_v5, %v3008_v11 }
 0x961   :  { %v3021_v8 = vrot.slane %v3013_v10, %v5062_v25  ;;  %v3028_v17 = vrot.slane %v3014_v30, %v5062_v25 }
 0x963   :  { %v3029_v1 = vcombine.low %v3021_v8, %v3028_v17 }
 0x965   :  { %v3036_v18 = vrot.slane %v3029_v1, %v5062_v25 }
 0x967   :  { %3040 = vst.msk [vmem:[#allocation11] sm:$0xf] %vm3038_vm12, %v3036_v18 }
 0x968   :  { %3330 = shalt.err (!%p3327_p9)
}
 0x969   :  { %s3331_s1 = scalar_lea.hbm %s5191_s7, 64 }
 0x96a   :  { %p3332_p10 = scmp.ne.s32.totalorder %s5191_s7, %s3331_s1  ;;  %p3335_p11 = scmp.lt.u32.totalorder %s3331_s1, %s5191_s7 }
 0x96c   :  { %p3337_p12 = pnand %p3335_p11, %p3332_p10 }
 0x96e   :  { %3340 = shalt.err (!%p3337_p12)
}
 0x96f   :  { %3050 = dma.vmem_to_hbm [thread:$0]  %s3048_s24, 64, %s5191_s7, [#allocation9]  }
 0x970   :  { %3345 = dma.done.wait [#allocation9], 64  }
 0x971   :  { %3346 = vsyncadd [#allocation9], 4294967232 }
 0x972   :  { %3054 = vsyncpa [#allocation9], 1 }
 0x973   :  { %3055 = vsyncpa [#allocation10], 1 }
 0x974   :  { %3056 = vsyncmov [#allocation3] }
 0x977   :  { %s3057_s0 = vpop.sfrf %3056 }
 0x978   :  { %p3262_p13 = scmp.ne.s32.totalorder %s3057_s0, 0 }
 0x97a   :  { %3061 = shalt.err (%p3262_p13)  }

</bundles_post_ra>
